<compile_context>
chip_gen: v7x
topology: tpu7x:2x2x1
jax: 0.10.0
libtpu: 0.0.40
codegen_flags: <defaults>
</compile_context>

<pallas_src>
import jax
import jax.numpy as jnp
import numpy as np
from jax import lax
from jax.experimental import pallas as pl
from jax.experimental.pallas import tpu as pltpu

B_TILE = 8  # f32 sublane count; batch is padded/tiled to a multiple of this.


def decoder_kernel(feat_ref, emb_ref,
                   w1f_ref, w1x_ref, whh1_ref, b1_ref,
                   w2f_ref, w2x_ref, whh2_ref, b2_ref,
                   wlin_ref, blin_ref,
                   out_ref,
                   h_ref, c_ref, xg_ref, seq_ref):
    """One (batch-tile, vocab-tile) grid step.

    The two stacked LSTMs over time run only at vocab-tile 0 (their result
    persists in seq_ref scratch); every grid step emits one lane-dense
    (T*8, Vt) logits tile.
    """
    bt, E = h_ref.shape                       # (8, E)
    T = xg_ref.shape[0] // bt
    f32 = jnp.float32
    mmd = whh1_ref.dtype                      # matmul operand dtype (f32 / bf16)

    @pl.when(pl.program_id(1) == 0)
    def _recurrence():
        feat = feat_ref[...]                  # (8, E)
        # Loop-invariant: feature half of concat([feat, x]) @ W_ih, bias folded.
        fg1 = jnp.dot(feat, w1f_ref[...], preferred_element_type=f32) + b1_ref[...]
        fg2 = jnp.dot(feat, w2f_ref[...], preferred_element_type=f32) + b2_ref[...]
        whh1 = whh1_ref[...]                  # hoisted loads (loop-invariant)
        whh2 = whh2_ref[...]

        # Big time-batched input GEMM for LSTM-1: (T*8, E) @ (E, 4E).
        xg_ref[...] = jnp.dot(emb_ref[...], w1x_ref[...],
                              preferred_element_type=f32)

        h_ref[...] = jnp.zeros_like(h_ref)
        c_ref[...] = jnp.zeros_like(c_ref)

        unroll = True if T <= 32 else 8

        def run_lstm(fg, whh):
            def step(t, carry):
                r = pl.multiple_of(t * bt, bt)
                pre = (xg_ref[pl.ds(r, bt), :] + fg
                       + jnp.dot(h_ref[...].astype(mmd), whh,
                                 preferred_element_type=f32))      # (8, 4E)
                i = jax.nn.sigmoid(pre[:, 0 * E:1 * E])
                f = jax.nn.sigmoid(pre[:, 1 * E:2 * E])
                g = jnp.tanh(pre[:, 2 * E:3 * E])
                o = jax.nn.sigmoid(pre[:, 3 * E:4 * E])
                c = f * c_ref[...] + i * g
                h = o * jnp.tanh(c)
                c_ref[...] = c
                h_ref[...] = h
                seq_ref[pl.ds(r, bt), :] = h
                return carry
            lax.fori_loop(0, T, step, 0, unroll=unroll)

        # LSTM 1 (zero initial state); writes its hidden sequence into seq_ref.
        run_lstm(fg1, whh1)

        # LSTM-2 input GEMM from LSTM-1's output sequence (reuses xg_ref).
        xg_ref[...] = jnp.dot(seq_ref[...].astype(mmd), w2x_ref[...],
                              preferred_element_type=f32)

        # LSTM 2 seeded with LSTM 1's final (h, c) already held in h_ref/c_ref.
        run_lstm(fg2, whh2)                   # overwrites seq_ref with h2 sequence

    # Vocab-tiled projection: one lane-dense (T*8, Vt) slab per grid step.
    out_ref[...] = (jnp.dot(seq_ref[...].astype(mmd), wlin_ref[...],
                            preferred_element_type=f32) + blin_ref[...])


def decoder_forward(features, caption, params, *, matmul_dtype=jnp.float32,
                    vocab_tile=1024):
    """features: (B, E) f32; caption: (B, T) int32 -> logits (B, T, V) f32."""
    B, T = caption.shape
    E = params["embed"].shape[1]
    V = params["w_lin"].shape[1]
    f32 = jnp.float32
    mmd = matmul_dtype

    # --- batch tiling ---
    NB = pl.cdiv(B, B_TILE)
    B_pad = NB * B_TILE
    padb = B_pad - B

    # --- vocab tiling (lane-dense, multiple of 128) ---
    V128 = ((V + 127) // 128) * 128
    Vt = min(V128, vocab_tile)
    V_pad = ((V128 + Vt - 1) // Vt) * Vt
    NV = V_pad // Vt
    padv = V_pad - V

    # Embedding lookup (glue: gather in plain JAX), pad batch to a tile multiple.
    emb = jnp.take(params["embed"], caption, axis=0).astype(f32)   # (B, T, E)
    feat = features.astype(f32)
    if padb:
        emb = jnp.pad(emb, ((0, padb), (0, 0), (0, 0)))
        feat = jnp.pad(feat, ((0, padb), (0, 0)))

    # (NB, T*B_TILE, E); row t*B_TILE + j of tile n is batch n*B_TILE + j, time t.
    emb = (emb.reshape(NB, B_TILE, T, E).transpose(0, 2, 1, 3)
              .reshape(NB, T * B_TILE, E).astype(mmd))
    feat = feat.reshape(NB, B_TILE, E).astype(mmd)

    # Split concat-weights into feature / sequence halves (hoists in-kernel slicing).
    w1f, w1x = params["w_ih1"][:E].astype(mmd), params["w_ih1"][E:].astype(mmd)
    w2f, w2x = params["w_ih2"][:E].astype(mmd), params["w_ih2"][E:].astype(mmd)
    whh1 = params["w_hh1"].astype(mmd)
    whh2 = params["w_hh2"].astype(mmd)
    b1 = params["b1"].astype(f32)
    b2 = params["b2"].astype(f32)
    wlin = params["w_lin"].astype(mmd)
    blin = params["b_lin"].astype(f32)
    if padv:
        wlin = jnp.pad(wlin, ((0, 0), (0, padv)))
        blin = jnp.pad(blin, ((0, 0), (0, padv)))

    full = lambda a: pl.BlockSpec(a.shape, lambda n, v, nd=a.ndim: (0,) * nd)
    btile = lambda rows, cols: pl.BlockSpec((None, rows, cols),
                                            lambda n, v: (n, 0, 0))

    out = pl.pallas_call(
        decoder_kernel,
        out_shape=jax.ShapeDtypeStruct((NB, T * B_TILE, V_pad), f32),
        grid=(NB, NV),
        in_specs=[
            btile(B_TILE, E),                 # features     (per batch tile)
            btile(T * B_TILE, E),             # embeddings   (per batch tile)
            full(w1f), full(w1x), full(whh1), full(b1),
            full(w2f), full(w2x), full(whh2), full(b2),
            pl.BlockSpec((E, Vt), lambda n, v: (0, v)),     # w_lin vocab tile
            pl.BlockSpec((1, Vt), lambda n, v: (0, v)),     # b_lin vocab tile
        ],
        out_specs=pl.BlockSpec((None, T * B_TILE, Vt), lambda n, v: (n, 0, v)),
        scratch_shapes=[
            pltpu.VMEM((B_TILE, E), f32),             # h (carried L1 -> L2)
            pltpu.VMEM((B_TILE, E), f32),             # c (carried L1 -> L2)
            pltpu.VMEM((T * B_TILE, 4 * E), f32),     # gate preacts (reused L1/L2)
            pltpu.VMEM((T * B_TILE, E), f32),         # hidden seq (persists over v)
        ],
        compiler_params=pltpu.CompilerParams(
            dimension_semantics=("parallel", "arbitrary"),  # batch || , vocab seq
            vmem_limit_bytes=64 * 1024 * 1024,
        ),
    )(feat, emb, w1f, w1x, whh1, b1, w2f, w2x, whh2, b2, wlin, blin)

    out = (out.reshape(NB, T, B_TILE, V_pad).transpose(0, 2, 1, 3)
              .reshape(B_pad, T, V_pad))
    return out[:B, :, :V]


# ----------------------- pure-JAX reference -----------------------
def _lstm_ref(x_seq, h0, c0, w_ih, w_hh, b, E):
    def step(carry, x):
        h, c = carry
        pre = x @ w_ih + h @ w_hh + b
        i = jax.nn.sigmoid(pre[:, :E])
        f = jax.nn.sigmoid(pre[:, E:2 * E])
        g = jnp.tanh(pre[:, 2 * E:3 * E])
        o = jax.nn.sigmoid(pre[:, 3 * E:])
        c = f * c + i * g
        h = o * jnp.tanh(c)
        return (h, c), h
    (hT, cT), ys = lax.scan(step, (h0, c0), x_seq)
    return ys, hT, cT


def decoder_reference(features, caption, params):
    B, T = caption.shape
    E = params["embed"].shape[1]
    emb = jnp.take(params["embed"], caption, axis=0)       # (B, T, E)
    emb_tm = jnp.transpose(emb, (1, 0, 2))                 # (T, B, E)
    feat_seq = jnp.broadcast_to(features[None], (T, B, E))

    z = jnp.zeros((B, E), jnp.float32)
    x1 = jnp.concatenate([feat_seq, emb_tm], axis=-1)      # (T, B, 2E)
    y1, h1, c1 = _lstm_ref(x1, z, z, params["w_ih1"], params["w_hh1"], params["b1"], E)
    x2 = jnp.concatenate([feat_seq, y1], axis=-1)
    y2, _, _ = _lstm_ref(x2, h1, c1, params["w_ih2"], params["w_hh2"], params["b2"], E)
    out = y2 @ params["w_lin"] + params["b_lin"]           # (T, B, V)
    return jnp.transpose(out, (1, 0, 2))


def _make_inputs(key, B, T, E, V):
    ks = jax.random.split(key, 12)
    u = lambda k, shape, s=0.1: jax.random.uniform(k, shape, jnp.float32, -s, s)
    params = {
        "embed": u(ks[0], (V, E), 1.0),                    # nn.Embedding(V, E)
        "w_ih1": u(ks[1], (2 * E, 4 * E)),                 # LSTM1 W_ih^T
        "w_hh1": u(ks[2], (E, 4 * E)),                     # LSTM1 W_hh^T
        "b1":    u(ks[3], (1, 4 * E)),                     # b_ih + b_hh combined
        "w_ih2": u(ks[4], (2 * E, 4 * E)),
        "w_hh2": u(ks[5], (E, 4 * E)),
        "b2":    u(ks[6], (1, 4 * E)),
        "w_lin": u(ks[7], (E, V)),                         # Linear(E, V) weight^T
        "b_lin": u(ks[8], (1, V)),
    }
    features = jax.random.normal(ks[9], (B, E), jnp.float32)
    caption = jax.random.randint(ks[10], (B, T), 0, V)
    return params, features, caption


if __name__ == "__main__":
    B, T, E, V = 2, 8, 32, 128                             # batch, seq, embed, vocab
    params, features, caption = _make_inputs(jax.random.PRNGKey(0), B, T, E, V)

    # f32 path
    out = decoder_forward(features, caption, params)
    jax.block_until_ready(out)
    assert out.shape == (B, T, V) and out.dtype == jnp.float32
    ref = decoder_reference(features, caption, params)
    np.testing.assert_allclose(np.asarray(out), np.asarray(ref), rtol=1e-3, atol=1e-3)

    # bf16 MXU-operand path (v6e/v7x fast path); accumulation stays f32.
    out_bf16 = decoder_forward(features, caption, params, matmul_dtype=jnp.bfloat16)
    jax.block_until_ready(out_bf16)
    np.testing.assert_allclose(np.asarray(out_bf16), np.asarray(ref),
                               rtol=5e-2, atol=5e-2)

    # Batch that is not a tile multiple and needs a 2-wide (parallel) grid.
    B2 = 10
    params2, features2, caption2 = _make_inputs(jax.random.PRNGKey(1), B2, T, E, V)
    out2 = decoder_forward(features2, caption2, params2)
    jax.block_until_ready(out2)
    ref2 = decoder_reference(features2, caption2, params2)
    np.testing.assert_allclose(np.asarray(out2), np.asarray(ref2), rtol=1e-3, atol=1e-3)

    # Vocab larger than the tile and not a multiple of 128 -> exercises the
    # vocab-streamed projection (NV > 1) plus vocab padding.
    B3, T3, V3 = 4, 6, 300
    params3, features3, caption3 = _make_inputs(jax.random.PRNGKey(2), B3, T3, E, V3)
    out3 = decoder_forward(features3, caption3, params3, vocab_tile=128)
    jax.block_until_ready(out3)
    assert out3.shape == (B3, T3, V3)
    ref3 = decoder_reference(features3, caption3, params3)
    np.testing.assert_allclose(np.asarray(out3), np.asarray(ref3), rtol=1e-3, atol=1e-3)

    print("KERNEL_OK")
</pallas_src>

<mosaic_0001>
module attributes {stable_mosaic.version = 11 : i64} {
  func.func @decoder_kernel(%arg0: i32, %arg1: i32, %arg2: memref<1x8x32xf32, #tpu.memory_space<vmem>>, %arg3: memref<1x64x32xf32, #tpu.memory_space<vmem>>, %arg4: memref<32x128xf32, #tpu.memory_space<vmem>>, %arg5: memref<32x128xf32, #tpu.memory_space<vmem>>, %arg6: memref<32x128xf32, #tpu.memory_space<vmem>>, %arg7: memref<1x128xf32, #tpu.memory_space<vmem>>, %arg8: memref<32x128xf32, #tpu.memory_space<vmem>>, %arg9: memref<32x128xf32, #tpu.memory_space<vmem>>, %arg10: memref<32x128xf32, #tpu.memory_space<vmem>>, %arg11: memref<1x128xf32, #tpu.memory_space<vmem>>, %arg12: memref<32x128xf32, #tpu.memory_space<vmem>>, %arg13: memref<1x128xf32, #tpu.memory_space<vmem>>, %arg14: memref<1x64x128xf32, #tpu.memory_space<vmem>>, %arg15: memref<8x32xf32, #tpu.memory_space<vmem>>, %arg16: memref<8x32xf32, #tpu.memory_space<vmem>>, %arg17: memref<64x128xf32, #tpu.memory_space<vmem>>, %arg18: memref<64x32xf32, #tpu.memory_space<vmem>>) attributes {dimension_semantics = [#tpu.dimension_semantics<parallel>, #tpu.dimension_semantics<arbitrary>], iteration_bounds = array<i64: 1, 1>, scalar_prefetch = 0 : i64, scratch_operands = 4 : i64, tpu.core_type = #tpu.core_type<tc>, window_params = [{transform_indices = @transform_0, window_bounds = array<i64: 1, 8, 32>}, {transform_indices = @transform_1, window_bounds = array<i64: 1, 64, 32>}, {pipeline_mode = #tpu.pipeline_mode<synchronous>, transform_indices = @transform_2, window_bounds = array<i64: 32, 128>}, {pipeline_mode = #tpu.pipeline_mode<synchronous>, transform_indices = @transform_3, window_bounds = array<i64: 32, 128>}, {pipeline_mode = #tpu.pipeline_mode<synchronous>, transform_indices = @transform_4, window_bounds = array<i64: 32, 128>}, {pipeline_mode = #tpu.pipeline_mode<synchronous>, transform_indices = @transform_5, window_bounds = array<i64: 1, 128>}, {pipeline_mode = #tpu.pipeline_mode<synchronous>, transform_indices = @transform_6, window_bounds = array<i64: 32, 128>}, {pipeline_mode = #tpu.pipeline_mode<synchronous>, transform_indices = @transform_7, window_bounds = array<i64: 32, 128>}, {pipeline_mode = #tpu.pipeline_mode<synchronous>, transform_indices = @transform_8, window_bounds = array<i64: 32, 128>}, {pipeline_mode = #tpu.pipeline_mode<synchronous>, transform_indices = @transform_9, window_bounds = array<i64: 1, 128>}, {transform_indices = @transform_10, window_bounds = array<i64: 32, 128>}, {transform_indices = @transform_11, window_bounds = array<i64: 1, 128>}, {transform_indices = @transform_12, window_bounds = array<i64: 1, 64, 128>}]} {
    %c0_i32 = arith.constant 0 : i32
    %0 = arith.cmpi eq, %arg1, %c0_i32 : i32
    %1 = arith.extui %0 : i1 to i32
    %c0_i32_0 = arith.constant 0 : i32
    %2 = arith.cmpi ne, %1, %c0_i32_0 : i32
    scf.if %2 {
      %c0_9 = arith.constant 0 : index
      %c0_10 = arith.constant 0 : index
      %c0_11 = arith.constant 0 : index
      %12 = vector.load %arg2[%c0_9, %c0_10, %c0_11] : memref<1x8x32xf32, #tpu.memory_space<vmem>>, vector<1x8x32xf32>
      %13 = vector.shape_cast %12 : vector<1x8x32xf32> to vector<8x32xf32>
      %c0_12 = arith.constant 0 : index
      %c0_13 = arith.constant 0 : index
      %14 = vector.load %arg4[%c0_12, %c0_13] : memref<32x128xf32, #tpu.memory_space<vmem>>, vector<32x128xf32>
      %cst_14 = arith.constant dense<0.000000e+00> : vector<8x128xf32>
      %15 = tpu.matmul %13, %14, %cst_14 {dimension_numbers = #tpu.dot_dimension_numbers<[1], [0], [0], [1], [0, 0, 1, 1], [], []>} : vector<8x32xf32>, vector<32x128xf32>, vector<8x128xf32> -> vector<8x128xf32>
      %c0_15 = arith.constant 0 : index
      %c0_16 = arith.constant 0 : index
      %16 = vector.load %arg7[%c0_15, %c0_16] : memref<1x128xf32, #tpu.memory_space<vmem>>, vector<1x128xf32>
      %17 = vector.broadcast %16 : vector<1x128xf32> to vector<8x128xf32>
      %18 = arith.addf %15, %17 : vector<8x128xf32>
      %c0_17 = arith.constant 0 : index
      %c0_18 = arith.constant 0 : index
      %19 = vector.load %arg8[%c0_17, %c0_18] : memref<32x128xf32, #tpu.memory_space<vmem>>, vector<32x128xf32>
      %cst_19 = arith.constant dense<0.000000e+00> : vector<8x128xf32>
      %20 = tpu.matmul %13, %19, %cst_19 {dimension_numbers = #tpu.dot_dimension_numbers<[1], [0], [0], [1], [0, 0, 1, 1], [], []>} : vector<8x32xf32>, vector<32x128xf32>, vector<8x128xf32> -> vector<8x128xf32>
      %c0_20 = arith.constant 0 : index
      %c0_21 = arith.constant 0 : index
      %21 = vector.load %arg11[%c0_20, %c0_21] : memref<1x128xf32, #tpu.memory_space<vmem>>, vector<1x128xf32>
      %22 = vector.broadcast %21 : vector<1x128xf32> to vector<8x128xf32>
      %23 = arith.addf %20, %22 : vector<8x128xf32>
      %c0_22 = arith.constant 0 : index
      %c0_23 = arith.constant 0 : index
      %24 = vector.load %arg6[%c0_22, %c0_23] : memref<32x128xf32, #tpu.memory_space<vmem>>, vector<32x128xf32>
      %c0_24 = arith.constant 0 : index
      %c0_25 = arith.constant 0 : index
      %25 = vector.load %arg10[%c0_24, %c0_25] : memref<32x128xf32, #tpu.memory_space<vmem>>, vector<32x128xf32>
      %c0_26 = arith.constant 0 : index
      %c0_27 = arith.constant 0 : index
      %c0_28 = arith.constant 0 : index
      %26 = vector.load %arg3[%c0_26, %c0_27, %c0_28] : memref<1x64x32xf32, #tpu.memory_space<vmem>>, vector<1x64x32xf32>
      %27 = vector.shape_cast %26 : vector<1x64x32xf32> to vector<64x32xf32>
      %c0_29 = arith.constant 0 : index
      %c0_30 = arith.constant 0 : index
      %28 = vector.load %arg5[%c0_29, %c0_30] : memref<32x128xf32, #tpu.memory_space<vmem>>, vector<32x128xf32>
      %cst_31 = arith.constant dense<0.000000e+00> : vector<64x128xf32>
      %29 = tpu.matmul %27, %28, %cst_31 {dimension_numbers = #tpu.dot_dimension_numbers<[1], [0], [0], [1], [0, 0, 1, 1], [], []>} : vector<64x32xf32>, vector<32x128xf32>, vector<64x128xf32> -> vector<64x128xf32>
      %c0_32 = arith.constant 0 : index
      %c0_33 = arith.constant 0 : index
      %30 = vector.load %arg17[%c0_32, %c0_33] : memref<64x128xf32, #tpu.memory_space<vmem>>, vector<64x128xf32>
      tpu.vector_store %arg17[%c0_32, %c0_33], %29 {strides = array<i32>} : memref<64x128xf32, #tpu.memory_space<vmem>>, vector<64x128xf32>,
      %cst_34 = arith.constant 0.000000e+00 : f32
      %31 = vector.broadcast %cst_34 : f32 to vector<8x32xf32>
      %c0_35 = arith.constant 0 : index
      %c0_36 = arith.constant 0 : index
      %32 = vector.load %arg15[%c0_35, %c0_36] : memref<8x32xf32, #tpu.memory_space<vmem>>, vector<8x32xf32>
      tpu.vector_store %arg15[%c0_35, %c0_36], %31 {strides = array<i32>} : memref<8x32xf32, #tpu.memory_space<vmem>>, vector<8x32xf32>,
      %cst_37 = arith.constant 0.000000e+00 : f32
      %33 = vector.broadcast %cst_37 : f32 to vector<8x32xf32>
      %c0_38 = arith.constant 0 : index
      %c0_39 = arith.constant 0 : index
      %34 = vector.load %arg16[%c0_38, %c0_39] : memref<8x32xf32, #tpu.memory_space<vmem>>, vector<8x32xf32>
      tpu.vector_store %arg16[%c0_38, %c0_39], %33 {strides = array<i32>} : memref<8x32xf32, #tpu.memory_space<vmem>>, vector<8x32xf32>,
      %c0_i32_40 = arith.constant 0 : i32
      %c8_i32 = arith.constant 8 : i32
      %35 = arith.muli %c0_i32_40, %c8_i32 : i32
      %36 = tpu.assume_multiple %35, 8 : i32
      %37 = arith.index_cast %36 : i32 to index
      %c0_41 = arith.constant 0 : index
      %38 = vector.load %arg17[%37, %c0_41] : memref<64x128xf32, #tpu.memory_space<vmem>>, vector<8x128xf32>
      %39 = arith.addf %38, %18 : vector<8x128xf32>
      %c0_42 = arith.constant 0 : index
      %c0_43 = arith.constant 0 : index
      %40 = vector.load %arg15[%c0_42, %c0_43] : memref<8x32xf32, #tpu.memory_space<vmem>>, vector<8x32xf32>
      %cst_44 = arith.constant dense<0.000000e+00> : vector<8x128xf32>
      %41 = tpu.matmul %40, %24, %cst_44 {dimension_numbers = #tpu.dot_dimension_numbers<[1], [0], [0], [1], [0, 0, 1, 1], [], []>} : vector<8x32xf32>, vector<32x128xf32>, vector<8x128xf32> -> vector<8x128xf32>
      %42 = arith.addf %39, %41 : vector<8x128xf32>
      %43 = vector.extract_strided_slice %42 {offsets = [0, 0], sizes = [8, 32], strides = [1, 1]} : vector<8x128xf32> to vector<8x32xf32>
      %44 = arith.negf %43 : vector<8x32xf32>
      %45 = math.exp %44 : vector<8x32xf32>
      %cst_45 = arith.constant 1.000000e+00 : f32
      %46 = vector.broadcast %cst_45 : f32 to vector<8x32xf32>
      %47 = arith.addf %46, %45 : vector<8x32xf32>
      %48 = arith.divf %46, %47 : vector<8x32xf32>
      %49 = vector.extract_strided_slice %42 {offsets = [0, 32], sizes = [8, 32], strides = [1, 1]} : vector<8x128xf32> to vector<8x32xf32>
      %50 = arith.negf %49 : vector<8x32xf32>
      %51 = math.exp %50 : vector<8x32xf32>
      %cst_46 = arith.constant 1.000000e+00 : f32
      %52 = vector.broadcast %cst_46 : f32 to vector<8x32xf32>
      %53 = arith.addf %52, %51 : vector<8x32xf32>
      %54 = arith.divf %52, %53 : vector<8x32xf32>
      %55 = vector.extract_strided_slice %42 {offsets = [0, 64], sizes = [8, 32], strides = [1, 1]} : vector<8x128xf32> to vector<8x32xf32>
      %56 = math.tanh %55 : vector<8x32xf32>
      %57 = vector.extract_strided_slice %42 {offsets = [0, 96], sizes = [8, 32], strides = [1, 1]} : vector<8x128xf32> to vector<8x32xf32>
      %58 = arith.negf %57 : vector<8x32xf32>
      %59 = math.exp %58 : vector<8x32xf32>
      %cst_47 = arith.constant 1.000000e+00 : f32
      %60 = vector.broadcast %cst_47 : f32 to vector<8x32xf32>
      %61 = arith.addf %60, %59 : vector<8x32xf32>
      %62 = arith.divf %60, %61 : vector<8x32xf32>
      %c0_48 = arith.constant 0 : index
      %c0_49 = arith.constant 0 : index
      %63 = vector.load %arg16[%c0_48, %c0_49] : memref<8x32xf32, #tpu.memory_space<vmem>>, vector<8x32xf32>
      %64 = arith.mulf %54, %63 : vector<8x32xf32>
      %65 = arith.mulf %48, %56 : vector<8x32xf32>
      %66 = arith.addf %64, %65 : vector<8x32xf32>
      %67 = math.tanh %66 : vector<8x32xf32>
      %68 = arith.mulf %62, %67 : vector<8x32xf32>
      %c0_50 = arith.constant 0 : index
      %c0_51 = arith.constant 0 : index
      %69 = vector.load %arg16[%c0_50, %c0_51] : memref<8x32xf32, #tpu.memory_space<vmem>>, vector<8x32xf32>
      tpu.vector_store %arg16[%c0_50, %c0_51], %66 {strides = array<i32>} : memref<8x32xf32, #tpu.memory_space<vmem>>, vector<8x32xf32>,
      %c0_52 = arith.constant 0 : index
      %c0_53 = arith.constant 0 : index
      %70 = vector.load %arg15[%c0_52, %c0_53] : memref<8x32xf32, #tpu.memory_space<vmem>>, vector<8x32xf32>
      tpu.vector_store %arg15[%c0_52, %c0_53], %68 {strides = array<i32>} : memref<8x32xf32, #tpu.memory_space<vmem>>, vector<8x32xf32>,
      %71 = arith.index_cast %36 : i32 to index
      %c0_54 = arith.constant 0 : index
      %72 = vector.load %arg18[%71, %c0_54] : memref<64x32xf32, #tpu.memory_space<vmem>>, vector<8x32xf32>
      tpu.vector_store %arg18[%71, %c0_54], %68 {strides = array<i32>} : memref<64x32xf32, #tpu.memory_space<vmem>>, vector<8x32xf32>,
      %c1_i32 = arith.constant 1 : i32
      %c8_i32_55 = arith.constant 8 : i32
      %73 = arith.muli %c1_i32, %c8_i32_55 : i32
      %74 = tpu.assume_multiple %73, 8 : i32
      %75 = arith.index_cast %74 : i32 to index
      %c0_56 = arith.constant 0 : index
      %76 = vector.load %arg17[%75, %c0_56] : memref<64x128xf32, #tpu.memory_space<vmem>>, vector<8x128xf32>
      %77 = arith.addf %76, %18 : vector<8x128xf32>
      %c0_57 = arith.constant 0 : index
      %c0_58 = arith.constant 0 : index
      %78 = vector.load %arg15[%c0_57, %c0_58] : memref<8x32xf32, #tpu.memory_space<vmem>>, vector<8x32xf32>
      %cst_59 = arith.constant dense<0.000000e+00> : vector<8x128xf32>
      %79 = tpu.matmul %78, %24, %cst_59 {dimension_numbers = #tpu.dot_dimension_numbers<[1], [0], [0], [1], [0, 0, 1, 1], [], []>} : vector<8x32xf32>, vector<32x128xf32>, vector<8x128xf32> -> vector<8x128xf32>
      %80 = arith.addf %77, %79 : vector<8x128xf32>
      %81 = vector.extract_strided_slice %80 {offsets = [0, 0], sizes = [8, 32], strides = [1, 1]} : vector<8x128xf32> to vector<8x32xf32>
      %82 = arith.negf %81 : vector<8x32xf32>
      %83 = math.exp %82 : vector<8x32xf32>
      %cst_60 = arith.constant 1.000000e+00 : f32
      %84 = vector.broadcast %cst_60 : f32 to vector<8x32xf32>
      %85 = arith.addf %84, %83 : vector<8x32xf32>
      %86 = arith.divf %84, %85 : vector<8x32xf32>
      %87 = vector.extract_strided_slice %80 {offsets = [0, 32], sizes = [8, 32], strides = [1, 1]} : vector<8x128xf32> to vector<8x32xf32>
      %88 = arith.negf %87 : vector<8x32xf32>
      %89 = math.exp %88 : vector<8x32xf32>
      %cst_61 = arith.constant 1.000000e+00 : f32
      %90 = vector.broadcast %cst_61 : f32 to vector<8x32xf32>
      %91 = arith.addf %90, %89 : vector<8x32xf32>
      %92 = arith.divf %90, %91 : vector<8x32xf32>
      %93 = vector.extract_strided_slice %80 {offsets = [0, 64], sizes = [8, 32], strides = [1, 1]} : vector<8x128xf32> to vector<8x32xf32>
      %94 = math.tanh %93 : vector<8x32xf32>
      %95 = vector.extract_strided_slice %80 {offsets = [0, 96], sizes = [8, 32], strides = [1, 1]} : vector<8x128xf32> to vector<8x32xf32>
      %96 = arith.negf %95 : vector<8x32xf32>
      %97 = math.exp %96 : vector<8x32xf32>
      %cst_62 = arith.constant 1.000000e+00 : f32
      %98 = vector.broadcast %cst_62 : f32 to vector<8x32xf32>
      %99 = arith.addf %98, %97 : vector<8x32xf32>
      %100 = arith.divf %98, %99 : vector<8x32xf32>
      %c0_63 = arith.constant 0 : index
      %c0_64 = arith.constant 0 : index
      %101 = vector.load %arg16[%c0_63, %c0_64] : memref<8x32xf32, #tpu.memory_space<vmem>>, vector<8x32xf32>
      %102 = arith.mulf %92, %101 : vector<8x32xf32>
      %103 = arith.mulf %86, %94 : vector<8x32xf32>
      %104 = arith.addf %102, %103 : vector<8x32xf32>
      %105 = math.tanh %104 : vector<8x32xf32>
      %106 = arith.mulf %100, %105 : vector<8x32xf32>
      %c0_65 = arith.constant 0 : index
      %c0_66 = arith.constant 0 : index
      %107 = vector.load %arg16[%c0_65, %c0_66] : memref<8x32xf32, #tpu.memory_space<vmem>>, vector<8x32xf32>
      tpu.vector_store %arg16[%c0_65, %c0_66], %104 {strides = array<i32>} : memref<8x32xf32, #tpu.memory_space<vmem>>, vector<8x32xf32>,
      %c0_67 = arith.constant 0 : index
      %c0_68 = arith.constant 0 : index
      %108 = vector.load %arg15[%c0_67, %c0_68] : memref<8x32xf32, #tpu.memory_space<vmem>>, vector<8x32xf32>
      tpu.vector_store %arg15[%c0_67, %c0_68], %106 {strides = array<i32>} : memref<8x32xf32, #tpu.memory_space<vmem>>, vector<8x32xf32>,
      %109 = arith.index_cast %74 : i32 to index
      %c0_69 = arith.constant 0 : index
      %110 = vector.load %arg18[%109, %c0_69] : memref<64x32xf32, #tpu.memory_space<vmem>>, vector<8x32xf32>
      tpu.vector_store %arg18[%109, %c0_69], %106 {strides = array<i32>} : memref<64x32xf32, #tpu.memory_space<vmem>>, vector<8x32xf32>,
      %c2_i32 = arith.constant 2 : i32
      %c8_i32_70 = arith.constant 8 : i32
      %111 = arith.muli %c2_i32, %c8_i32_70 : i32
      %112 = tpu.assume_multiple %111, 8 : i32
      %113 = arith.index_cast %112 : i32 to index
      %c0_71 = arith.constant 0 : index
      %114 = vector.load %arg17[%113, %c0_71] : memref<64x128xf32, #tpu.memory_space<vmem>>, vector<8x128xf32>
      %115 = arith.addf %114, %18 : vector<8x128xf32>
      %c0_72 = arith.constant 0 : index
      %c0_73 = arith.constant 0 : index
      %116 = vector.load %arg15[%c0_72, %c0_73] : memref<8x32xf32, #tpu.memory_space<vmem>>, vector<8x32xf32>
      %cst_74 = arith.constant dense<0.000000e+00> : vector<8x128xf32>
      %117 = tpu.matmul %116, %24, %cst_74 {dimension_numbers = #tpu.dot_dimension_numbers<[1], [0], [0], [1], [0, 0, 1, 1], [], []>} : vector<8x32xf32>, vector<32x128xf32>, vector<8x128xf32> -> vector<8x128xf32>
      %118 = arith.addf %115, %117 : vector<8x128xf32>
      %119 = vector.extract_strided_slice %118 {offsets = [0, 0], sizes = [8, 32], strides = [1, 1]} : vector<8x128xf32> to vector<8x32xf32>
      %120 = arith.negf %119 : vector<8x32xf32>
      %121 = math.exp %120 : vector<8x32xf32>
      %cst_75 = arith.constant 1.000000e+00 : f32
      %122 = vector.broadcast %cst_75 : f32 to vector<8x32xf32>
      %123 = arith.addf %122, %121 : vector<8x32xf32>
      %124 = arith.divf %122, %123 : vector<8x32xf32>
      %125 = vector.extract_strided_slice %118 {offsets = [0, 32], sizes = [8, 32], strides = [1, 1]} : vector<8x128xf32> to vector<8x32xf32>
      %126 = arith.negf %125 : vector<8x32xf32>
      %127 = math.exp %126 : vector<8x32xf32>
      %cst_76 = arith.constant 1.000000e+00 : f32
      %128 = vector.broadcast %cst_76 : f32 to vector<8x32xf32>
      %129 = arith.addf %128, %127 : vector<8x32xf32>
      %130 = arith.divf %128, %129 : vector<8x32xf32>
      %131 = vector.extract_strided_slice %118 {offsets = [0, 64], sizes = [8, 32], strides = [1, 1]} : vector<8x128xf32> to vector<8x32xf32>
      %132 = math.tanh %131 : vector<8x32xf32>
      %133 = vector.extract_strided_slice %118 {offsets = [0, 96], sizes = [8, 32], strides = [1, 1]} : vector<8x128xf32> to vector<8x32xf32>
      %134 = arith.negf %133 : vector<8x32xf32>
      %135 = math.exp %134 : vector<8x32xf32>
      %cst_77 = arith.constant 1.000000e+00 : f32
      %136 = vector.broadcast %cst_77 : f32 to vector<8x32xf32>
      %137 = arith.addf %136, %135 : vector<8x32xf32>
      %138 = arith.divf %136, %137 : vector<8x32xf32>
      %c0_78 = arith.constant 0 : index
      %c0_79 = arith.constant 0 : index
      %139 = vector.load %arg16[%c0_78, %c0_79] : memref<8x32xf32, #tpu.memory_space<vmem>>, vector<8x32xf32>
      %140 = arith.mulf %130, %139 : vector<8x32xf32>
      %141 = arith.mulf %124, %132 : vector<8x32xf32>
      %142 = arith.addf %140, %141 : vector<8x32xf32>
      %143 = math.tanh %142 : vector<8x32xf32>
      %144 = arith.mulf %138, %143 : vector<8x32xf32>
      %c0_80 = arith.constant 0 : index
      %c0_81 = arith.constant 0 : index
      %145 = vector.load %arg16[%c0_80, %c0_81] : memref<8x32xf32, #tpu.memory_space<vmem>>, vector<8x32xf32>
      tpu.vector_store %arg16[%c0_80, %c0_81], %142 {strides = array<i32>} : memref<8x32xf32, #tpu.memory_space<vmem>>, vector<8x32xf32>,
      %c0_82 = arith.constant 0 : index
      %c0_83 = arith.constant 0 : index
      %146 = vector.load %arg15[%c0_82, %c0_83] : memref<8x32xf32, #tpu.memory_space<vmem>>, vector<8x32xf32>
      tpu.vector_store %arg15[%c0_82, %c0_83], %144 {strides = array<i32>} : memref<8x32xf32, #tpu.memory_space<vmem>>, vector<8x32xf32>,
      %147 = arith.index_cast %112 : i32 to index
      %c0_84 = arith.constant 0 : index
      %148 = vector.load %arg18[%147, %c0_84] : memref<64x32xf32, #tpu.memory_space<vmem>>, vector<8x32xf32>
      tpu.vector_store %arg18[%147, %c0_84], %144 {strides = array<i32>} : memref<64x32xf32, #tpu.memory_space<vmem>>, vector<8x32xf32>,
      %c3_i32 = arith.constant 3 : i32
      %c8_i32_85 = arith.constant 8 : i32
      %149 = arith.muli %c3_i32, %c8_i32_85 : i32
      %150 = tpu.assume_multiple %149, 8 : i32
      %151 = arith.index_cast %150 : i32 to index
      %c0_86 = arith.constant 0 : index
      %152 = vector.load %arg17[%151, %c0_86] : memref<64x128xf32, #tpu.memory_space<vmem>>, vector<8x128xf32>
      %153 = arith.addf %152, %18 : vector<8x128xf32>
      %c0_87 = arith.constant 0 : index
      %c0_88 = arith.constant 0 : index
      %154 = vector.load %arg15[%c0_87, %c0_88] : memref<8x32xf32, #tpu.memory_space<vmem>>, vector<8x32xf32>
      %cst_89 = arith.constant dense<0.000000e+00> : vector<8x128xf32>
      %155 = tpu.matmul %154, %24, %cst_89 {dimension_numbers = #tpu.dot_dimension_numbers<[1], [0], [0], [1], [0, 0, 1, 1], [], []>} : vector<8x32xf32>, vector<32x128xf32>, vector<8x128xf32> -> vector<8x128xf32>
      %156 = arith.addf %153, %155 : vector<8x128xf32>
      %157 = vector.extract_strided_slice %156 {offsets = [0, 0], sizes = [8, 32], strides = [1, 1]} : vector<8x128xf32> to vector<8x32xf32>
      %158 = arith.negf %157 : vector<8x32xf32>
      %159 = math.exp %158 : vector<8x32xf32>
      %cst_90 = arith.constant 1.000000e+00 : f32
      %160 = vector.broadcast %cst_90 : f32 to vector<8x32xf32>
      %161 = arith.addf %160, %159 : vector<8x32xf32>
      %162 = arith.divf %160, %161 : vector<8x32xf32>
      %163 = vector.extract_strided_slice %156 {offsets = [0, 32], sizes = [8, 32], strides = [1, 1]} : vector<8x128xf32> to vector<8x32xf32>
      %164 = arith.negf %163 : vector<8x32xf32>
      %165 = math.exp %164 : vector<8x32xf32>
      %cst_91 = arith.constant 1.000000e+00 : f32
      %166 = vector.broadcast %cst_91 : f32 to vector<8x32xf32>
      %167 = arith.addf %166, %165 : vector<8x32xf32>
      %168 = arith.divf %166, %167 : vector<8x32xf32>
      %169 = vector.extract_strided_slice %156 {offsets = [0, 64], sizes = [8, 32], strides = [1, 1]} : vector<8x128xf32> to vector<8x32xf32>
      %170 = math.tanh %169 : vector<8x32xf32>
      %171 = vector.extract_strided_slice %156 {offsets = [0, 96], sizes = [8, 32], strides = [1, 1]} : vector<8x128xf32> to vector<8x32xf32>
      %172 = arith.negf %171 : vector<8x32xf32>
      %173 = math.exp %172 : vector<8x32xf32>
      %cst_92 = arith.constant 1.000000e+00 : f32
      %174 = vector.broadcast %cst_92 : f32 to vector<8x32xf32>
      %175 = arith.addf %174, %173 : vector<8x32xf32>
      %176 = arith.divf %174, %175 : vector<8x32xf32>
      %c0_93 = arith.constant 0 : index
      %c0_94 = arith.constant 0 : index
      %177 = vector.load %arg16[%c0_93, %c0_94] : memref<8x32xf32, #tpu.memory_space<vmem>>, vector<8x32xf32>
      %178 = arith.mulf %168, %177 : vector<8x32xf32>
      %179 = arith.mulf %162, %170 : vector<8x32xf32>
      %180 = arith.addf %178, %179 : vector<8x32xf32>
      %181 = math.tanh %180 : vector<8x32xf32>
      %182 = arith.mulf %176, %181 : vector<8x32xf32>
      %c0_95 = arith.constant 0 : index
      %c0_96 = arith.constant 0 : index
      %183 = vector.load %arg16[%c0_95, %c0_96] : memref<8x32xf32, #tpu.memory_space<vmem>>, vector<8x32xf32>
      tpu.vector_store %arg16[%c0_95, %c0_96], %180 {strides = array<i32>} : memref<8x32xf32, #tpu.memory_space<vmem>>, vector<8x32xf32>,
      %c0_97 = arith.constant 0 : index
      %c0_98 = arith.constant 0 : index
      %184 = vector.load %arg15[%c0_97, %c0_98] : memref<8x32xf32, #tpu.memory_space<vmem>>, vector<8x32xf32>
      tpu.vector_store %arg15[%c0_97, %c0_98], %182 {strides = array<i32>} : memref<8x32xf32, #tpu.memory_space<vmem>>, vector<8x32xf32>,
      %185 = arith.index_cast %150 : i32 to index
      %c0_99 = arith.constant 0 : index
      %186 = vector.load %arg18[%185, %c0_99] : memref<64x32xf32, #tpu.memory_space<vmem>>, vector<8x32xf32>
      tpu.vector_store %arg18[%185, %c0_99], %182 {strides = array<i32>} : memref<64x32xf32, #tpu.memory_space<vmem>>, vector<8x32xf32>,
      %c4_i32 = arith.constant 4 : i32
      %c8_i32_100 = arith.constant 8 : i32
      %187 = arith.muli %c4_i32, %c8_i32_100 : i32
      %188 = tpu.assume_multiple %187, 8 : i32
      %189 = arith.index_cast %188 : i32 to index
      %c0_101 = arith.constant 0 : index
      %190 = vector.load %arg17[%189, %c0_101] : memref<64x128xf32, #tpu.memory_space<vmem>>, vector<8x128xf32>
      %191 = arith.addf %190, %18 : vector<8x128xf32>
      %c0_102 = arith.constant 0 : index
      %c0_103 = arith.constant 0 : index
      %192 = vector.load %arg15[%c0_102, %c0_103] : memref<8x32xf32, #tpu.memory_space<vmem>>, vector<8x32xf32>
      %cst_104 = arith.constant dense<0.000000e+00> : vector<8x128xf32>
      %193 = tpu.matmul %192, %24, %cst_104 {dimension_numbers = #tpu.dot_dimension_numbers<[1], [0], [0], [1], [0, 0, 1, 1], [], []>} : vector<8x32xf32>, vector<32x128xf32>, vector<8x128xf32> -> vector<8x128xf32>
      %194 = arith.addf %191, %193 : vector<8x128xf32>
      %195 = vector.extract_strided_slice %194 {offsets = [0, 0], sizes = [8, 32], strides = [1, 1]} : vector<8x128xf32> to vector<8x32xf32>
      %196 = arith.negf %195 : vector<8x32xf32>
      %197 = math.exp %196 : vector<8x32xf32>
      %cst_105 = arith.constant 1.000000e+00 : f32
      %198 = vector.broadcast %cst_105 : f32 to vector<8x32xf32>
      %199 = arith.addf %198, %197 : vector<8x32xf32>
      %200 = arith.divf %198, %199 : vector<8x32xf32>
      %201 = vector.extract_strided_slice %194 {offsets = [0, 32], sizes = [8, 32], strides = [1, 1]} : vector<8x128xf32> to vector<8x32xf32>
      %202 = arith.negf %201 : vector<8x32xf32>
      %203 = math.exp %202 : vector<8x32xf32>
      %cst_106 = arith.constant 1.000000e+00 : f32
      %204 = vector.broadcast %cst_106 : f32 to vector<8x32xf32>
      %205 = arith.addf %204, %203 : vector<8x32xf32>
      %206 = arith.divf %204, %205 : vector<8x32xf32>
      %207 = vector.extract_strided_slice %194 {offsets = [0, 64], sizes = [8, 32], strides = [1, 1]} : vector<8x128xf32> to vector<8x32xf32>
      %208 = math.tanh %207 : vector<8x32xf32>
      %209 = vector.extract_strided_slice %194 {offsets = [0, 96], sizes = [8, 32], strides = [1, 1]} : vector<8x128xf32> to vector<8x32xf32>
      %210 = arith.negf %209 : vector<8x32xf32>
      %211 = math.exp %210 : vector<8x32xf32>
      %cst_107 = arith.constant 1.000000e+00 : f32
      %212 = vector.broadcast %cst_107 : f32 to vector<8x32xf32>
      %213 = arith.addf %212, %211 : vector<8x32xf32>
      %214 = arith.divf %212, %213 : vector<8x32xf32>
      %c0_108 = arith.constant 0 : index
      %c0_109 = arith.constant 0 : index
      %215 = vector.load %arg16[%c0_108, %c0_109] : memref<8x32xf32, #tpu.memory_space<vmem>>, vector<8x32xf32>
      %216 = arith.mulf %206, %215 : vector<8x32xf32>
      %217 = arith.mulf %200, %208 : vector<8x32xf32>
      %218 = arith.addf %216, %217 : vector<8x32xf32>
      %219 = math.tanh %218 : vector<8x32xf32>
      %220 = arith.mulf %214, %219 : vector<8x32xf32>
      %c0_110 = arith.constant 0 : index
      %c0_111 = arith.constant 0 : index
      %221 = vector.load %arg16[%c0_110, %c0_111] : memref<8x32xf32, #tpu.memory_space<vmem>>, vector<8x32xf32>
      tpu.vector_store %arg16[%c0_110, %c0_111], %218 {strides = array<i32>} : memref<8x32xf32, #tpu.memory_space<vmem>>, vector<8x32xf32>,
      %c0_112 = arith.constant 0 : index
      %c0_113 = arith.constant 0 : index
      %222 = vector.load %arg15[%c0_112, %c0_113] : memref<8x32xf32, #tpu.memory_space<vmem>>, vector<8x32xf32>
      tpu.vector_store %arg15[%c0_112, %c0_113], %220 {strides = array<i32>} : memref<8x32xf32, #tpu.memory_space<vmem>>, vector<8x32xf32>,
      %223 = arith.index_cast %188 : i32 to index
      %c0_114 = arith.constant 0 : index
      %224 = vector.load %arg18[%223, %c0_114] : memref<64x32xf32, #tpu.memory_space<vmem>>, vector<8x32xf32>
      tpu.vector_store %arg18[%223, %c0_114], %220 {strides = array<i32>} : memref<64x32xf32, #tpu.memory_space<vmem>>, vector<8x32xf32>,
      %c5_i32 = arith.constant 5 : i32
      %c8_i32_115 = arith.constant 8 : i32
      %225 = arith.muli %c5_i32, %c8_i32_115 : i32
      %226 = tpu.assume_multiple %225, 8 : i32
      %227 = arith.index_cast %226 : i32 to index
      %c0_116 = arith.constant 0 : index
      %228 = vector.load %arg17[%227, %c0_116] : memref<64x128xf32, #tpu.memory_space<vmem>>, vector<8x128xf32>
      %229 = arith.addf %228, %18 : vector<8x128xf32>
      %c0_117 = arith.constant 0 : index
      %c0_118 = arith.constant 0 : index
      %230 = vector.load %arg15[%c0_117, %c0_118] : memref<8x32xf32, #tpu.memory_space<vmem>>, vector<8x32xf32>
      %cst_119 = arith.constant dense<0.000000e+00> : vector<8x128xf32>
      %231 = tpu.matmul %230, %24, %cst_119 {dimension_numbers = #tpu.dot_dimension_numbers<[1], [0], [0], [1], [0, 0, 1, 1], [], []>} : vector<8x32xf32>, vector<32x128xf32>, vector<8x128xf32> -> vector<8x128xf32>
      %232 = arith.addf %229, %231 : vector<8x128xf32>
      %233 = vector.extract_strided_slice %232 {offsets = [0, 0], sizes = [8, 32], strides = [1, 1]} : vector<8x128xf32> to vector<8x32xf32>
      %234 = arith.negf %233 : vector<8x32xf32>
      %235 = math.exp %234 : vector<8x32xf32>
      %cst_120 = arith.constant 1.000000e+00 : f32
      %236 = vector.broadcast %cst_120 : f32 to vector<8x32xf32>
      %237 = arith.addf %236, %235 : vector<8x32xf32>
      %238 = arith.divf %236, %237 : vector<8x32xf32>
      %239 = vector.extract_strided_slice %232 {offsets = [0, 32], sizes = [8, 32], strides = [1, 1]} : vector<8x128xf32> to vector<8x32xf32>
      %240 = arith.negf %239 : vector<8x32xf32>
      %241 = math.exp %240 : vector<8x32xf32>
      %cst_121 = arith.constant 1.000000e+00 : f32
      %242 = vector.broadcast %cst_121 : f32 to vector<8x32xf32>
      %243 = arith.addf %242, %241 : vector<8x32xf32>
      %244 = arith.divf %242, %243 : vector<8x32xf32>
      %245 = vector.extract_strided_slice %232 {offsets = [0, 64], sizes = [8, 32], strides = [1, 1]} : vector<8x128xf32> to vector<8x32xf32>
      %246 = math.tanh %245 : vector<8x32xf32>
      %247 = vector.extract_strided_slice %232 {offsets = [0, 96], sizes = [8, 32], strides = [1, 1]} : vector<8x128xf32> to vector<8x32xf32>
      %248 = arith.negf %247 : vector<8x32xf32>
      %249 = math.exp %248 : vector<8x32xf32>
      %cst_122 = arith.constant 1.000000e+00 : f32
      %250 = vector.broadcast %cst_122 : f32 to vector<8x32xf32>
      %251 = arith.addf %250, %249 : vector<8x32xf32>
      %252 = arith.divf %250, %251 : vector<8x32xf32>
      %c0_123 = arith.constant 0 : index
      %c0_124 = arith.constant 0 : index
      %253 = vector.load %arg16[%c0_123, %c0_124] : memref<8x32xf32, #tpu.memory_space<vmem>>, vector<8x32xf32>
      %254 = arith.mulf %244, %253 : vector<8x32xf32>
      %255 = arith.mulf %238, %246 : vector<8x32xf32>
      %256 = arith.addf %254, %255 : vector<8x32xf32>
      %257 = math.tanh %256 : vector<8x32xf32>
      %258 = arith.mulf %252, %257 : vector<8x32xf32>
      %c0_125 = arith.constant 0 : index
      %c0_126 = arith.constant 0 : index
      %259 = vector.load %arg16[%c0_125, %c0_126] : memref<8x32xf32, #tpu.memory_space<vmem>>, vector<8x32xf32>
      tpu.vector_store %arg16[%c0_125, %c0_126], %256 {strides = array<i32>} : memref<8x32xf32, #tpu.memory_space<vmem>>, vector<8x32xf32>,
      %c0_127 = arith.constant 0 : index
      %c0_128 = arith.constant 0 : index
      %260 = vector.load %arg15[%c0_127, %c0_128] : memref<8x32xf32, #tpu.memory_space<vmem>>, vector<8x32xf32>
      tpu.vector_store %arg15[%c0_127, %c0_128], %258 {strides = array<i32>} : memref<8x32xf32, #tpu.memory_space<vmem>>, vector<8x32xf32>,
      %261 = arith.index_cast %226 : i32 to index
      %c0_129 = arith.constant 0 : index
      %262 = vector.load %arg18[%261, %c0_129] : memref<64x32xf32, #tpu.memory_space<vmem>>, vector<8x32xf32>
      tpu.vector_store %arg18[%261, %c0_129], %258 {strides = array<i32>} : memref<64x32xf32, #tpu.memory_space<vmem>>, vector<8x32xf32>,
      %c6_i32 = arith.constant 6 : i32
      %c8_i32_130 = arith.constant 8 : i32
      %263 = arith.muli %c6_i32, %c8_i32_130 : i32
      %264 = tpu.assume_multiple %263, 8 : i32
      %265 = arith.index_cast %264 : i32 to index
      %c0_131 = arith.constant 0 : index
      %266 = vector.load %arg17[%265, %c0_131] : memref<64x128xf32, #tpu.memory_space<vmem>>, vector<8x128xf32>
      %267 = arith.addf %266, %18 : vector<8x128xf32>
      %c0_132 = arith.constant 0 : index
      %c0_133 = arith.constant 0 : index
      %268 = vector.load %arg15[%c0_132, %c0_133] : memref<8x32xf32, #tpu.memory_space<vmem>>, vector<8x32xf32>
      %cst_134 = arith.constant dense<0.000000e+00> : vector<8x128xf32>
      %269 = tpu.matmul %268, %24, %cst_134 {dimension_numbers = #tpu.dot_dimension_numbers<[1], [0], [0], [1], [0, 0, 1, 1], [], []>} : vector<8x32xf32>, vector<32x128xf32>, vector<8x128xf32> -> vector<8x128xf32>
      %270 = arith.addf %267, %269 : vector<8x128xf32>
      %271 = vector.extract_strided_slice %270 {offsets = [0, 0], sizes = [8, 32], strides = [1, 1]} : vector<8x128xf32> to vector<8x32xf32>
      %272 = arith.negf %271 : vector<8x32xf32>
      %273 = math.exp %272 : vector<8x32xf32>
      %cst_135 = arith.constant 1.000000e+00 : f32
      %274 = vector.broadcast %cst_135 : f32 to vector<8x32xf32>
      %275 = arith.addf %274, %273 : vector<8x32xf32>
      %276 = arith.divf %274, %275 : vector<8x32xf32>
      %277 = vector.extract_strided_slice %270 {offsets = [0, 32], sizes = [8, 32], strides = [1, 1]} : vector<8x128xf32> to vector<8x32xf32>
      %278 = arith.negf %277 : vector<8x32xf32>
      %279 = math.exp %278 : vector<8x32xf32>
      %cst_136 = arith.constant 1.000000e+00 : f32
      %280 = vector.broadcast %cst_136 : f32 to vector<8x32xf32>
      %281 = arith.addf %280, %279 : vector<8x32xf32>
      %282 = arith.divf %280, %281 : vector<8x32xf32>
      %283 = vector.extract_strided_slice %270 {offsets = [0, 64], sizes = [8, 32], strides = [1, 1]} : vector<8x128xf32> to vector<8x32xf32>
      %284 = math.tanh %283 : vector<8x32xf32>
      %285 = vector.extract_strided_slice %270 {offsets = [0, 96], sizes = [8, 32], strides = [1, 1]} : vector<8x128xf32> to vector<8x32xf32>
      %286 = arith.negf %285 : vector<8x32xf32>
      %287 = math.exp %286 : vector<8x32xf32>
      %cst_137 = arith.constant 1.000000e+00 : f32
      %288 = vector.broadcast %cst_137 : f32 to vector<8x32xf32>
      %289 = arith.addf %288, %287 : vector<8x32xf32>
      %290 = arith.divf %288, %289 : vector<8x32xf32>
      %c0_138 = arith.constant 0 : index
      %c0_139 = arith.constant 0 : index
      %291 = vector.load %arg16[%c0_138, %c0_139] : memref<8x32xf32, #tpu.memory_space<vmem>>, vector<8x32xf32>
      %292 = arith.mulf %282, %291 : vector<8x32xf32>
      %293 = arith.mulf %276, %284 : vector<8x32xf32>
      %294 = arith.addf %292, %293 : vector<8x32xf32>
      %295 = math.tanh %294 : vector<8x32xf32>
      %296 = arith.mulf %290, %295 : vector<8x32xf32>
      %c0_140 = arith.constant 0 : index
      %c0_141 = arith.constant 0 : index
      %297 = vector.load %arg16[%c0_140, %c0_141] : memref<8x32xf32, #tpu.memory_space<vmem>>, vector<8x32xf32>
      tpu.vector_store %arg16[%c0_140, %c0_141], %294 {strides = array<i32>} : memref<8x32xf32, #tpu.memory_space<vmem>>, vector<8x32xf32>,
      %c0_142 = arith.constant 0 : index
      %c0_143 = arith.constant 0 : index
      %298 = vector.load %arg15[%c0_142, %c0_143] : memref<8x32xf32, #tpu.memory_space<vmem>>, vector<8x32xf32>
      tpu.vector_store %arg15[%c0_142, %c0_143], %296 {strides = array<i32>} : memref<8x32xf32, #tpu.memory_space<vmem>>, vector<8x32xf32>,
      %299 = arith.index_cast %264 : i32 to index
      %c0_144 = arith.constant 0 : index
      %300 = vector.load %arg18[%299, %c0_144] : memref<64x32xf32, #tpu.memory_space<vmem>>, vector<8x32xf32>
      tpu.vector_store %arg18[%299, %c0_144], %296 {strides = array<i32>} : memref<64x32xf32, #tpu.memory_space<vmem>>, vector<8x32xf32>,
      %c7_i32 = arith.constant 7 : i32
      %c8_i32_145 = arith.constant 8 : i32
      %301 = arith.muli %c7_i32, %c8_i32_145 : i32
      %302 = tpu.assume_multiple %301, 8 : i32
      %303 = arith.index_cast %302 : i32 to index
      %c0_146 = arith.constant 0 : index
      %304 = vector.load %arg17[%303, %c0_146] : memref<64x128xf32, #tpu.memory_space<vmem>>, vector<8x128xf32>
      %305 = arith.addf %304, %18 : vector<8x128xf32>
      %c0_147 = arith.constant 0 : index
      %c0_148 = arith.constant 0 : index
      %306 = vector.load %arg15[%c0_147, %c0_148] : memref<8x32xf32, #tpu.memory_space<vmem>>, vector<8x32xf32>
      %cst_149 = arith.constant dense<0.000000e+00> : vector<8x128xf32>
      %307 = tpu.matmul %306, %24, %cst_149 {dimension_numbers = #tpu.dot_dimension_numbers<[1], [0], [0], [1], [0, 0, 1, 1], [], []>} : vector<8x32xf32>, vector<32x128xf32>, vector<8x128xf32> -> vector<8x128xf32>
      %308 = arith.addf %305, %307 : vector<8x128xf32>
      %309 = vector.extract_strided_slice %308 {offsets = [0, 0], sizes = [8, 32], strides = [1, 1]} : vector<8x128xf32> to vector<8x32xf32>
      %310 = arith.negf %309 : vector<8x32xf32>
      %311 = math.exp %310 : vector<8x32xf32>
      %cst_150 = arith.constant 1.000000e+00 : f32
      %312 = vector.broadcast %cst_150 : f32 to vector<8x32xf32>
      %313 = arith.addf %312, %311 : vector<8x32xf32>
      %314 = arith.divf %312, %313 : vector<8x32xf32>
      %315 = vector.extract_strided_slice %308 {offsets = [0, 32], sizes = [8, 32], strides = [1, 1]} : vector<8x128xf32> to vector<8x32xf32>
      %316 = arith.negf %315 : vector<8x32xf32>
      %317 = math.exp %316 : vector<8x32xf32>
      %cst_151 = arith.constant 1.000000e+00 : f32
      %318 = vector.broadcast %cst_151 : f32 to vector<8x32xf32>
      %319 = arith.addf %318, %317 : vector<8x32xf32>
      %320 = arith.divf %318, %319 : vector<8x32xf32>
      %321 = vector.extract_strided_slice %308 {offsets = [0, 64], sizes = [8, 32], strides = [1, 1]} : vector<8x128xf32> to vector<8x32xf32>
      %322 = math.tanh %321 : vector<8x32xf32>
      %323 = vector.extract_strided_slice %308 {offsets = [0, 96], sizes = [8, 32], strides = [1, 1]} : vector<8x128xf32> to vector<8x32xf32>
      %324 = arith.negf %323 : vector<8x32xf32>
      %325 = math.exp %324 : vector<8x32xf32>
      %cst_152 = arith.constant 1.000000e+00 : f32
      %326 = vector.broadcast %cst_152 : f32 to vector<8x32xf32>
      %327 = arith.addf %326, %325 : vector<8x32xf32>
      %328 = arith.divf %326, %327 : vector<8x32xf32>
      %c0_153 = arith.constant 0 : index
      %c0_154 = arith.constant 0 : index
      %329 = vector.load %arg16[%c0_153, %c0_154] : memref<8x32xf32, #tpu.memory_space<vmem>>, vector<8x32xf32>
      %330 = arith.mulf %320, %329 : vector<8x32xf32>
      %331 = arith.mulf %314, %322 : vector<8x32xf32>
      %332 = arith.addf %330, %331 : vector<8x32xf32>
      %333 = math.tanh %332 : vector<8x32xf32>
      %334 = arith.mulf %328, %333 : vector<8x32xf32>
      %c0_155 = arith.constant 0 : index
      %c0_156 = arith.constant 0 : index
      %335 = vector.load %arg16[%c0_155, %c0_156] : memref<8x32xf32, #tpu.memory_space<vmem>>, vector<8x32xf32>
      tpu.vector_store %arg16[%c0_155, %c0_156], %332 {strides = array<i32>} : memref<8x32xf32, #tpu.memory_space<vmem>>, vector<8x32xf32>,
      %c0_157 = arith.constant 0 : index
      %c0_158 = arith.constant 0 : index
      %336 = vector.load %arg15[%c0_157, %c0_158] : memref<8x32xf32, #tpu.memory_space<vmem>>, vector<8x32xf32>
      tpu.vector_store %arg15[%c0_157, %c0_158], %334 {strides = array<i32>} : memref<8x32xf32, #tpu.memory_space<vmem>>, vector<8x32xf32>,
      %337 = arith.index_cast %302 : i32 to index
      %c0_159 = arith.constant 0 : index
      %338 = vector.load %arg18[%337, %c0_159] : memref<64x32xf32, #tpu.memory_space<vmem>>, vector<8x32xf32>
      tpu.vector_store %arg18[%337, %c0_159], %334 {strides = array<i32>} : memref<64x32xf32, #tpu.memory_space<vmem>>, vector<8x32xf32>,
      %c8_i32_160 = arith.constant 8 : i32
      %c0_161 = arith.constant 0 : index
      %c0_162 = arith.constant 0 : index
      %339 = vector.load %arg18[%c0_161, %c0_162] : memref<64x32xf32, #tpu.memory_space<vmem>>, vector<64x32xf32>
      %c0_163 = arith.constant 0 : index
      %c0_164 = arith.constant 0 : index
      %340 = vector.load %arg9[%c0_163, %c0_164] : memref<32x128xf32, #tpu.memory_space<vmem>>, vector<32x128xf32>
      %cst_165 = arith.constant dense<0.000000e+00> : vector<64x128xf32>
      %341 = tpu.matmul %339, %340, %cst_165 {dimension_numbers = #tpu.dot_dimension_numbers<[1], [0], [0], [1], [0, 0, 1, 1], [], []>} : vector<64x32xf32>, vector<32x128xf32>, vector<64x128xf32> -> vector<64x128xf32>
      %c0_166 = arith.constant 0 : index
      %c0_167 = arith.constant 0 : index
      %342 = vector.load %arg17[%c0_166, %c0_167] : memref<64x128xf32, #tpu.memory_space<vmem>>, vector<64x128xf32>
      tpu.vector_store %arg17[%c0_166, %c0_167], %341 {strides = array<i32>} : memref<64x128xf32, #tpu.memory_space<vmem>>, vector<64x128xf32>,
      %c0_i32_168 = arith.constant 0 : i32
      %c8_i32_169 = arith.constant 8 : i32
      %343 = arith.muli %c0_i32_168, %c8_i32_169 : i32
      %344 = tpu.assume_multiple %343, 8 : i32
      %345 = arith.index_cast %344 : i32 to index
      %c0_170 = arith.constant 0 : index
      %346 = vector.load %arg17[%345, %c0_170] : memref<64x128xf32, #tpu.memory_space<vmem>>, vector<8x128xf32>
      %347 = arith.addf %346, %23 : vector<8x128xf32>
      %c0_171 = arith.constant 0 : index
      %c0_172 = arith.constant 0 : index
      %348 = vector.load %arg15[%c0_171, %c0_172] : memref<8x32xf32, #tpu.memory_space<vmem>>, vector<8x32xf32>
      %cst_173 = arith.constant dense<0.000000e+00> : vector<8x128xf32>
      %349 = tpu.matmul %348, %25, %cst_173 {dimension_numbers = #tpu.dot_dimension_numbers<[1], [0], [0], [1], [0, 0, 1, 1], [], []>} : vector<8x32xf32>, vector<32x128xf32>, vector<8x128xf32> -> vector<8x128xf32>
      %350 = arith.addf %347, %349 : vector<8x128xf32>
      %351 = vector.extract_strided_slice %350 {offsets = [0, 0], sizes = [8, 32], strides = [1, 1]} : vector<8x128xf32> to vector<8x32xf32>
      %352 = arith.negf %351 : vector<8x32xf32>
      %353 = math.exp %352 : vector<8x32xf32>
      %cst_174 = arith.constant 1.000000e+00 : f32
      %354 = vector.broadcast %cst_174 : f32 to vector<8x32xf32>
      %355 = arith.addf %354, %353 : vector<8x32xf32>
      %356 = arith.divf %354, %355 : vector<8x32xf32>
      %357 = vector.extract_strided_slice %350 {offsets = [0, 32], sizes = [8, 32], strides = [1, 1]} : vector<8x128xf32> to vector<8x32xf32>
      %358 = arith.negf %357 : vector<8x32xf32>
      %359 = math.exp %358 : vector<8x32xf32>
      %cst_175 = arith.constant 1.000000e+00 : f32
      %360 = vector.broadcast %cst_175 : f32 to vector<8x32xf32>
      %361 = arith.addf %360, %359 : vector<8x32xf32>
      %362 = arith.divf %360, %361 : vector<8x32xf32>
      %363 = vector.extract_strided_slice %350 {offsets = [0, 64], sizes = [8, 32], strides = [1, 1]} : vector<8x128xf32> to vector<8x32xf32>
      %364 = math.tanh %363 : vector<8x32xf32>
      %365 = vector.extract_strided_slice %350 {offsets = [0, 96], sizes = [8, 32], strides = [1, 1]} : vector<8x128xf32> to vector<8x32xf32>
      %366 = arith.negf %365 : vector<8x32xf32>
      %367 = math.exp %366 : vector<8x32xf32>
      %cst_176 = arith.constant 1.000000e+00 : f32
      %368 = vector.broadcast %cst_176 : f32 to vector<8x32xf32>
      %369 = arith.addf %368, %367 : vector<8x32xf32>
      %370 = arith.divf %368, %369 : vector<8x32xf32>
      %c0_177 = arith.constant 0 : index
      %c0_178 = arith.constant 0 : index
      %371 = vector.load %arg16[%c0_177, %c0_178] : memref<8x32xf32, #tpu.memory_space<vmem>>, vector<8x32xf32>
      %372 = arith.mulf %362, %371 : vector<8x32xf32>
      %373 = arith.mulf %356, %364 : vector<8x32xf32>
      %374 = arith.addf %372, %373 : vector<8x32xf32>
      %375 = math.tanh %374 : vector<8x32xf32>
      %376 = arith.mulf %370, %375 : vector<8x32xf32>
      %c0_179 = arith.constant 0 : index
      %c0_180 = arith.constant 0 : index
      %377 = vector.load %arg16[%c0_179, %c0_180] : memref<8x32xf32, #tpu.memory_space<vmem>>, vector<8x32xf32>
      tpu.vector_store %arg16[%c0_179, %c0_180], %374 {strides = array<i32>} : memref<8x32xf32, #tpu.memory_space<vmem>>, vector<8x32xf32>,
      %c0_181 = arith.constant 0 : index
      %c0_182 = arith.constant 0 : index
      %378 = vector.load %arg15[%c0_181, %c0_182] : memref<8x32xf32, #tpu.memory_space<vmem>>, vector<8x32xf32>
      tpu.vector_store %arg15[%c0_181, %c0_182], %376 {strides = array<i32>} : memref<8x32xf32, #tpu.memory_space<vmem>>, vector<8x32xf32>,
      %379 = arith.index_cast %344 : i32 to index
      %c0_183 = arith.constant 0 : index
      %380 = vector.load %arg18[%379, %c0_183] : memref<64x32xf32, #tpu.memory_space<vmem>>, vector<8x32xf32>
      tpu.vector_store %arg18[%379, %c0_183], %376 {strides = array<i32>} : memref<64x32xf32, #tpu.memory_space<vmem>>, vector<8x32xf32>,
      %c1_i32_184 = arith.constant 1 : i32
      %c8_i32_185 = arith.constant 8 : i32
      %381 = arith.muli %c1_i32_184, %c8_i32_185 : i32
      %382 = tpu.assume_multiple %381, 8 : i32
      %383 = arith.index_cast %382 : i32 to index
      %c0_186 = arith.constant 0 : index
      %384 = vector.load %arg17[%383, %c0_186] : memref<64x128xf32, #tpu.memory_space<vmem>>, vector<8x128xf32>
      %385 = arith.addf %384, %23 : vector<8x128xf32>
      %c0_187 = arith.constant 0 : index
      %c0_188 = arith.constant 0 : index
      %386 = vector.load %arg15[%c0_187, %c0_188] : memref<8x32xf32, #tpu.memory_space<vmem>>, vector<8x32xf32>
      %cst_189 = arith.constant dense<0.000000e+00> : vector<8x128xf32>
      %387 = tpu.matmul %386, %25, %cst_189 {dimension_numbers = #tpu.dot_dimension_numbers<[1], [0], [0], [1], [0, 0, 1, 1], [], []>} : vector<8x32xf32>, vector<32x128xf32>, vector<8x128xf32> -> vector<8x128xf32>
      %388 = arith.addf %385, %387 : vector<8x128xf32>
      %389 = vector.extract_strided_slice %388 {offsets = [0, 0], sizes = [8, 32], strides = [1, 1]} : vector<8x128xf32> to vector<8x32xf32>
      %390 = arith.negf %389 : vector<8x32xf32>
      %391 = math.exp %390 : vector<8x32xf32>
      %cst_190 = arith.constant 1.000000e+00 : f32
      %392 = vector.broadcast %cst_190 : f32 to vector<8x32xf32>
      %393 = arith.addf %392, %391 : vector<8x32xf32>
      %394 = arith.divf %392, %393 : vector<8x32xf32>
      %395 = vector.extract_strided_slice %388 {offsets = [0, 32], sizes = [8, 32], strides = [1, 1]} : vector<8x128xf32> to vector<8x32xf32>
      %396 = arith.negf %395 : vector<8x32xf32>
      %397 = math.exp %396 : vector<8x32xf32>
      %cst_191 = arith.constant 1.000000e+00 : f32
      %398 = vector.broadcast %cst_191 : f32 to vector<8x32xf32>
      %399 = arith.addf %398, %397 : vector<8x32xf32>
      %400 = arith.divf %398, %399 : vector<8x32xf32>
      %401 = vector.extract_strided_slice %388 {offsets = [0, 64], sizes = [8, 32], strides = [1, 1]} : vector<8x128xf32> to vector<8x32xf32>
      %402 = math.tanh %401 : vector<8x32xf32>
      %403 = vector.extract_strided_slice %388 {offsets = [0, 96], sizes = [8, 32], strides = [1, 1]} : vector<8x128xf32> to vector<8x32xf32>
      %404 = arith.negf %403 : vector<8x32xf32>
      %405 = math.exp %404 : vector<8x32xf32>
      %cst_192 = arith.constant 1.000000e+00 : f32
      %406 = vector.broadcast %cst_192 : f32 to vector<8x32xf32>
      %407 = arith.addf %406, %405 : vector<8x32xf32>
      %408 = arith.divf %406, %407 : vector<8x32xf32>
      %c0_193 = arith.constant 0 : index
      %c0_194 = arith.constant 0 : index
      %409 = vector.load %arg16[%c0_193, %c0_194] : memref<8x32xf32, #tpu.memory_space<vmem>>, vector<8x32xf32>
      %410 = arith.mulf %400, %409 : vector<8x32xf32>
      %411 = arith.mulf %394, %402 : vector<8x32xf32>
      %412 = arith.addf %410, %411 : vector<8x32xf32>
      %413 = math.tanh %412 : vector<8x32xf32>
      %414 = arith.mulf %408, %413 : vector<8x32xf32>
      %c0_195 = arith.constant 0 : index
      %c0_196 = arith.constant 0 : index
      %415 = vector.load %arg16[%c0_195, %c0_196] : memref<8x32xf32, #tpu.memory_space<vmem>>, vector<8x32xf32>
      tpu.vector_store %arg16[%c0_195, %c0_196], %412 {strides = array<i32>} : memref<8x32xf32, #tpu.memory_space<vmem>>, vector<8x32xf32>,
      %c0_197 = arith.constant 0 : index
      %c0_198 = arith.constant 0 : index
      %416 = vector.load %arg15[%c0_197, %c0_198] : memref<8x32xf32, #tpu.memory_space<vmem>>, vector<8x32xf32>
      tpu.vector_store %arg15[%c0_197, %c0_198], %414 {strides = array<i32>} : memref<8x32xf32, #tpu.memory_space<vmem>>, vector<8x32xf32>,
      %417 = arith.index_cast %382 : i32 to index
      %c0_199 = arith.constant 0 : index
      %418 = vector.load %arg18[%417, %c0_199] : memref<64x32xf32, #tpu.memory_space<vmem>>, vector<8x32xf32>
      tpu.vector_store %arg18[%417, %c0_199], %414 {strides = array<i32>} : memref<64x32xf32, #tpu.memory_space<vmem>>, vector<8x32xf32>,
      %c2_i32_200 = arith.constant 2 : i32
      %c8_i32_201 = arith.constant 8 : i32
      %419 = arith.muli %c2_i32_200, %c8_i32_201 : i32
      %420 = tpu.assume_multiple %419, 8 : i32
      %421 = arith.index_cast %420 : i32 to index
      %c0_202 = arith.constant 0 : index
      %422 = vector.load %arg17[%421, %c0_202] : memref<64x128xf32, #tpu.memory_space<vmem>>, vector<8x128xf32>
      %423 = arith.addf %422, %23 : vector<8x128xf32>
      %c0_203 = arith.constant 0 : index
      %c0_204 = arith.constant 0 : index
      %424 = vector.load %arg15[%c0_203, %c0_204] : memref<8x32xf32, #tpu.memory_space<vmem>>, vector<8x32xf32>
      %cst_205 = arith.constant dense<0.000000e+00> : vector<8x128xf32>
      %425 = tpu.matmul %424, %25, %cst_205 {dimension_numbers = #tpu.dot_dimension_numbers<[1], [0], [0], [1], [0, 0, 1, 1], [], []>} : vector<8x32xf32>, vector<32x128xf32>, vector<8x128xf32> -> vector<8x128xf32>
      %426 = arith.addf %423, %425 : vector<8x128xf32>
      %427 = vector.extract_strided_slice %426 {offsets = [0, 0], sizes = [8, 32], strides = [1, 1]} : vector<8x128xf32> to vector<8x32xf32>
      %428 = arith.negf %427 : vector<8x32xf32>
      %429 = math.exp %428 : vector<8x32xf32>
      %cst_206 = arith.constant 1.000000e+00 : f32
      %430 = vector.broadcast %cst_206 : f32 to vector<8x32xf32>
      %431 = arith.addf %430, %429 : vector<8x32xf32>
      %432 = arith.divf %430, %431 : vector<8x32xf32>
      %433 = vector.extract_strided_slice %426 {offsets = [0, 32], sizes = [8, 32], strides = [1, 1]} : vector<8x128xf32> to vector<8x32xf32>
      %434 = arith.negf %433 : vector<8x32xf32>
      %435 = math.exp %434 : vector<8x32xf32>
      %cst_207 = arith.constant 1.000000e+00 : f32
      %436 = vector.broadcast %cst_207 : f32 to vector<8x32xf32>
      %437 = arith.addf %436, %435 : vector<8x32xf32>
      %438 = arith.divf %436, %437 : vector<8x32xf32>
      %439 = vector.extract_strided_slice %426 {offsets = [0, 64], sizes = [8, 32], strides = [1, 1]} : vector<8x128xf32> to vector<8x32xf32>
      %440 = math.tanh %439 : vector<8x32xf32>
      %441 = vector.extract_strided_slice %426 {offsets = [0, 96], sizes = [8, 32], strides = [1, 1]} : vector<8x128xf32> to vector<8x32xf32>
      %442 = arith.negf %441 : vector<8x32xf32>
      %443 = math.exp %442 : vector<8x32xf32>
      %cst_208 = arith.constant 1.000000e+00 : f32
      %444 = vector.broadcast %cst_208 : f32 to vector<8x32xf32>
      %445 = arith.addf %444, %443 : vector<8x32xf32>
      %446 = arith.divf %444, %445 : vector<8x32xf32>
      %c0_209 = arith.constant 0 : index
      %c0_210 = arith.constant 0 : index
      %447 = vector.load %arg16[%c0_209, %c0_210] : memref<8x32xf32, #tpu.memory_space<vmem>>, vector<8x32xf32>
      %448 = arith.mulf %438, %447 : vector<8x32xf32>
      %449 = arith.mulf %432, %440 : vector<8x32xf32>
      %450 = arith.addf %448, %449 : vector<8x32xf32>
      %451 = math.tanh %450 : vector<8x32xf32>
      %452 = arith.mulf %446, %451 : vector<8x32xf32>
      %c0_211 = arith.constant 0 : index
      %c0_212 = arith.constant 0 : index
      %453 = vector.load %arg16[%c0_211, %c0_212] : memref<8x32xf32, #tpu.memory_space<vmem>>, vector<8x32xf32>
      tpu.vector_store %arg16[%c0_211, %c0_212], %450 {strides = array<i32>} : memref<8x32xf32, #tpu.memory_space<vmem>>, vector<8x32xf32>,
      %c0_213 = arith.constant 0 : index
      %c0_214 = arith.constant 0 : index
      %454 = vector.load %arg15[%c0_213, %c0_214] : memref<8x32xf32, #tpu.memory_space<vmem>>, vector<8x32xf32>
      tpu.vector_store %arg15[%c0_213, %c0_214], %452 {strides = array<i32>} : memref<8x32xf32, #tpu.memory_space<vmem>>, vector<8x32xf32>,
      %455 = arith.index_cast %420 : i32 to index
      %c0_215 = arith.constant 0 : index
      %456 = vector.load %arg18[%455, %c0_215] : memref<64x32xf32, #tpu.memory_space<vmem>>, vector<8x32xf32>
      tpu.vector_store %arg18[%455, %c0_215], %452 {strides = array<i32>} : memref<64x32xf32, #tpu.memory_space<vmem>>, vector<8x32xf32>,
      %c3_i32_216 = arith.constant 3 : i32
      %c8_i32_217 = arith.constant 8 : i32
      %457 = arith.muli %c3_i32_216, %c8_i32_217 : i32
      %458 = tpu.assume_multiple %457, 8 : i32
      %459 = arith.index_cast %458 : i32 to index
      %c0_218 = arith.constant 0 : index
      %460 = vector.load %arg17[%459, %c0_218] : memref<64x128xf32, #tpu.memory_space<vmem>>, vector<8x128xf32>
      %461 = arith.addf %460, %23 : vector<8x128xf32>
      %c0_219 = arith.constant 0 : index
      %c0_220 = arith.constant 0 : index
      %462 = vector.load %arg15[%c0_219, %c0_220] : memref<8x32xf32, #tpu.memory_space<vmem>>, vector<8x32xf32>
      %cst_221 = arith.constant dense<0.000000e+00> : vector<8x128xf32>
      %463 = tpu.matmul %462, %25, %cst_221 {dimension_numbers = #tpu.dot_dimension_numbers<[1], [0], [0], [1], [0, 0, 1, 1], [], []>} : vector<8x32xf32>, vector<32x128xf32>, vector<8x128xf32> -> vector<8x128xf32>
      %464 = arith.addf %461, %463 : vector<8x128xf32>
      %465 = vector.extract_strided_slice %464 {offsets = [0, 0], sizes = [8, 32], strides = [1, 1]} : vector<8x128xf32> to vector<8x32xf32>
      %466 = arith.negf %465 : vector<8x32xf32>
      %467 = math.exp %466 : vector<8x32xf32>
      %cst_222 = arith.constant 1.000000e+00 : f32
      %468 = vector.broadcast %cst_222 : f32 to vector<8x32xf32>
      %469 = arith.addf %468, %467 : vector<8x32xf32>
      %470 = arith.divf %468, %469 : vector<8x32xf32>
      %471 = vector.extract_strided_slice %464 {offsets = [0, 32], sizes = [8, 32], strides = [1, 1]} : vector<8x128xf32> to vector<8x32xf32>
      %472 = arith.negf %471 : vector<8x32xf32>
      %473 = math.exp %472 : vector<8x32xf32>
      %cst_223 = arith.constant 1.000000e+00 : f32
      %474 = vector.broadcast %cst_223 : f32 to vector<8x32xf32>
      %475 = arith.addf %474, %473 : vector<8x32xf32>
      %476 = arith.divf %474, %475 : vector<8x32xf32>
      %477 = vector.extract_strided_slice %464 {offsets = [0, 64], sizes = [8, 32], strides = [1, 1]} : vector<8x128xf32> to vector<8x32xf32>
      %478 = math.tanh %477 : vector<8x32xf32>
      %479 = vector.extract_strided_slice %464 {offsets = [0, 96], sizes = [8, 32], strides = [1, 1]} : vector<8x128xf32> to vector<8x32xf32>
      %480 = arith.negf %479 : vector<8x32xf32>
      %481 = math.exp %480 : vector<8x32xf32>
      %cst_224 = arith.constant 1.000000e+00 : f32
      %482 = vector.broadcast %cst_224 : f32 to vector<8x32xf32>
      %483 = arith.addf %482, %481 : vector<8x32xf32>
      %484 = arith.divf %482, %483 : vector<8x32xf32>
      %c0_225 = arith.constant 0 : index
      %c0_226 = arith.constant 0 : index
      %485 = vector.load %arg16[%c0_225, %c0_226] : memref<8x32xf32, #tpu.memory_space<vmem>>, vector<8x32xf32>
      %486 = arith.mulf %476, %485 : vector<8x32xf32>
      %487 = arith.mulf %470, %478 : vector<8x32xf32>
      %488 = arith.addf %486, %487 : vector<8x32xf32>
      %489 = math.tanh %488 : vector<8x32xf32>
      %490 = arith.mulf %484, %489 : vector<8x32xf32>
      %c0_227 = arith.constant 0 : index
      %c0_228 = arith.constant 0 : index
      %491 = vector.load %arg16[%c0_227, %c0_228] : memref<8x32xf32, #tpu.memory_space<vmem>>, vector<8x32xf32>
      tpu.vector_store %arg16[%c0_227, %c0_228], %488 {strides = array<i32>} : memref<8x32xf32, #tpu.memory_space<vmem>>, vector<8x32xf32>,
      %c0_229 = arith.constant 0 : index
      %c0_230 = arith.constant 0 : index
      %492 = vector.load %arg15[%c0_229, %c0_230] : memref<8x32xf32, #tpu.memory_space<vmem>>, vector<8x32xf32>
      tpu.vector_store %arg15[%c0_229, %c0_230], %490 {strides = array<i32>} : memref<8x32xf32, #tpu.memory_space<vmem>>, vector<8x32xf32>,
      %493 = arith.index_cast %458 : i32 to index
      %c0_231 = arith.constant 0 : index
      %494 = vector.load %arg18[%493, %c0_231] : memref<64x32xf32, #tpu.memory_space<vmem>>, vector<8x32xf32>
      tpu.vector_store %arg18[%493, %c0_231], %490 {strides = array<i32>} : memref<64x32xf32, #tpu.memory_space<vmem>>, vector<8x32xf32>,
      %c4_i32_232 = arith.constant 4 : i32
      %c8_i32_233 = arith.constant 8 : i32
      %495 = arith.muli %c4_i32_232, %c8_i32_233 : i32
      %496 = tpu.assume_multiple %495, 8 : i32
      %497 = arith.index_cast %496 : i32 to index
      %c0_234 = arith.constant 0 : index
      %498 = vector.load %arg17[%497, %c0_234] : memref<64x128xf32, #tpu.memory_space<vmem>>, vector<8x128xf32>
      %499 = arith.addf %498, %23 : vector<8x128xf32>
      %c0_235 = arith.constant 0 : index
      %c0_236 = arith.constant 0 : index
      %500 = vector.load %arg15[%c0_235, %c0_236] : memref<8x32xf32, #tpu.memory_space<vmem>>, vector<8x32xf32>
      %cst_237 = arith.constant dense<0.000000e+00> : vector<8x128xf32>
      %501 = tpu.matmul %500, %25, %cst_237 {dimension_numbers = #tpu.dot_dimension_numbers<[1], [0], [0], [1], [0, 0, 1, 1], [], []>} : vector<8x32xf32>, vector<32x128xf32>, vector<8x128xf32> -> vector<8x128xf32>
      %502 = arith.addf %499, %501 : vector<8x128xf32>
      %503 = vector.extract_strided_slice %502 {offsets = [0, 0], sizes = [8, 32], strides = [1, 1]} : vector<8x128xf32> to vector<8x32xf32>
      %504 = arith.negf %503 : vector<8x32xf32>
      %505 = math.exp %504 : vector<8x32xf32>
      %cst_238 = arith.constant 1.000000e+00 : f32
      %506 = vector.broadcast %cst_238 : f32 to vector<8x32xf32>
      %507 = arith.addf %506, %505 : vector<8x32xf32>
      %508 = arith.divf %506, %507 : vector<8x32xf32>
      %509 = vector.extract_strided_slice %502 {offsets = [0, 32], sizes = [8, 32], strides = [1, 1]} : vector<8x128xf32> to vector<8x32xf32>
      %510 = arith.negf %509 : vector<8x32xf32>
      %511 = math.exp %510 : vector<8x32xf32>
      %cst_239 = arith.constant 1.000000e+00 : f32
      %512 = vector.broadcast %cst_239 : f32 to vector<8x32xf32>
      %513 = arith.addf %512, %511 : vector<8x32xf32>
      %514 = arith.divf %512, %513 : vector<8x32xf32>
      %515 = vector.extract_strided_slice %502 {offsets = [0, 64], sizes = [8, 32], strides = [1, 1]} : vector<8x128xf32> to vector<8x32xf32>
      %516 = math.tanh %515 : vector<8x32xf32>
      %517 = vector.extract_strided_slice %502 {offsets = [0, 96], sizes = [8, 32], strides = [1, 1]} : vector<8x128xf32> to vector<8x32xf32>
      %518 = arith.negf %517 : vector<8x32xf32>
      %519 = math.exp %518 : vector<8x32xf32>
      %cst_240 = arith.constant 1.000000e+00 : f32
      %520 = vector.broadcast %cst_240 : f32 to vector<8x32xf32>
      %521 = arith.addf %520, %519 : vector<8x32xf32>
      %522 = arith.divf %520, %521 : vector<8x32xf32>
      %c0_241 = arith.constant 0 : index
      %c0_242 = arith.constant 0 : index
      %523 = vector.load %arg16[%c0_241, %c0_242] : memref<8x32xf32, #tpu.memory_space<vmem>>, vector<8x32xf32>
      %524 = arith.mulf %514, %523 : vector<8x32xf32>
      %525 = arith.mulf %508, %516 : vector<8x32xf32>
      %526 = arith.addf %524, %525 : vector<8x32xf32>
      %527 = math.tanh %526 : vector<8x32xf32>
      %528 = arith.mulf %522, %527 : vector<8x32xf32>
      %c0_243 = arith.constant 0 : index
      %c0_244 = arith.constant 0 : index
      %529 = vector.load %arg16[%c0_243, %c0_244] : memref<8x32xf32, #tpu.memory_space<vmem>>, vector<8x32xf32>
      tpu.vector_store %arg16[%c0_243, %c0_244], %526 {strides = array<i32>} : memref<8x32xf32, #tpu.memory_space<vmem>>, vector<8x32xf32>,
      %c0_245 = arith.constant 0 : index
      %c0_246 = arith.constant 0 : index
      %530 = vector.load %arg15[%c0_245, %c0_246] : memref<8x32xf32, #tpu.memory_space<vmem>>, vector<8x32xf32>
      tpu.vector_store %arg15[%c0_245, %c0_246], %528 {strides = array<i32>} : memref<8x32xf32, #tpu.memory_space<vmem>>, vector<8x32xf32>,
      %531 = arith.index_cast %496 : i32 to index
      %c0_247 = arith.constant 0 : index
      %532 = vector.load %arg18[%531, %c0_247] : memref<64x32xf32, #tpu.memory_space<vmem>>, vector<8x32xf32>
      tpu.vector_store %arg18[%531, %c0_247], %528 {strides = array<i32>} : memref<64x32xf32, #tpu.memory_space<vmem>>, vector<8x32xf32>,
      %c5_i32_248 = arith.constant 5 : i32
      %c8_i32_249 = arith.constant 8 : i32
      %533 = arith.muli %c5_i32_248, %c8_i32_249 : i32
      %534 = tpu.assume_multiple %533, 8 : i32
      %535 = arith.index_cast %534 : i32 to index
      %c0_250 = arith.constant 0 : index
      %536 = vector.load %arg17[%535, %c0_250] : memref<64x128xf32, #tpu.memory_space<vmem>>, vector<8x128xf32>
      %537 = arith.addf %536, %23 : vector<8x128xf32>
      %c0_251 = arith.constant 0 : index
      %c0_252 = arith.constant 0 : index
      %538 = vector.load %arg15[%c0_251, %c0_252] : memref<8x32xf32, #tpu.memory_space<vmem>>, vector<8x32xf32>
      %cst_253 = arith.constant dense<0.000000e+00> : vector<8x128xf32>
      %539 = tpu.matmul %538, %25, %cst_253 {dimension_numbers = #tpu.dot_dimension_numbers<[1], [0], [0], [1], [0, 0, 1, 1], [], []>} : vector<8x32xf32>, vector<32x128xf32>, vector<8x128xf32> -> vector<8x128xf32>
      %540 = arith.addf %537, %539 : vector<8x128xf32>
      %541 = vector.extract_strided_slice %540 {offsets = [0, 0], sizes = [8, 32], strides = [1, 1]} : vector<8x128xf32> to vector<8x32xf32>
      %542 = arith.negf %541 : vector<8x32xf32>
      %543 = math.exp %542 : vector<8x32xf32>
      %cst_254 = arith.constant 1.000000e+00 : f32
      %544 = vector.broadcast %cst_254 : f32 to vector<8x32xf32>
      %545 = arith.addf %544, %543 : vector<8x32xf32>
      %546 = arith.divf %544, %545 : vector<8x32xf32>
      %547 = vector.extract_strided_slice %540 {offsets = [0, 32], sizes = [8, 32], strides = [1, 1]} : vector<8x128xf32> to vector<8x32xf32>
      %548 = arith.negf %547 : vector<8x32xf32>
      %549 = math.exp %548 : vector<8x32xf32>
      %cst_255 = arith.constant 1.000000e+00 : f32
      %550 = vector.broadcast %cst_255 : f32 to vector<8x32xf32>
      %551 = arith.addf %550, %549 : vector<8x32xf32>
      %552 = arith.divf %550, %551 : vector<8x32xf32>
      %553 = vector.extract_strided_slice %540 {offsets = [0, 64], sizes = [8, 32], strides = [1, 1]} : vector<8x128xf32> to vector<8x32xf32>
      %554 = math.tanh %553 : vector<8x32xf32>
      %555 = vector.extract_strided_slice %540 {offsets = [0, 96], sizes = [8, 32], strides = [1, 1]} : vector<8x128xf32> to vector<8x32xf32>
      %556 = arith.negf %555 : vector<8x32xf32>
      %557 = math.exp %556 : vector<8x32xf32>
      %cst_256 = arith.constant 1.000000e+00 : f32
      %558 = vector.broadcast %cst_256 : f32 to vector<8x32xf32>
      %559 = arith.addf %558, %557 : vector<8x32xf32>
      %560 = arith.divf %558, %559 : vector<8x32xf32>
      %c0_257 = arith.constant 0 : index
      %c0_258 = arith.constant 0 : index
      %561 = vector.load %arg16[%c0_257, %c0_258] : memref<8x32xf32, #tpu.memory_space<vmem>>, vector<8x32xf32>
      %562 = arith.mulf %552, %561 : vector<8x32xf32>
      %563 = arith.mulf %546, %554 : vector<8x32xf32>
      %564 = arith.addf %562, %563 : vector<8x32xf32>
      %565 = math.tanh %564 : vector<8x32xf32>
      %566 = arith.mulf %560, %565 : vector<8x32xf32>
      %c0_259 = arith.constant 0 : index
      %c0_260 = arith.constant 0 : index
      %567 = vector.load %arg16[%c0_259, %c0_260] : memref<8x32xf32, #tpu.memory_space<vmem>>, vector<8x32xf32>
      tpu.vector_store %arg16[%c0_259, %c0_260], %564 {strides = array<i32>} : memref<8x32xf32, #tpu.memory_space<vmem>>, vector<8x32xf32>,
      %c0_261 = arith.constant 0 : index
      %c0_262 = arith.constant 0 : index
      %568 = vector.load %arg15[%c0_261, %c0_262] : memref<8x32xf32, #tpu.memory_space<vmem>>, vector<8x32xf32>
      tpu.vector_store %arg15[%c0_261, %c0_262], %566 {strides = array<i32>} : memref<8x32xf32, #tpu.memory_space<vmem>>, vector<8x32xf32>,
      %569 = arith.index_cast %534 : i32 to index
      %c0_263 = arith.constant 0 : index
      %570 = vector.load %arg18[%569, %c0_263] : memref<64x32xf32, #tpu.memory_space<vmem>>, vector<8x32xf32>
      tpu.vector_store %arg18[%569, %c0_263], %566 {strides = array<i32>} : memref<64x32xf32, #tpu.memory_space<vmem>>, vector<8x32xf32>,
      %c6_i32_264 = arith.constant 6 : i32
      %c8_i32_265 = arith.constant 8 : i32
      %571 = arith.muli %c6_i32_264, %c8_i32_265 : i32
      %572 = tpu.assume_multiple %571, 8 : i32
      %573 = arith.index_cast %572 : i32 to index
      %c0_266 = arith.constant 0 : index
      %574 = vector.load %arg17[%573, %c0_266] : memref<64x128xf32, #tpu.memory_space<vmem>>, vector<8x128xf32>
      %575 = arith.addf %574, %23 : vector<8x128xf32>
      %c0_267 = arith.constant 0 : index
      %c0_268 = arith.constant 0 : index
      %576 = vector.load %arg15[%c0_267, %c0_268] : memref<8x32xf32, #tpu.memory_space<vmem>>, vector<8x32xf32>
      %cst_269 = arith.constant dense<0.000000e+00> : vector<8x128xf32>
      %577 = tpu.matmul %576, %25, %cst_269 {dimension_numbers = #tpu.dot_dimension_numbers<[1], [0], [0], [1], [0, 0, 1, 1], [], []>} : vector<8x32xf32>, vector<32x128xf32>, vector<8x128xf32> -> vector<8x128xf32>
      %578 = arith.addf %575, %577 : vector<8x128xf32>
      %579 = vector.extract_strided_slice %578 {offsets = [0, 0], sizes = [8, 32], strides = [1, 1]} : vector<8x128xf32> to vector<8x32xf32>
      %580 = arith.negf %579 : vector<8x32xf32>
      %581 = math.exp %580 : vector<8x32xf32>
      %cst_270 = arith.constant 1.000000e+00 : f32
      %582 = vector.broadcast %cst_270 : f32 to vector<8x32xf32>
      %583 = arith.addf %582, %581 : vector<8x32xf32>
      %584 = arith.divf %582, %583 : vector<8x32xf32>
      %585 = vector.extract_strided_slice %578 {offsets = [0, 32], sizes = [8, 32], strides = [1, 1]} : vector<8x128xf32> to vector<8x32xf32>
      %586 = arith.negf %585 : vector<8x32xf32>
      %587 = math.exp %586 : vector<8x32xf32>
      %cst_271 = arith.constant 1.000000e+00 : f32
      %588 = vector.broadcast %cst_271 : f32 to vector<8x32xf32>
      %589 = arith.addf %588, %587 : vector<8x32xf32>
      %590 = arith.divf %588, %589 : vector<8x32xf32>
      %591 = vector.extract_strided_slice %578 {offsets = [0, 64], sizes = [8, 32], strides = [1, 1]} : vector<8x128xf32> to vector<8x32xf32>
      %592 = math.tanh %591 : vector<8x32xf32>
      %593 = vector.extract_strided_slice %578 {offsets = [0, 96], sizes = [8, 32], strides = [1, 1]} : vector<8x128xf32> to vector<8x32xf32>
      %594 = arith.negf %593 : vector<8x32xf32>
      %595 = math.exp %594 : vector<8x32xf32>
      %cst_272 = arith.constant 1.000000e+00 : f32
      %596 = vector.broadcast %cst_272 : f32 to vector<8x32xf32>
      %597 = arith.addf %596, %595 : vector<8x32xf32>
      %598 = arith.divf %596, %597 : vector<8x32xf32>
      %c0_273 = arith.constant 0 : index
      %c0_274 = arith.constant 0 : index
      %599 = vector.load %arg16[%c0_273, %c0_274] : memref<8x32xf32, #tpu.memory_space<vmem>>, vector<8x32xf32>
      %600 = arith.mulf %590, %599 : vector<8x32xf32>
      %601 = arith.mulf %584, %592 : vector<8x32xf32>
      %602 = arith.addf %600, %601 : vector<8x32xf32>
      %603 = math.tanh %602 : vector<8x32xf32>
      %604 = arith.mulf %598, %603 : vector<8x32xf32>
      %c0_275 = arith.constant 0 : index
      %c0_276 = arith.constant 0 : index
      %605 = vector.load %arg16[%c0_275, %c0_276] : memref<8x32xf32, #tpu.memory_space<vmem>>, vector<8x32xf32>
      tpu.vector_store %arg16[%c0_275, %c0_276], %602 {strides = array<i32>} : memref<8x32xf32, #tpu.memory_space<vmem>>, vector<8x32xf32>,
      %c0_277 = arith.constant 0 : index
      %c0_278 = arith.constant 0 : index
      %606 = vector.load %arg15[%c0_277, %c0_278] : memref<8x32xf32, #tpu.memory_space<vmem>>, vector<8x32xf32>
      tpu.vector_store %arg15[%c0_277, %c0_278], %604 {strides = array<i32>} : memref<8x32xf32, #tpu.memory_space<vmem>>, vector<8x32xf32>,
      %607 = arith.index_cast %572 : i32 to index
      %c0_279 = arith.constant 0 : index
      %608 = vector.load %arg18[%607, %c0_279] : memref<64x32xf32, #tpu.memory_space<vmem>>, vector<8x32xf32>
      tpu.vector_store %arg18[%607, %c0_279], %604 {strides = array<i32>} : memref<64x32xf32, #tpu.memory_space<vmem>>, vector<8x32xf32>,
      %c7_i32_280 = arith.constant 7 : i32
      %c8_i32_281 = arith.constant 8 : i32
      %609 = arith.muli %c7_i32_280, %c8_i32_281 : i32
      %610 = tpu.assume_multiple %609, 8 : i32
      %611 = arith.index_cast %610 : i32 to index
      %c0_282 = arith.constant 0 : index
      %612 = vector.load %arg17[%611, %c0_282] : memref<64x128xf32, #tpu.memory_space<vmem>>, vector<8x128xf32>
      %613 = arith.addf %612, %23 : vector<8x128xf32>
      %c0_283 = arith.constant 0 : index
      %c0_284 = arith.constant 0 : index
      %614 = vector.load %arg15[%c0_283, %c0_284] : memref<8x32xf32, #tpu.memory_space<vmem>>, vector<8x32xf32>
      %cst_285 = arith.constant dense<0.000000e+00> : vector<8x128xf32>
      %615 = tpu.matmul %614, %25, %cst_285 {dimension_numbers = #tpu.dot_dimension_numbers<[1], [0], [0], [1], [0, 0, 1, 1], [], []>} : vector<8x32xf32>, vector<32x128xf32>, vector<8x128xf32> -> vector<8x128xf32>
      %616 = arith.addf %613, %615 : vector<8x128xf32>
      %617 = vector.extract_strided_slice %616 {offsets = [0, 0], sizes = [8, 32], strides = [1, 1]} : vector<8x128xf32> to vector<8x32xf32>
      %618 = arith.negf %617 : vector<8x32xf32>
      %619 = math.exp %618 : vector<8x32xf32>
      %cst_286 = arith.constant 1.000000e+00 : f32
      %620 = vector.broadcast %cst_286 : f32 to vector<8x32xf32>
      %621 = arith.addf %620, %619 : vector<8x32xf32>
      %622 = arith.divf %620, %621 : vector<8x32xf32>
      %623 = vector.extract_strided_slice %616 {offsets = [0, 32], sizes = [8, 32], strides = [1, 1]} : vector<8x128xf32> to vector<8x32xf32>
      %624 = arith.negf %623 : vector<8x32xf32>
      %625 = math.exp %624 : vector<8x32xf32>
      %cst_287 = arith.constant 1.000000e+00 : f32
      %626 = vector.broadcast %cst_287 : f32 to vector<8x32xf32>
      %627 = arith.addf %626, %625 : vector<8x32xf32>
      %628 = arith.divf %626, %627 : vector<8x32xf32>
      %629 = vector.extract_strided_slice %616 {offsets = [0, 64], sizes = [8, 32], strides = [1, 1]} : vector<8x128xf32> to vector<8x32xf32>
      %630 = math.tanh %629 : vector<8x32xf32>
      %631 = vector.extract_strided_slice %616 {offsets = [0, 96], sizes = [8, 32], strides = [1, 1]} : vector<8x128xf32> to vector<8x32xf32>
      %632 = arith.negf %631 : vector<8x32xf32>
      %633 = math.exp %632 : vector<8x32xf32>
      %cst_288 = arith.constant 1.000000e+00 : f32
      %634 = vector.broadcast %cst_288 : f32 to vector<8x32xf32>
      %635 = arith.addf %634, %633 : vector<8x32xf32>
      %636 = arith.divf %634, %635 : vector<8x32xf32>
      %c0_289 = arith.constant 0 : index
      %c0_290 = arith.constant 0 : index
      %637 = vector.load %arg16[%c0_289, %c0_290] : memref<8x32xf32, #tpu.memory_space<vmem>>, vector<8x32xf32>
      %638 = arith.mulf %628, %637 : vector<8x32xf32>
      %639 = arith.mulf %622, %630 : vector<8x32xf32>
      %640 = arith.addf %638, %639 : vector<8x32xf32>
      %641 = math.tanh %640 : vector<8x32xf32>
      %642 = arith.mulf %636, %641 : vector<8x32xf32>
      %c0_291 = arith.constant 0 : index
      %c0_292 = arith.constant 0 : index
      %643 = vector.load %arg16[%c0_291, %c0_292] : memref<8x32xf32, #tpu.memory_space<vmem>>, vector<8x32xf32>
      tpu.vector_store %arg16[%c0_291, %c0_292], %640 {strides = array<i32>} : memref<8x32xf32, #tpu.memory_space<vmem>>, vector<8x32xf32>,
      %c0_293 = arith.constant 0 : index
      %c0_294 = arith.constant 0 : index
      %644 = vector.load %arg15[%c0_293, %c0_294] : memref<8x32xf32, #tpu.memory_space<vmem>>, vector<8x32xf32>
      tpu.vector_store %arg15[%c0_293, %c0_294], %642 {strides = array<i32>} : memref<8x32xf32, #tpu.memory_space<vmem>>, vector<8x32xf32>,
      %645 = arith.index_cast %610 : i32 to index
      %c0_295 = arith.constant 0 : index
      %646 = vector.load %arg18[%645, %c0_295] : memref<64x32xf32, #tpu.memory_space<vmem>>, vector<8x32xf32>
      tpu.vector_store %arg18[%645, %c0_295], %642 {strides = array<i32>} : memref<64x32xf32, #tpu.memory_space<vmem>>, vector<8x32xf32>,
      %c8_i32_296 = arith.constant 8 : i32
    } else {
    }
    %c0 = arith.constant 0 : index
    %c0_1 = arith.constant 0 : index
    %3 = vector.load %arg18[%c0, %c0_1] : memref<64x32xf32, #tpu.memory_space<vmem>>, vector<64x32xf32>
    %c0_2 = arith.constant 0 : index
    %c0_3 = arith.constant 0 : index
    %4 = vector.load %arg12[%c0_2, %c0_3] : memref<32x128xf32, #tpu.memory_space<vmem>>, vector<32x128xf32>
    %cst = arith.constant dense<0.000000e+00> : vector<64x128xf32>
    %5 = tpu.matmul %3, %4, %cst {dimension_numbers = #tpu.dot_dimension_numbers<[1], [0], [0], [1], [0, 0, 1, 1], [], []>} : vector<64x32xf32>, vector<32x128xf32>, vector<64x128xf32> -> vector<64x128xf32>
    %c0_4 = arith.constant 0 : index
    %c0_5 = arith.constant 0 : index
    %6 = vector.load %arg13[%c0_4, %c0_5] : memref<1x128xf32, #tpu.memory_space<vmem>>, vector<1x128xf32>
    %7 = vector.broadcast %6 : vector<1x128xf32> to vector<64x128xf32>
    %8 = arith.addf %5, %7 : vector<64x128xf32>
    %c0_6 = arith.constant 0 : index
    %c0_7 = arith.constant 0 : index
    %c0_8 = arith.constant 0 : index
    %9 = vector.load %arg14[%c0_6, %c0_7, %c0_8] : memref<1x64x128xf32, #tpu.memory_space<vmem>>, vector<1x64x128xf32>
    %10 = vector.shape_cast %9 : vector<1x64x128xf32> to vector<64x128xf32>
    %11 = vector.shape_cast %8 : vector<64x128xf32> to vector<1x64x128xf32>
    tpu.vector_store %arg14[%c0_6, %c0_7, %c0_8], %11 {strides = array<i32>} : memref<1x64x128xf32, #tpu.memory_space<vmem>>, vector<1x64x128xf32>,
    return
  }
  func.func @transform_0(%arg0: i32, %arg1: i32) -> (i32, i32, i32) {
    %c0_i32 = arith.constant 0 : i32
    %c0_i32_0 = arith.constant 0 : i32
    %c0_i32_1 = arith.constant 0 : i32
    return %arg0, %c0_i32, %c0_i32_0 : i32, i32, i32
  }
  func.func @transform_1(%arg0: i32, %arg1: i32) -> (i32, i32, i32) {
    %c0_i32 = arith.constant 0 : i32
    %c0_i32_0 = arith.constant 0 : i32
    %c0_i32_1 = arith.constant 0 : i32
    return %arg0, %c0_i32, %c0_i32_0 : i32, i32, i32
  }
  func.func @transform_2(%arg0: i32, %arg1: i32) -> (i32, i32) {
    %c0_i32 = arith.constant 0 : i32
    %c0_i32_0 = arith.constant 0 : i32
    %c0_i32_1 = arith.constant 0 : i32
    return %c0_i32, %c0_i32_0 : i32, i32
  }
  func.func @transform_3(%arg0: i32, %arg1: i32) -> (i32, i32) {
    %c0_i32 = arith.constant 0 : i32
    %c0_i32_0 = arith.constant 0 : i32
    %c0_i32_1 = arith.constant 0 : i32
    return %c0_i32, %c0_i32_0 : i32, i32
  }
  func.func @transform_4(%arg0: i32, %arg1: i32) -> (i32, i32) {
    %c0_i32 = arith.constant 0 : i32
    %c0_i32_0 = arith.constant 0 : i32
    %c0_i32_1 = arith.constant 0 : i32
    return %c0_i32, %c0_i32_0 : i32, i32
  }
  func.func @transform_5(%arg0: i32, %arg1: i32) -> (i32, i32) {
    %c0_i32 = arith.constant 0 : i32
    %c0_i32_0 = arith.constant 0 : i32
    %c0_i32_1 = arith.constant 0 : i32
    return %c0_i32, %c0_i32_0 : i32, i32
  }
  func.func @transform_6(%arg0: i32, %arg1: i32) -> (i32, i32) {
    %c0_i32 = arith.constant 0 : i32
    %c0_i32_0 = arith.constant 0 : i32
    %c0_i32_1 = arith.constant 0 : i32
    return %c0_i32, %c0_i32_0 : i32, i32
  }
  func.func @transform_7(%arg0: i32, %arg1: i32) -> (i32, i32) {
    %c0_i32 = arith.constant 0 : i32
    %c0_i32_0 = arith.constant 0 : i32
    %c0_i32_1 = arith.constant 0 : i32
    return %c0_i32, %c0_i32_0 : i32, i32
  }
  func.func @transform_8(%arg0: i32, %arg1: i32) -> (i32, i32) {
    %c0_i32 = arith.constant 0 : i32
    %c0_i32_0 = arith.constant 0 : i32
    %c0_i32_1 = arith.constant 0 : i32
    return %c0_i32, %c0_i32_0 : i32, i32
  }
  func.func @transform_9(%arg0: i32, %arg1: i32) -> (i32, i32) {
    %c0_i32 = arith.constant 0 : i32
    %c0_i32_0 = arith.constant 0 : i32
    %c0_i32_1 = arith.constant 0 : i32
    return %c0_i32, %c0_i32_0 : i32, i32
  }
  func.func @transform_10(%arg0: i32, %arg1: i32) -> (i32, i32) {
    %c0_i32 = arith.constant 0 : i32
    %c0_i32_0 = arith.constant 0 : i32
    return %c0_i32, %arg1 : i32, i32
  }
  func.func @transform_11(%arg0: i32, %arg1: i32) -> (i32, i32) {
    %c0_i32 = arith.constant 0 : i32
    %c0_i32_0 = arith.constant 0 : i32
    return %c0_i32, %arg1 : i32, i32
  }
  func.func @transform_12(%arg0: i32, %arg1: i32) -> (i32, i32, i32) {
    %c0_i32 = arith.constant 0 : i32
    %c0_i32_0 = arith.constant 0 : i32
    return %arg0, %c0_i32, %arg1 : i32, i32, i32
  }
}

</mosaic_0001>

<bundles_post_ra>
// kernel: tpu_custom_call.1
= control target key start
LH: loop header
LB: loop body
LE: loop exit
PB: predicated region body
PF: predicated region fallthrough
CT: control target
= control target key end

     0   :  { %17 = vsyncpa [#allocation7], 0  ;;  %s4409_s0 = inlined_call_operand.hbm [shape: f32[1,8,32], index: 0, kind: input, shape index: {}]   ;;  %s4410_s1 = inlined_call_operand.hbm [shape: f32[1,64,32], index: 1, kind: input, shape index: {}]   ;;  %s4411_s2 = inlined_call_operand.hbm [shape: f32[32,128], index: 2, kind: input, shape index: {}]   ;;  %s4412_s3 = inlined_call_operand.hbm [shape: f32[32,128], index: 3, kind: input, shape index: {}]   ;;  %s4413_s4 = inlined_call_operand.hbm [shape: f32[32,128], index: 4, kind: input, shape index: {}]   ;;  %s4414_s5 = inlined_call_operand.hbm [shape: f32[1,128], index: 5, kind: input, shape index: {}]   ;;  %s4415_s6 = inlined_call_operand.hbm [shape: f32[32,128], index: 6, kind: input, shape index: {}]   ;;  %s4416_s7 = inlined_call_operand.hbm [shape: f32[32,128], index: 7, kind: input, shape index: {}]   ;;  %s4417_s8 = inlined_call_operand.hbm [shape: f32[32,128], index: 8, kind: input, shape index: {}]   ;;  %s4418_s9 = inlined_call_operand.hbm [shape: f32[1,128], index: 9, kind: input, shape index: {}]   ;;  %s4419_s10 = inlined_call_operand.hbm [shape: f32[32,128], index: 10, kind: input, shape index: {}]   ;;  %s4420_s11 = inlined_call_operand.hbm [shape: f32[1,128], index: 11, kind: input, shape index: {}]   ;;  %s4421_s12 = inlined_call_operand.hbm [shape: f32[1,64,128], index: 12, kind: output, shape index: {}]  }
   0x1   :  { %18 = vsyncpa [#allocation10], 0 }
   0x2   :  { %19 = vsyncpa [#allocation13], 0 }
   0x3   :  { %20 = vsyncpa [#allocation16], 0 }
   0x4   :  { %21 = vsyncpa [#allocation19], 0 }
   0x5   :  { %22 = vsyncpa [#allocation22], 0 }
   0x6   :  { %23 = vsyncpa [#allocation25], 0 }
   0x7   :  { %24 = vsyncpa [#allocation8], 0  ;;  %s3770_s21 = smov [#allocation9]   ;;  %s3468_s25 = scalar_lea.hbm %s4410_s1, 1024 }
   0x8   :  { %s40_s22 = sshll.u32 %s3770_s21, 4  ;;  %p3469_p0 = scmp.ne.s32.totalorder %s4410_s1, %s3468_s25  ;;  %s41_s22 = int_to_ptr.vmem [resolvable:$true] %s40_s22 }
   0x9   :  { %p3472_p1 = scmp.lt.u32.totalorder %s3468_s25, %s4410_s1 }
   0xb   :  { %p3474_p2 = pnand %p3472_p1, %p3469_p0 }
   0xd   :  { %3477 = shalt.err (!%p3474_p2)
}
   0xe   :  { %s3478_s30 = scalar_lea.vmem %s41_s22, 1024  ;;  %p3483_p4 = scmp.lt.s32.totalorder %s41_s22, %s41_s22 }
   0xf   :  { %p3479_p3 = scmp.ne.s32.totalorder %s41_s22, %s3478_s30  ;;  %p3484_p5 = scmp.lt.s32.totalorder %s3478_s30, %s3478_s30 }
  0x11   :  { %p3485_p6 = por %p3484_p5, %p3483_p4 }
  0x13   :  { %p3486_p7 = pnand %p3485_p6, %p3479_p3 }
  0x15   :  { %3489 = shalt.err (!%p3486_p7)
}
  0x16   :  { %s3771_s13 = smov 128   ;;  %s3772_s14 = smov 8  }
  0x17   :  { %46 = dma.hbm_to_vmem [thread:$0]  %s4410_s1, 1024, %s41_s22, [#allocation10], %s3771_s13, %s3771_s13, %s3772_s14  }
  0x18   :  { %s3773_s17 = smov [#allocation12]   ;;  %s3774_s19 = smov [#allocation15]  }
  0x19   :  { %s64_s18 = sshll.u32 %s3773_s17, 4  ;;  %s89_s20 = sshll.u32 %s3774_s19, 4  ;;  %s65_s18 = int_to_ptr.vmem [resolvable:$true] %s64_s18  ;;  %s90_s20 = int_to_ptr.vmem [resolvable:$true] %s89_s20 }
  0x1a   :  { %s3490_s24 = scalar_lea.hbm %s4412_s3, 512 }
  0x1b   :  { %p3491_p8 = scmp.ne.s32.totalorder %s4412_s3, %s3490_s24  ;;  %p3494_p9 = scmp.lt.u32.totalorder %s3490_s24, %s4412_s3 }
  0x1d   :  { %p3496_p10 = pnand %p3494_p9, %p3491_p8 }
  0x1f   :  { %3499 = shalt.err (!%p3496_p10)
}
  0x20   :  { %s3500_s1 = scalar_lea.vmem %s65_s18, 512  ;;  %p3505_p12 = scmp.lt.s32.totalorder %s65_s18, %s65_s18 }
  0x21   :  { %p3501_p11 = scmp.ne.s32.totalorder %s65_s18, %s3500_s1  ;;  %p3506_p13 = scmp.lt.s32.totalorder %s3500_s1, %s3500_s1 }
  0x23   :  { %p3507_p0 = por %p3506_p13, %p3505_p12 }
  0x25   :  { %p3508_p1 = pnand %p3507_p0, %p3501_p11 }
  0x27   :  { %3511 = shalt.err (!%p3508_p1)
}
  0x28   :  { %70 = dma.hbm_to_vmem [thread:$0]  %s4412_s3, 512, %s65_s18, [#allocation13], %s3771_s13, %s3771_s13, %s3772_s14  }
  0x29   :  { %s3512_s16 = scalar_lea.hbm %s4414_s5, 16 }
  0x2a   :  { %p3513_p2 = scmp.ne.s32.totalorder %s4414_s5, %s3512_s16  ;;  %p3516_p3 = scmp.lt.u32.totalorder %s3512_s16, %s4414_s5 }
  0x2c   :  { %p3518_p4 = pnand %p3516_p3, %p3513_p2 }
  0x2e   :  { %3521 = shalt.err (!%p3518_p4)
}
  0x2f   :  { %s3522_s24 = scalar_lea.vmem %s90_s20, 16  ;;  %s3526_s25 = scalar_lea.vmem %s90_s20, 32 }
  0x30   :  { %p3523_p5 = scmp.ne.s32.totalorder %s90_s20, %s3522_s24  ;;  %p3527_p6 = scmp.lt.s32.totalorder %s90_s20, %s90_s20 }
  0x31   :  { %p3528_p7 = scmp.lt.s32.totalorder %s3526_s25, %s3522_s24 }
  0x33   :  { %p3529_p8 = por %p3528_p7, %p3527_p6 }
  0x35   :  { %p3530_p9 = pnand %p3529_p8, %p3523_p5 }
  0x37   :  { %3533 = shalt.err (!%p3530_p9)
}
  0x38   :  { %92 = dma.hbm_to_vmem [thread:$0]  %s4414_s5, 16, %s90_s20, [#allocation16]  }
  0x39   :  { %s3775_s26 = smov [#allocation18]   ;;  %s3776_s28 = smov [#allocation21]  }
  0x3a   :  { %s110_s27 = sshll.u32 %s3775_s26, 4  ;;  %s135_s1 = sshll.u32 %s3776_s28, 4  ;;  %s111_s27 = int_to_ptr.vmem [resolvable:$true] %s110_s27  ;;  %s136_s1 = int_to_ptr.vmem [resolvable:$true] %s135_s1 }
  0x3b   :  { %s3534_s30 = scalar_lea.hbm %s4416_s7, 512 }
  0x3c   :  { %p3535_p10 = scmp.ne.s32.totalorder %s4416_s7, %s3534_s30  ;;  %p3538_p11 = scmp.lt.u32.totalorder %s3534_s30, %s4416_s7 }
  0x3e   :  { %p3540_p12 = pnand %p3538_p11, %p3535_p10 }
  0x40   :  { %3543 = shalt.err (!%p3540_p12)
}
  0x41   :  { %s3544_s5 = scalar_lea.vmem %s111_s27, 512  ;;  %p3549_p0 = scmp.lt.s32.totalorder %s111_s27, %s111_s27 }
  0x42   :  { %p3545_p13 = scmp.ne.s32.totalorder %s111_s27, %s3544_s5  ;;  %p3550_p1 = scmp.lt.s32.totalorder %s3544_s5, %s3544_s5 }
  0x44   :  { %p3551_p2 = por %p3550_p1, %p3549_p0 }
  0x46   :  { %p3552_p3 = pnand %p3551_p2, %p3545_p13 }
  0x48   :  { %3555 = shalt.err (!%p3552_p3)
}
  0x49   :  { %116 = dma.hbm_to_vmem [thread:$0]  %s4416_s7, 512, %s111_s27, [#allocation19], %s3771_s13, %s3771_s13, %s3772_s14  }
  0x4a   :  { %s3556_s25 = scalar_lea.hbm %s4418_s9, 16 }
  0x4b   :  { %p3557_p4 = scmp.ne.s32.totalorder %s4418_s9, %s3556_s25  ;;  %p3560_p5 = scmp.lt.u32.totalorder %s3556_s25, %s4418_s9 }
  0x4d   :  { %p3562_p6 = pnand %p3560_p5, %p3557_p4 }
  0x4f   :  { %3565 = shalt.err (!%p3562_p6)
}
  0x50   :  { %s3566_s22 = scalar_lea.vmem %s136_s1, 16  ;;  %s3570_s29 = scalar_lea.vmem %s136_s1, 32 }
  0x51   :  { %p3567_p7 = scmp.ne.s32.totalorder %s136_s1, %s3566_s22  ;;  %p3571_p8 = scmp.lt.s32.totalorder %s136_s1, %s136_s1 }
  0x52   :  { %p3572_p9 = scmp.lt.s32.totalorder %s3570_s29, %s3566_s22 }
  0x54   :  { %p3573_p10 = por %p3572_p9, %p3571_p8 }
  0x56   :  { %p3574_p11 = pnand %p3573_p10, %p3567_p7 }
  0x58   :  { %3577 = shalt.err (!%p3574_p11)
}
  0x59   :  { %138 = dma.hbm_to_vmem [thread:$0]  %s4418_s9, 16, %s136_s1, [#allocation22]  }
  0x5a   :  { %s3777_s30 = smov [#allocation6]   ;;  %s3778_s16 = smov [#allocation11]  }
  0x5b   :  { %s31_s15 = sshll.u32 %s3777_s30, 4  ;;  %s52_s17 = sshll.u32 %s3778_s16, 4  ;;  %s32_s15 = int_to_ptr.vmem [resolvable:$true] %s31_s15  ;;  %s53_s17 = int_to_ptr.vmem [resolvable:$true] %s52_s17 }
  0x5c   :  { %s3578_s20 = scalar_lea.hbm %s4409_s0, 128 }
  0x5d   :  { %p3579_p12 = scmp.ne.s32.totalorder %s4409_s0, %s3578_s20  ;;  %p3582_p13 = scmp.lt.u32.totalorder %s3578_s20, %s4409_s0 }
  0x5f   :  { %p3584_p0 = pnand %p3582_p13, %p3579_p12 }
  0x61   :  { %3587 = shalt.err (!%p3584_p0)
}
  0x62   :  { %s3588_s9 = scalar_lea.vmem %s32_s15, 128  ;;  %p3593_p2 = scmp.lt.s32.totalorder %s32_s15, %s32_s15 }
  0x63   :  { %p3589_p1 = scmp.ne.s32.totalorder %s32_s15, %s3588_s9  ;;  %p3594_p3 = scmp.lt.s32.totalorder %s3588_s9, %s3588_s9 }
  0x65   :  { %p3595_p4 = por %p3594_p3, %p3593_p2 }
  0x67   :  { %p3596_p5 = pnand %p3595_p4, %p3589_p1 }
  0x69   :  { %3599 = shalt.err (!%p3596_p5)
}
  0x6a   :  { %34 = dma.hbm_to_vmem [thread:$0]  %s4409_s0, 128, %s32_s15, [#allocation7]  }
  0x6b   :  { %s3600_s28 = scalar_lea.hbm %s4411_s2, 512 }
  0x6c   :  { %p3601_p6 = scmp.ne.s32.totalorder %s4411_s2, %s3600_s28  ;;  %p3604_p7 = scmp.lt.u32.totalorder %s3600_s28, %s4411_s2 }
  0x6e   :  { %p3606_p8 = pnand %p3604_p7, %p3601_p6 }
  0x70   :  { %3609 = shalt.err (!%p3606_p8)
}
  0x71   :  { %s3610_s30 = scalar_lea.vmem %s53_s17, 512  ;;  %p3615_p10 = scmp.lt.s32.totalorder %s53_s17, %s53_s17 }
  0x72   :  { %p3611_p9 = scmp.ne.s32.totalorder %s53_s17, %s3610_s30  ;;  %p3616_p11 = scmp.lt.s32.totalorder %s3610_s30, %s3610_s30 }
  0x74   :  { %p3617_p12 = por %p3616_p11, %p3615_p10 }
  0x76   :  { %p3618_p13 = pnand %p3617_p12, %p3611_p9 }
  0x78   :  { %3621 = shalt.err (!%p3618_p13)
}
  0x79   :  { %58 = dma.hbm_to_vmem [thread:$0]  %s4411_s2, 512, %s53_s17, [#allocation10], %s3771_s13, %s3771_s13, %s3772_s14  }
  0x7a   :  { %s3779_s16 = smov [#allocation14]   ;;  %s3780_s5 = smov [#allocation17]  }
  0x7b   :  { %s76_s19 = sshll.u32 %s3779_s16, 4  ;;  %s98_s20 = sshll.u32 %s3780_s5, 4  ;;  %s77_s19 = int_to_ptr.vmem [resolvable:$true] %s76_s19  ;;  %s99_s20 = int_to_ptr.vmem [resolvable:$true] %s98_s20 }
  0x7c   :  { %s3622_s24 = scalar_lea.hbm %s4413_s4, 512 }
  0x7d   :  { %p3623_p0 = scmp.ne.s32.totalorder %s4413_s4, %s3622_s24  ;;  %p3626_p1 = scmp.lt.u32.totalorder %s3622_s24, %s4413_s4 }
  0x7f   :  { %p3628_p2 = pnand %p3626_p1, %p3623_p0 }
  0x81   :  { %3631 = shalt.err (!%p3628_p2)
}
  0x82   :  { %s3632_s2 = scalar_lea.vmem %s77_s19, 512  ;;  %p3637_p4 = scmp.lt.s32.totalorder %s77_s19, %s77_s19 }
  0x83   :  { %p3633_p3 = scmp.ne.s32.totalorder %s77_s19, %s3632_s2  ;;  %p3638_p5 = scmp.lt.s32.totalorder %s3632_s2, %s3632_s2 }
  0x85   :  { %p3639_p6 = por %p3638_p5, %p3637_p4 }
  0x87   :  { %p3640_p7 = pnand %p3639_p6, %p3633_p3 }
  0x89   :  { %3643 = shalt.err (!%p3640_p7)
}
  0x8a   :  { %82 = dma.hbm_to_vmem [thread:$0]  %s4413_s4, 512, %s77_s19, [#allocation13], %s3771_s13, %s3771_s13, %s3772_s14  }
  0x8b   :  { %s3644_s22 = scalar_lea.hbm %s4415_s6, 512 }
  0x8c   :  { %p3645_p8 = scmp.ne.s32.totalorder %s4415_s6, %s3644_s22  ;;  %p3648_p9 = scmp.lt.u32.totalorder %s3644_s22, %s4415_s6 }
  0x8e   :  { %p3650_p10 = pnand %p3648_p9, %p3645_p8 }
  0x90   :  { %3653 = shalt.err (!%p3650_p10)
}
  0x91   :  { %s3654_s0 = scalar_lea.vmem %s99_s20, 512  ;;  %p3659_p12 = scmp.lt.s32.totalorder %s99_s20, %s99_s20 }
  0x92   :  { %p3655_p11 = scmp.ne.s32.totalorder %s99_s20, %s3654_s0  ;;  %p3660_p13 = scmp.lt.s32.totalorder %s3654_s0, %s3654_s0 }
  0x94   :  { %p3661_p0 = por %p3660_p13, %p3659_p12 }
  0x96   :  { %p3662_p1 = pnand %p3661_p0, %p3655_p11 }
  0x98   :  { %3665 = shalt.err (!%p3662_p1)
}
  0x99   :  { %104 = dma.hbm_to_vmem [thread:$0]  %s4415_s6, 512, %s99_s20, [#allocation16], %s3771_s13, %s3771_s13, %s3772_s14  }
  0x9a   :  { %s3781_s16 = smov [#allocation20]   ;;  %s3782_s5 = smov [#allocation23]  }
  0x9b   :  { %s122_s19 = sshll.u32 %s3781_s16, 4  ;;  %s144_s21 = sshll.u32 %s3782_s5, 4  ;;  %s123_s19 = int_to_ptr.vmem [resolvable:$true] %s122_s19  ;;  %s145_s21 = int_to_ptr.vmem [resolvable:$true] %s144_s21 }
  0x9c   :  { %s3666_s25 = scalar_lea.hbm %s4417_s8, 512 }
  0x9d   :  { %p3667_p2 = scmp.ne.s32.totalorder %s4417_s8, %s3666_s25  ;;  %p3670_p3 = scmp.lt.u32.totalorder %s3666_s25, %s4417_s8 }
  0x9f   :  { %p3672_p4 = pnand %p3670_p3, %p3667_p2 }
  0xa1   :  { %3675 = shalt.err (!%p3672_p4)
}
  0xa2   :  { %s3676_s6 = scalar_lea.vmem %s123_s19, 512  ;;  %p3681_p6 = scmp.lt.s32.totalorder %s123_s19, %s123_s19 }
  0xa3   :  { %p3677_p5 = scmp.ne.s32.totalorder %s123_s19, %s3676_s6  ;;  %p3682_p7 = scmp.lt.s32.totalorder %s3676_s6, %s3676_s6 }
  0xa5   :  { %p3683_p8 = por %p3682_p7, %p3681_p6 }
  0xa7   :  { %p3684_p9 = pnand %p3683_p8, %p3677_p5 }
  0xa9   :  { %3687 = shalt.err (!%p3684_p9)
}
  0xaa   :  { %128 = dma.hbm_to_vmem [thread:$0]  %s4417_s8, 512, %s123_s19, [#allocation19], %s3771_s13, %s3771_s13, %s3772_s14  }
  0xab   :  { %s3688_s28 = scalar_lea.hbm %s4419_s10, 512 }
  0xac   :  { %p3689_p10 = scmp.ne.s32.totalorder %s4419_s10, %s3688_s28  ;;  %p3692_p11 = scmp.lt.u32.totalorder %s3688_s28, %s4419_s10 }
  0xae   :  { %p3694_p12 = pnand %p3692_p11, %p3689_p10 }
  0xb0   :  { %3697 = shalt.err (!%p3694_p12)
}
  0xb1   :  { %s3698_s30 = scalar_lea.vmem %s145_s21, 512  ;;  %p3703_p0 = scmp.lt.s32.totalorder %s145_s21, %s145_s21 }
  0xb2   :  { %p3699_p13 = scmp.ne.s32.totalorder %s145_s21, %s3698_s30  ;;  %p3704_p1 = scmp.lt.s32.totalorder %s3698_s30, %s3698_s30 }
  0xb4   :  { %p3705_p2 = por %p3704_p1, %p3703_p0 }
  0xb6   :  { %p3706_p3 = pnand %p3705_p2, %p3699_p13 }
  0xb8   :  { %3709 = shalt.err (!%p3706_p3)
}
  0xb9   :  { %150 = dma.hbm_to_vmem [thread:$0]  %s4419_s10, 512, %s145_s21, [#allocation22], %s3771_s13, %s3771_s13, %s3772_s14  }
  0xba   :  { %s3783_s4 = smov [#allocation24]   ;;  %s3710_s5 = scalar_lea.hbm %s4420_s11, 16 }
  0xbb   :  { %s157_s15 = sshll.u32 %s3783_s4, 4  ;;  %p3711_p4 = scmp.ne.s32.totalorder %s4420_s11, %s3710_s5  ;;  %s158_s15 = int_to_ptr.vmem [resolvable:$true] %s157_s15 }
  0xbc   :  { %p3714_p5 = scmp.lt.u32.totalorder %s3710_s5, %s4420_s11 }
  0xbe   :  { %p3716_p6 = pnand %p3714_p5, %p3711_p4 }
  0xc0   :  { %3719 = shalt.err (!%p3716_p6)
}
  0xc1   :  { %s3720_s1 = scalar_lea.vmem %s158_s15, 16  ;;  %s3724_s10 = scalar_lea.vmem %s158_s15, 32 }
  0xc2   :  { %p3721_p7 = scmp.ne.s32.totalorder %s158_s15, %s3720_s1  ;;  %p3725_p8 = scmp.lt.s32.totalorder %s158_s15, %s158_s15 }
  0xc3   :  { %p3726_p9 = scmp.lt.s32.totalorder %s3724_s10, %s3720_s1 }
  0xc5   :  { %p3727_p10 = por %p3726_p9, %p3725_p8 }
  0xc7   :  { %p3728_p11 = pnand %p3727_p10, %p3721_p7 }
  0xc9   :  { %3731 = shalt.err (!%p3728_p11)
}
  0xca   :  { %160 = dma.hbm_to_vmem [thread:$0]  %s4420_s11, 16, %s158_s15, [#allocation25]  }
  0xcb   :  { %3754 = dma.done.wait [#allocation7], 128  }
  0xcc   :  { %3755 = vsyncadd [#allocation7], 4294967168 }
  0xcd   :  { %3756 = dma.done.wait [#allocation10], 1536  }
  0xce   :  { %3757 = vsyncadd [#allocation10], 4294965760 }
  0xcf   :  { %3758 = dma.done.wait [#allocation13], 1024  }
  0xd0   :  { %3759 = vsyncadd [#allocation13], 4294966272 }
  0xd1   :  { %3760 = dma.done.wait [#allocation16], 528  }
  0xd2   :  { %3761 = vsyncadd [#allocation16], 4294966768 }
  0xd3   :  { %3762 = dma.done.wait [#allocation19], 1024  }
  0xd4   :  { %3763 = vsyncadd [#allocation19], 4294966272 }
  0xd5   :  { %3764 = dma.done.wait [#allocation22], 528  }
  0xd6   :  { %3765 = vsyncadd [#allocation22], 4294966768 }
  0xd7   :  { %3766 = dma.done.wait [#allocation25], 16  }
  0xd8   :  { %3767 = vsyncadd [#allocation25], 4294967280  ;;  %vm213_vm0 = vcmask 261120   ;;  %v3784_v0 = vmov 0.0|0.0   ;;  %vm3785_vm1 = vmmov 0   ;;  %v3786_v1 = vmov 0.0  }
  0xd9   :  { %3187 = vmatprep.subr.bf16.mxu1 %v3784_v0  ;;  %2937 = vmatprep.mubr.msk.f32.mxu1 %vm3785_vm1, %v3786_v1  ;;  %525 = vst.msk [vmem:[#allocation2] sm:$0xff] %vm213_vm0, %v3786_v1  ;;  %526 = vst.msk [vmem:[#allocation3] sm:$0xff] %vm213_vm0, %v3786_v1  ;;  %v202_v2 = vld [vmem:[#allocation11] sm:$0xff]  ;;  %v203_v3 = vld [vmem:[#allocation11 + $0x8] sm:$0xff]  ;;  %s3787_s11 = smov 64   ;;  %s3788_s2 = smov 32  }
  0xda   :  { %v384_v4 = vld [vmem:[#allocation12] sm:$0xff]  ;;  %v3188_v5 = vpack.c.bf16 %v203_v3, %v202_v2  ;;  %v385_v6 = vld [vmem:[#allocation12 + $0x8] sm:$0xff]  ;;  %v204_v7 = vld [vmem:[#allocation11 + $0x10] sm:$0xff]  ;;  %s3789_s6 = smov 96   ;;  %s3790_s20 = smov [#allocation26]  }
  0xdb   :  { %v205_v8 = vld [vmem:[#allocation11 + $0x18] sm:$0xff]  ;;  %v3199_v9 = vpack.c.bf16 %v385_v6, %v384_v4  ;;  %v386_v10 = vld [vmem:[#allocation12 + $0x10] sm:$0xff]  ;;  %v376_v14 = vld [vmem:[#allocation9] sm:$0xff]  ;;  %s2724_s17 = sshll.u32 %s3790_s20, 4  ;;  %s2725_s17 = int_to_ptr.vmem [resolvable:$true] %s2724_s17 }
  0xdc   :  { %v387_v11 = vld [vmem:[#allocation12 + $0x18] sm:$0xff]  ;;  %3189 = vmatpush3.bf16.msra.mxu1 %v3188_v5  ;;  %v3191_v12 = vpack.c.bf16 %v205_v8, %v204_v7  ;;  %v287_v15 = vld [vmem:[#allocation17] sm:$0xff]  ;;  %v288_v16 = vld [vmem:[#allocation17 + $0x8] sm:$0xff]  ;;  %2959 = vmatprep.mubr.msk.f32.mxu0 %vm213_vm0, %v376_v14  ;;  %s3732_s18 = scalar_lea.vmem %s2725_s17, 1024  ;;  %p3737_p13 = scmp.lt.s32.totalorder %s2725_s17, %s2725_s17 }
  0xdd   :  { %v3203_v13 = vpack.c.bf16 %v387_v11, %v386_v10  ;;  %3200 = vmatprep.subr.bf16.mxu0 %v3199_v9  ;;  %3190 = vmatprep.subr.bf16.mxu1 %v3784_v0  ;;  %v201_v17 = vld [vmem:[#allocation6] sm:$0xff]  ;;  %v3194_v18 = vpack.c.bf16 %v288_v16, %v287_v15  ;;  %v368_v21 = vld [vmem:[#allocation14] sm:$0xff]  ;;  %v369_v22 = vld [vmem:[#allocation14 + $0x8] sm:$0xff]  ;;  %p3733_p12 = scmp.ne.s32.totalorder %s2725_s17, %s3732_s18  ;;  %p3738_p0 = scmp.lt.s32.totalorder %s3732_s18, %s3732_s18 }
  0xde   :  { %3202 = vmatpush3.bf16.msra.mxu0 %v3199_v9  ;;  %v289_v19 = vld [vmem:[#allocation17 + $0x10] sm:$0xff]  ;;  %v290_v20 = vld [vmem:[#allocation17 + $0x18] sm:$0xff]  ;;  %v377_v23 = vld [vmem:[#allocation9 + $0x8] sm:$0xff]  ;;  %v4038_v26 = vpack.c.bf16 %v369_v22, %v368_v21 }
  0xdf   :  { %3204 = vmatprep.subr.bf16.mxu0 %v3203_v13  ;;  %v378_v24 = vld [vmem:[#allocation9 + $0x10] sm:$0xff]  ;;  %v3197_v25 = vpack.c.bf16 %v290_v20, %v289_v19  ;;  %v371_v28 = vld [vmem:[#allocation14 + $0x18] sm:$0xff]  ;;  %v380_v30 = vld [vmem:[#allocation9 + $0x20] sm:$0xff]  ;;  %p3739_p1 = por %p3738_p0, %p3737_p13 }
  0xe0   :  { %3192 = vmatpush3.bf16.msra.mxu1 %v3191_v12  ;;  %v370_v27 = vld [vmem:[#allocation14 + $0x10] sm:$0xff]  ;;  %v379_v29 = vld [vmem:[#allocation9 + $0x18] sm:$0xff]  ;;  %v381_v32 = vld [vmem:[#allocation9 + $0x28] sm:$0xff] }
  0xe1   :  { %3193 = vmatprep.subr.bf16.mxu1 %v3784_v0  ;;  %v4045_v31 = vpack.c.bf16 %v371_v28, %v370_v27  ;;  %v382_v33 = vld [vmem:[#allocation9 + $0x30] sm:$0xff]  ;;  %v383_v34 = vld [vmem:[#allocation9 + $0x38] sm:$0xff]  ;;  %v529_v35 = vld [vmem:[#allocation2] sm:$0xff]  ;;  %p3740_p2 = pnand %p3739_p1, %p3733_p12 }
  0xe2   :  { %3206 = vmatpush3.bf16.msra.mxu0 %v3203_v13  ;;  %v2742_v36 = vld [vmem:[#allocation15] ss:$0 sm:$0xff]  ;;  %v611_v62 = vld [vmem:[#allocation3] sm:$0xff] }
  0xe3   :  { %2938 = vmatmul.mubr.msk.f32.vlgmr.msra.gmra.mrb[0].mxu1 %vm213_vm0, %v201_v17  ;;  %3219 = vmatprep.subr.bf16.mxu0 %v3784_v0 }
  0xe4   :  { %3195 = vmatpush3.bf16.msra.mxu1 %v3194_v18  ;;  %2948 = vmatprep.mubr.msk.f32.mxu1 %vm3785_vm1, %v3786_v1 }
  0xe5   :  { %2960 = vmatmul.mubr.msk.f32.vlgmr.msra.gmra.mrb[0].mxu0 %vm213_vm0, %v377_v23  ;;  %3196 = vmatprep.subr.bf16.mxu1 %v3784_v0 }
  0xe6   :  { %2962 = vmatprep.mubr.msk.f32.mxu0 %vm213_vm0, %v378_v24  ;;  %3221 = vmatpush3.bf16.msra.mxu0 %v4038_v26 }
  0xe7   :  { %3222 = vmatprep.subr.bf16.mxu0 %v3784_v0 }
  0xe8   :  { %3198 = vmatpush3.bf16.msra.mxu1 %v3197_v25 }
  0xe9   :  { %2963 = vmatmul.mubr.msk.f32.gmra.mrb[2].mxu0 %vm213_vm0, %v379_v29  ;;  %3207 = vmatprep.subr.bf16.mxu1 %v3784_v0 }
  0xea   :  { %2965 = vmatprep.mubr.msk.f32.mxu0 %vm213_vm0, %v380_v30  ;;  %3224 = vmatpush3.bf16.msra.mxu0 %v4045_v31 }
  0xeb   :  { %2949 = vmatmul.mubr.msk.f32.vlgmr.msra.gmra.mrb[2].mxu1 %vm213_vm0, %v201_v17  ;;  %3231 = vmatprep.subr.bf16.mxu0 %v3784_v0 }
  0xec   :  { %3209 = vmatpush3.bf16.msra.mxu1 %v4038_v26  ;;  %2979 = vmatprep.mubr.msk.f32.mxu1 %vm3785_vm1, %v3786_v1 }
  0xed   :  { %2966 = vmatmul.mubr.msk.f32.gmra.mrb[4].mxu0 %vm213_vm0, %v381_v32  ;;  %3210 = vmatprep.subr.bf16.mxu1 %v3784_v0 }
  0xee   :  { %2968 = vmatprep.mubr.msk.f32.mxu0 %vm213_vm0, %v382_v33 }
  0xf0   :  { %3212 = vmatpush3.bf16.msra.mxu1 %v4045_v31 }
  0xf1   :  { %2969 = vmatmul.mubr.msk.f32.gmra.mrb[6].mxu0 %vm213_vm0, %v383_v34  ;;  %3213 = vmatprep.subr.bf16.mxu1 %v3784_v0 }
  0xf2   :  { %3001 = vmatprep.mubr.msk.f32.mxu0 %vm3785_vm1, %v3786_v1 }
  0xf3   :  { %2980 = vmatmul.mubr.msk.f32.vlgmr.msra.gmra.mrb[4].mxu1 %vm213_vm0, %v529_v35 }
  0xf4   :  { %3215 = vmatpush3.bf16.msra.mxu1 %v4038_v26  ;;  %2990 = vmatprep.mubr.msk.f32.mxu1 %vm3785_vm1, %v3786_v1 }
  0xf5   :  { %3216 = vmatprep.subr.bf16.mxu1 %v3784_v0 }
  0xf8   :  { %3218 = vmatpush3.bf16.msra.mxu1 %v4045_v31 }
  0xf9   :  { %3225 = vmatprep.subr.bf16.mxu1 %v3784_v0 }
 0x1b6   :  { %v283_v37 = vpop.f32.mrb[0].mxu1 }
 0x1b7   :  { %v284_v38 = vadd.f32 %v2742_v36, %v283_v37  ;;  %v2939_v39 = vpop.f32.mrb[1].mxu1 }
 0x1b8   :  { %v2961_v40 = vpop.f32.mrb[0].mxu0 }
 0x1b9   :  { %v4071_v41 = vadd.f32 %v2961_v40, %v284_v38  ;;  %v478_v42 = vpop.f32.mrb[1].mxu0 }
 0x1ba   :  { %v528_v43 = vadd.f32 %v478_v42, %v284_v38 }
 0x1bc   :  { %v2964_v44 = vpop.f32.mrb[2].mxu0 }
 0x1bd   :  { %v4073_v45 = vadd.f32 %v2964_v44, %v284_v38  ;;  %v488_v46 = vpop.f32.mrb[3].mxu0 }
 0x1be   :  { %v4075_v47 = vadd.f32 %v488_v46, %v284_v38  ;;  %v4077_v48 = vpop.f32.mrb[2].mxu1 }
 0x1bf   :  { %v2950_v49 = vpop.f32.mrb[3].mxu1 }
 0x1c0   :  { %v2967_v50 = vpop.f32.mrb[4].mxu0 }
 0x1c1   :  { %v4079_v51 = vadd.f32 %v2967_v50, %v284_v38  ;;  %v498_v52 = vpop.f32.mrb[5].mxu0 }
 0x1c2   :  { %v4081_v53 = vadd.f32 %v498_v52, %v284_v38 }
 0x1c4   :  { %v2970_v54 = vpop.f32.mrb[6].mxu0 }
 0x1c5   :  { %v4083_v55 = vadd.f32 %v2970_v54, %v284_v38  ;;  %v508_v56 = vpop.f32.mrb[7].mxu0 }
 0x1c6   :  { %v4085_v57 = vadd.f32 %v508_v56, %v284_v38  ;;  %v599_v58 = vpop.f32.mrb[4].mxu1 }
 0x1c7   :  { %v603_v59 = vadd.f32 %v599_v58, %v528_v43  ;;  %v2981_v60 = vpop.f32.mrb[5].mxu1 }
 0x1c9   :  { %3340 = vtanh.f32 %v603_v59  ;;  %v2755_v63 = vmul.f32 -1.442695, %v603_v59 }
 0x1cb   :  { %3342 = vpow2.f32 %v2755_v63 }
 0x1d3   :  { %v3341_v61 = vpop.eup %3340 }
 0x1d4   :  { %618 = vrot.lane.b32.xlu0 %v3341_v61, %s3787_s11 }
 0x1d5   :  { %v3343_v2 = vpop.eup %3342 }
 0x1d6   :  { %v607_v3 = vadd.f32 1.0, %v3343_v2 }
 0x1d8   :  { %613 = vrot.lane.b32.xlu0 %v611_v62, %s3788_s2  ;;  %3344 = vrcp.f32 %v607_v3 }
 0x1e2   :  { %v3345_v4 = vpop.eup %3344 }
 0x246   :  { %v619_v5 = vpop.permute.xlu0 %618 }
 0x247   :  { %v621_v6 = vmul.f32 %v3345_v4, %v619_v5 }
 0x249   :  { %623 = vrot.lane.b32.xlu1 %v621_v6, %s3788_s2 }
 0x24a   :  { %v614_v7 = vpop.permute.xlu0 %613 }
 0x24b   :  { %v616_v8 = vmul.f32 %v3345_v4, %v614_v7 }
 0x2bb   :  { %v624_v9 = vpop.permute.xlu1 %623 }
 0x2bc   :  { %v626_v10 = vadd.f32 %v624_v9, %v616_v8 }
 0x2be   :  { %3346 = vtanh.f32 %v626_v10 }
 0x2c8   :  { %v3347_v11 = vpop.eup %3346 }
 0x2c9   :  { %629 = vrot.lane.b32.xlu1 %v3347_v11, %s3787_s11 }
 0x2cd   :  { %634 = vrot.lane.b32.xlu1 %v626_v10, %s3789_s6 }
 0x33b   :  { %v630_v12 = vpop.permute.xlu1 %629 }
 0x33c   :  { %v632_v13 = vmul.f32 %v3345_v4, %v630_v12 }
 0x33e   :  { %639 = vrot.lane.b32.xlu0 %v632_v13, %s3788_s2 }
 0x33f   :  { %v635_v14 = vpop.permute.xlu1 %634 }
 0x340   :  { %637 = vst.msk [vmem:[#allocation3] sm:$0xff] %vm213_vm0, %v635_v14 }
 0x347   :  { %v729_v15 = vld [vmem:[#allocation3] sm:$0xff] }
 0x348   :  { %731 = vrot.lane.b32.xlu1 %v729_v15, %s3788_s2 }
 0x3b0   :  { %v640_v16 = vpop.permute.xlu0 %639 }
 0x3b1   :  { %642 = vst.msk [vmem:[#allocation2] sm:$0xff] %vm213_vm0, %v640_v16  ;;  %643 = vst.msk [vmem:[#allocation5] sm:$0xff] %vm213_vm0, %v640_v16 }
 0x3b8   :  { %v647_v17 = vld [vmem:[#allocation2] sm:$0xff] }
 0x3b9   :  { %2991 = vmatmul.mubr.msk.f32.vlgmr.msra.gmra.mrb[6].mxu1 %vm213_vm0, %v647_v17 }
 0x3ba   :  { %3227 = vmatpush3.bf16.msra.mxu1 %v4038_v26  ;;  %3012 = vmatprep.mubr.msk.f32.mxu1 %vm3785_vm1, %v3786_v1  ;;  %v732_v29 = vpop.permute.xlu1 %731 }
 0x3bb   :  { %3228 = vmatprep.subr.bf16.mxu1 %v3784_v0 }
 0x3be   :  { %3230 = vmatpush3.bf16.msra.mxu1 %v4045_v31 }
 0x3bf   :  { %3237 = vmatprep.subr.bf16.mxu1 %v3784_v0 }
 0x48c   :  { %v717_v18 = vpop.f32.mrb[6].mxu1 }
 0x48d   :  { %v721_v19 = vadd.f32 %v717_v18, %v4071_v41  ;;  %v2992_v20 = vpop.f32.mrb[7].mxu1 }
 0x48f   :  { %3348 = vtanh.f32 %v721_v19  ;;  %v2757_v22 = vmul.f32 -1.442695, %v721_v19 }
 0x491   :  { %3350 = vpow2.f32 %v2757_v22 }
 0x499   :  { %v3349_v21 = vpop.eup %3348 }
 0x49a   :  { %736 = vrot.lane.b32.xlu0 %v3349_v21, %s3787_s11 }
 0x49b   :  { %v3351_v23 = vpop.eup %3350 }
 0x49c   :  { %v725_v24 = vadd.f32 1.0, %v3351_v23 }
 0x49e   :  { %3352 = vrcp.f32 %v725_v24 }
 0x4a8   :  { %v3353_v25 = vpop.eup %3352 }
 0x4a9   :  { %v734_v30 = vmul.f32 %v3353_v25, %v732_v29 }
 0x50c   :  { %v737_v27 = vpop.permute.xlu0 %736 }
 0x50d   :  { %v739_v28 = vmul.f32 %v3353_v25, %v737_v27 }
 0x50f   :  { %741 = vrot.lane.b32.xlu0 %v739_v28, %s3788_s2 }
 0x581   :  { %v742_v32 = vpop.permute.xlu0 %741 }
 0x582   :  { %v744_v33 = vadd.f32 %v742_v32, %v734_v30 }
 0x584   :  { %3354 = vtanh.f32 %v744_v33 }
 0x58e   :  { %v3355_v34 = vpop.eup %3354 }
 0x58f   :  { %747 = vrot.lane.b32.xlu1 %v3355_v34, %s3787_s11 }
 0x593   :  { %752 = vrot.lane.b32.xlu1 %v744_v33, %s3789_s6 }
 0x601   :  { %v748_v35 = vpop.permute.xlu1 %747 }
 0x602   :  { %v750_v36 = vmul.f32 %v3353_v25, %v748_v35 }
 0x604   :  { %757 = vrot.lane.b32.xlu0 %v750_v36, %s3788_s2 }
 0x605   :  { %v753_v37 = vpop.permute.xlu1 %752 }
 0x606   :  { %755 = vst.msk [vmem:[#allocation3] sm:$0xff] %vm213_vm0, %v753_v37 }
 0x60d   :  { %v848_v38 = vld [vmem:[#allocation3] sm:$0xff] }
 0x60e   :  { %850 = vrot.lane.b32.xlu1 %v848_v38, %s3788_s2 }
 0x676   :  { %v758_v39 = vpop.permute.xlu0 %757 }
 0x677   :  { %760 = vst.msk [vmem:[#allocation2] sm:$0xff] %vm213_vm0, %v758_v39  ;;  %762 = vst.msk [vmem:[#allocation5 + $0x8] sm:$0xff] %vm213_vm0, %v758_v39 }
 0x67e   :  { %v766_v40 = vld [vmem:[#allocation2] sm:$0xff] }
 0x67f   :  { %3002 = vmatmul.mubr.msk.f32.vlgmr.msra.gmra.mrb[8].mxu0 %vm213_vm0, %v766_v40 }
 0x680   :  { %3233 = vmatpush3.bf16.msra.mxu0 %v4038_v26  ;;  %3023 = vmatprep.mubr.msk.f32.mxu0 %vm3785_vm1, %v3786_v1  ;;  %v851_v58 = vpop.permute.xlu1 %850 }
 0x681   :  { %3234 = vmatprep.subr.bf16.mxu0 %v3784_v0 }
 0x684   :  { %3236 = vmatpush3.bf16.msra.mxu0 %v4045_v31 }
 0x685   :  { %3243 = vmatprep.subr.bf16.mxu0 %v3784_v0 }
 0x752   :  { %v836_v41 = vpop.f32.mrb[8].mxu0 }
 0x753   :  { %v840_v42 = vadd.f32 %v836_v41, %v4075_v47  ;;  %v3003_v43 = vpop.f32.mrb[9].mxu0 }
 0x755   :  { %3356 = vtanh.f32 %v840_v42  ;;  %v2759_v46 = vmul.f32 -1.442695, %v840_v42 }
 0x757   :  { %3358 = vpow2.f32 %v2759_v46 }
 0x75f   :  { %v3357_v44 = vpop.eup %3356 }
 0x760   :  { %855 = vrot.lane.b32.xlu0 %v3357_v44, %s3787_s11 }
 0x761   :  { %v3359_v49 = vpop.eup %3358 }
 0x762   :  { %v844_v50 = vadd.f32 1.0, %v3359_v49 }
 0x764   :  { %3360 = vrcp.f32 %v844_v50 }
 0x76e   :  { %v3361_v52 = vpop.eup %3360 }
 0x76f   :  { %v853_v59 = vmul.f32 %v3361_v52, %v851_v58 }
 0x7d2   :  { %v856_v54 = vpop.permute.xlu0 %855 }
 0x7d3   :  { %v858_v56 = vmul.f32 %v3361_v52, %v856_v54 }
 0x7d5   :  { %860 = vrot.lane.b32.xlu0 %v858_v56, %s3788_s2 }
 0x847   :  { %v861_v60 = vpop.permute.xlu0 %860 }
 0x848   :  { %v863_v61 = vadd.f32 %v861_v60, %v853_v59 }
 0x84a   :  { %3362 = vtanh.f32 %v863_v61 }
 0x854   :  { %v3363_v47 = vpop.eup %3362 }
 0x855   :  { %866 = vrot.lane.b32.xlu1 %v3363_v47, %s3787_s11 }
 0x859   :  { %871 = vrot.lane.b32.xlu1 %v863_v61, %s3789_s6 }
 0x8c7   :  { %v867_v62 = vpop.permute.xlu1 %866 }
 0x8c8   :  { %v869_v63 = vmul.f32 %v3361_v52, %v867_v62 }
 0x8ca   :  { %876 = vrot.lane.b32.xlu0 %v869_v63, %s3788_s2 }
 0x8cb   :  { %v872_v2 = vpop.permute.xlu1 %871 }
 0x8cc   :  { %874 = vst.msk [vmem:[#allocation3] sm:$0xff] %vm213_vm0, %v872_v2 }
 0x8d3   :  { %v967_v3 = vld [vmem:[#allocation3] sm:$0xff] }
 0x8d4   :  { %969 = vrot.lane.b32.xlu1 %v967_v3, %s3788_s2 }
 0x93c   :  { %v877_v4 = vpop.permute.xlu0 %876 }
 0x93d   :  { %879 = vst.msk [vmem:[#allocation2] sm:$0xff] %vm213_vm0, %v877_v4  ;;  %881 = vst.msk [vmem:[#allocation5 + $0x10] sm:$0xff] %vm213_vm0, %v877_v4  ;;  %v1485_v4 = vld [vmem:[#allocation18] sm:$0xff] }
 0x944   :  { %v885_v5 = vld [vmem:[#allocation2] sm:$0xff] }
 0x945   :  { %3013 = vmatmul.mubr.msk.f32.vlgmr.msra.gmra.mrb[8].mxu1 %vm213_vm0, %v885_v5  ;;  %v1486_v5 = vld [vmem:[#allocation18 + $0x8] sm:$0xff] }
 0x946   :  { %3239 = vmatpush3.bf16.msra.mxu1 %v4038_v26  ;;  %3034 = vmatprep.mubr.msk.f32.mxu1 %vm3785_vm1, %v3786_v1  ;;  %v970_v16 = vpop.permute.xlu1 %969 }
 0x947   :  { %3240 = vmatprep.subr.bf16.mxu1 %v3784_v0 }
 0x94a   :  { %3242 = vmatpush3.bf16.msra.mxu1 %v4045_v31 }
 0x94b   :  { %3249 = vmatprep.subr.bf16.mxu1 %v3784_v0 }
 0xa18   :  { %v955_v6 = vpop.f32.mrb[8].mxu1 }
 0xa19   :  { %v959_v7 = vadd.f32 %v955_v6, %v4073_v45  ;;  %v3014_v8 = vpop.f32.mrb[9].mxu1  ;;  %v3255_v6 = vpack.c.bf16 %v1486_v5, %v1485_v4  ;;  %v372_v4 = vld [vmem:[#allocation20] sm:$0xff]  ;;  %v373_v5 = vld [vmem:[#allocation20 + $0x8] sm:$0xff] }
 0xa1b   :  { %3364 = vtanh.f32 %v959_v7  ;;  %v2761_v10 = vmul.f32 -1.442695, %v959_v7 }
 0xa1d   :  { %3366 = vpow2.f32 %v2761_v10 }
 0xa25   :  { %v3365_v9 = vpop.eup %3364 }
 0xa26   :  { %974 = vrot.lane.b32.xlu0 %v3365_v9, %s3787_s11 }
 0xa27   :  { %v3367_v11 = vpop.eup %3366 }
 0xa28   :  { %v963_v12 = vadd.f32 1.0, %v3367_v11 }
 0xa2a   :  { %3368 = vrcp.f32 %v963_v12  ;;  %v1487_v12 = vld [vmem:[#allocation18 + $0x10] sm:$0xff] }
 0xa34   :  { %v3369_v13 = vpop.eup %3368 }
 0xa35   :  { %v972_v17 = vmul.f32 %v3369_v13, %v970_v16  ;;  %v1477_v16 = vld [vmem:[#allocation5] sm:$0xff] }
 0xa98   :  { %v975_v14 = vpop.permute.xlu0 %974 }
 0xa99   :  { %v977_v15 = vmul.f32 %v3369_v13, %v975_v14 }
 0xa9b   :  { %979 = vrot.lane.b32.xlu0 %v977_v15, %s3788_s2 }
 0xb0d   :  { %v980_v18 = vpop.permute.xlu0 %979 }
 0xb0e   :  { %v982_v19 = vadd.f32 %v980_v18, %v972_v17  ;;  %v1478_v17 = vld [vmem:[#allocation5 + $0x8] sm:$0xff]  ;;  %v1479_v18 = vld [vmem:[#allocation5 + $0x10] sm:$0xff] }
 0xb10   :  { %3370 = vtanh.f32 %v982_v19 }
 0xb1a   :  { %v3371_v45 = vpop.eup %3370 }
 0xb1b   :  { %985 = vrot.lane.b32.xlu1 %v3371_v45, %s3787_s11 }
 0xb1f   :  { %990 = vrot.lane.b32.xlu1 %v982_v19, %s3789_s6 }
 0xb8d   :  { %v986_v20 = vpop.permute.xlu1 %985 }
 0xb8e   :  { %v988_v21 = vmul.f32 %v3369_v13, %v986_v20  ;;  %v1488_v13 = vld [vmem:[#allocation18 + $0x18] sm:$0xff] }
 0xb8f   :  { %v3259_v14 = vpack.c.bf16 %v1488_v13, %v1487_v12 }
 0xb90   :  { %995 = vrot.lane.b32.xlu0 %v988_v21, %s3788_s2 }
 0xb91   :  { %v991_v22 = vpop.permute.xlu1 %990 }
 0xb92   :  { %993 = vst.msk [vmem:[#allocation3] sm:$0xff] %vm213_vm0, %v991_v22 }
 0xb99   :  { %v1086_v23 = vld [vmem:[#allocation3] sm:$0xff] }
 0xb9a   :  { %1088 = vrot.lane.b32.xlu1 %v1086_v23, %s3788_s2 }
 0xc02   :  { %v996_v24 = vpop.permute.xlu0 %995 }
 0xc03   :  { %998 = vst.msk [vmem:[#allocation2] sm:$0xff] %vm213_vm0, %v996_v24  ;;  %1000 = vst.msk [vmem:[#allocation5 + $0x18] sm:$0xff] %vm213_vm0, %v996_v24 }
 0xc0a   :  { %v1004_v25 = vld [vmem:[#allocation2] sm:$0xff]  ;;  %v1480_v19 = vld [vmem:[#allocation5 + $0x18] sm:$0xff] }
 0xc0b   :  { %3024 = vmatmul.mubr.msk.f32.vlgmr.msra.gmra.mrb[10].mxu0 %vm213_vm0, %v1004_v25 }
 0xc0c   :  { %3245 = vmatpush3.bf16.msra.mxu0 %v4038_v26  ;;  %3045 = vmatprep.mubr.msk.f32.mxu0 %vm3785_vm1, %v3786_v1  ;;  %v1089_v38 = vpop.permute.xlu1 %1088 }
 0xc0d   :  { %3246 = vmatprep.subr.bf16.mxu0 %v3784_v0 }
 0xc10   :  { %3248 = vmatpush3.bf16.msra.mxu0 %v4045_v31 }
 0xc11   :  { %3256 = vmatprep.subr.bf16.mxu0 %v3255_v6 }
 0xcde   :  { %v1074_v27 = vpop.f32.mrb[10].mxu0 }
 0xcdf   :  { %v1078_v28 = vadd.f32 %v1074_v27, %v4081_v53  ;;  %v3025_v29 = vpop.f32.mrb[11].mxu0 }
 0xce1   :  { %3372 = vtanh.f32 %v1078_v28  ;;  %v2763_v32 = vmul.f32 -1.442695, %v1078_v28 }
 0xce3   :  { %3374 = vpow2.f32 %v2763_v32 }
 0xceb   :  { %v3373_v30 = vpop.eup %3372 }
 0xcec   :  { %1093 = vrot.lane.b32.xlu0 %v3373_v30, %s3787_s11 }
 0xced   :  { %v3375_v33 = vpop.eup %3374 }
 0xcee   :  { %v1082_v34 = vadd.f32 1.0, %v3375_v33 }
 0xcf0   :  { %3376 = vrcp.f32 %v1082_v34 }
 0xcfa   :  { %v3377_v35 = vpop.eup %3376 }
 0xcfb   :  { %v1091_v39 = vmul.f32 %v3377_v35, %v1089_v38 }
 0xd5e   :  { %v1094_v36 = vpop.permute.xlu0 %1093 }
 0xd5f   :  { %v1096_v37 = vmul.f32 %v3377_v35, %v1094_v36 }
 0xd61   :  { %1098 = vrot.lane.b32.xlu0 %v1096_v37, %s3788_s2 }
 0xdd3   :  { %v1099_v40 = vpop.permute.xlu0 %1098 }
 0xdd4   :  { %v1101_v41 = vadd.f32 %v1099_v40, %v1091_v39 }
 0xdd6   :  { %3378 = vtanh.f32 %v1101_v41 }
 0xde0   :  { %v3379_v53 = vpop.eup %3378 }
 0xde1   :  { %1104 = vrot.lane.b32.xlu1 %v3379_v53, %s3787_s11 }
 0xde5   :  { %1109 = vrot.lane.b32.xlu1 %v1101_v41, %s3789_s6 }
 0xe53   :  { %v1105_v42 = vpop.permute.xlu1 %1104 }
 0xe54   :  { %v1107_v43 = vmul.f32 %v3377_v35, %v1105_v42 }
 0xe56   :  { %1114 = vrot.lane.b32.xlu0 %v1107_v43, %s3788_s2 }
 0xe57   :  { %v1110_v44 = vpop.permute.xlu1 %1109 }
 0xe58   :  { %1112 = vst.msk [vmem:[#allocation3] sm:$0xff] %vm213_vm0, %v1110_v44 }
 0xe5f   :  { %v1205_v46 = vld [vmem:[#allocation3] sm:$0xff] }
 0xe60   :  { %1207 = vrot.lane.b32.xlu1 %v1205_v46, %s3788_s2 }
 0xec8   :  { %v1115_v49 = vpop.permute.xlu0 %1114 }
 0xec9   :  { %1117 = vst.msk [vmem:[#allocation2] sm:$0xff] %vm213_vm0, %v1115_v49  ;;  %1119 = vst.msk [vmem:[#allocation5 + $0x20] sm:$0xff] %vm213_vm0, %v1115_v49 }
 0xed0   :  { %v1123_v50 = vld [vmem:[#allocation2] sm:$0xff]  ;;  %v1481_v45 = vld [vmem:[#allocation5 + $0x20] sm:$0xff] }
 0xed1   :  { %3035 = vmatmul.mubr.msk.f32.vlgmr.msra.gmra.mrb[10].mxu1 %vm213_vm0, %v1123_v50 }
 0xed2   :  { %3251 = vmatpush3.bf16.msra.mxu1 %v4038_v26  ;;  %3056 = vmatprep.mubr.msk.f32.mxu1 %vm3785_vm1, %v3786_v1 }
 0xed3   :  { %3252 = vmatprep.subr.bf16.mxu1 %v3784_v0 }
 0xed6   :  { %3254 = vmatpush3.bf16.msra.mxu1 %v4045_v31  ;;  %v1208_v31 = vpop.permute.xlu1 %1207 }
 0xed7   :  { %3263 = vmatprep.subr.bf16.mxu1 %v3784_v0 }
 0xfa4   :  { %v1193_v52 = vpop.f32.mrb[10].mxu1 }
 0xfa5   :  { %v1197_v54 = vadd.f32 %v1193_v52, %v4079_v51  ;;  %v3036_v56 = vpop.f32.mrb[11].mxu1 }
 0xfa7   :  { %3380 = vtanh.f32 %v1197_v54  ;;  %v2765_v59 = vmul.f32 -1.442695, %v1197_v54 }
 0xfa9   :  { %3382 = vpow2.f32 %v2765_v59 }
 0xfb1   :  { %v3381_v58 = vpop.eup %3380 }
 0xfb2   :  { %1212 = vrot.lane.b32.xlu0 %v3381_v58, %s3787_s11 }
 0xfb3   :  { %v3383_v26 = vpop.eup %3382 }
 0xfb4   :  { %v1201_v60 = vadd.f32 1.0, %v3383_v26 }
 0xfb6   :  { %3384 = vrcp.f32 %v1201_v60 }
 0xfc0   :  { %v3385_v61 = vpop.eup %3384 }
 0xfc1   :  { %v1210_v63 = vmul.f32 %v3385_v61, %v1208_v31 }
0x1024   :  { %v1213_v47 = vpop.permute.xlu0 %1212 }
0x1025   :  { %v1215_v62 = vmul.f32 %v3385_v61, %v1213_v47 }
0x1027   :  { %1217 = vrot.lane.b32.xlu0 %v1215_v62, %s3788_s2 }
0x1099   :  { %v1218_v2 = vpop.permute.xlu0 %1217 }
0x109a   :  { %v1220_v3 = vadd.f32 %v1218_v2, %v1210_v63 }
0x109c   :  { %3386 = vtanh.f32 %v1220_v3 }
0x10a6   :  { %v3387_v51 = vpop.eup %3386 }
0x10a7   :  { %1223 = vrot.lane.b32.xlu1 %v3387_v51, %s3787_s11 }
0x10ab   :  { %1228 = vrot.lane.b32.xlu1 %v1220_v3, %s3789_s6 }
0x1119   :  { %v1224_v7 = vpop.permute.xlu1 %1223 }
0x111a   :  { %v1226_v8 = vmul.f32 %v3385_v61, %v1224_v7  ;;  %v374_v7 = vld [vmem:[#allocation20 + $0x10] sm:$0xff] }
0x111c   :  { %1233 = vrot.lane.b32.xlu0 %v1226_v8, %s3788_s2  ;;  %v375_v8 = vld [vmem:[#allocation20 + $0x18] sm:$0xff] }
0x111d   :  { %v1229_v9 = vpop.permute.xlu1 %1228 }
0x111e   :  { %1231 = vst.msk [vmem:[#allocation3] sm:$0xff] %vm213_vm0, %v1229_v9  ;;  %v4223_v9 = vpack.c.bf16 %v375_v8, %v374_v7 }
0x1125   :  { %v1324_v10 = vld [vmem:[#allocation3] sm:$0xff] }
0x1126   :  { %1326 = vrot.lane.b32.xlu1 %v1324_v10, %s3788_s2 }
0x118e   :  { %v1234_v11 = vpop.permute.xlu0 %1233 }
0x118f   :  { %1236 = vst.msk [vmem:[#allocation2] sm:$0xff] %vm213_vm0, %v1234_v11  ;;  %1238 = vst.msk [vmem:[#allocation5 + $0x28] sm:$0xff] %vm213_vm0, %v1234_v11 }
0x1196   :  { %v1242_v15 = vld [vmem:[#allocation2] sm:$0xff]  ;;  %v1482_v20 = vld [vmem:[#allocation5 + $0x28] sm:$0xff] }
0x1197   :  { %3046 = vmatmul.mubr.msk.f32.vlgmr.msra.gmra.mrb[12].mxu0 %vm213_vm0, %v1242_v15 }
0x1198   :  { %3258 = vmatpush3.bf16.msra.mxu0 %v3255_v6  ;;  %3067 = vmatprep.mubr.msk.f32.mxu0 %vm213_vm0, %v1477_v16  ;;  %v1327_v38 = vpop.permute.xlu1 %1326  ;;  %v4220_v6 = vpack.c.bf16 %v373_v5, %v372_v4 }
0x1199   :  { %3260 = vmatprep.subr.bf16.mxu0 %v3259_v14 }
0x119c   :  { %3262 = vmatpush3.bf16.msra.mxu0 %v3259_v14 }
0x119d   :  { %3275 = vmatprep.subr.bf16.mxu0 %v3784_v0 }
0x119f   :  { %3068 = vmatmul.mubr.msk.f32.vlgmr.msra.gmra.mrb[14].mxu0 %vm213_vm0, %v1478_v17  ;;  %v2744_v17 = vld [vmem:[#allocation21] ss:$0 sm:$0xff] }
0x11a0   :  { %3070 = vmatprep.mubr.msk.f32.mxu0 %vm213_vm0, %v1479_v18  ;;  %3277 = vmatpush3.bf16.msra.mxu0 %v4220_v6  ;;  %v4248_v18 = vadd.f32 %v2744_v17, %v4077_v48 }
0x11a1   :  { %3278 = vmatprep.subr.bf16.mxu0 %v3784_v0 }
0x11a3   :  { %3071 = vmatmul.mubr.msk.f32.gmra.mrb[16].mxu0 %vm213_vm0, %v1480_v19 }
0x11a4   :  { %3073 = vmatprep.mubr.msk.f32.mxu0 %vm213_vm0, %v1481_v45  ;;  %3280 = vmatpush3.bf16.msra.mxu0 %v4223_v9 }
0x11a5   :  { %3287 = vmatprep.subr.bf16.mxu0 %v3784_v0 }
0x11a7   :  { %3074 = vmatmul.mubr.msk.f32.gmra.mrb[18].mxu0 %vm213_vm0, %v1482_v20 }
0x126a   :  { %v1312_v21 = vpop.f32.mrb[12].mxu0 }
0x126b   :  { %v1316_v22 = vadd.f32 %v1312_v21, %v4085_v57  ;;  %v3047_v23 = vpop.f32.mrb[13].mxu0 }
0x126d   :  { %3388 = vtanh.f32 %v1316_v22  ;;  %v2767_v33 = vmul.f32 -1.442695, %v1316_v22 }
0x126f   :  { %3390 = vpow2.f32 %v2767_v33 }
0x1272   :  { %v4190_v24 = vpop.f32.mrb[14].mxu0 }
0x1273   :  { %v4192_v25 = vpop.f32.mrb[15].mxu0 }
0x1274   :  { %v1627_v19 = vadd.f32 %v4192_v25, %v4248_v18 }
0x1276   :  { %v4194_v27 = vpop.f32.mrb[16].mxu0 }
0x1277   :  { %v3389_v28 = vpop.eup %3388  ;;  %v4196_v29 = vpop.f32.mrb[17].mxu0 }
0x1278   :  { %1331 = vrot.lane.b32.xlu0 %v3389_v28, %s3787_s11  ;;  %v1861_v8 = vadd.f32 %v4196_v29, %v4248_v18 }
0x1279   :  { %v3391_v57 = vpop.eup %3390 }
0x127a   :  { %v4199_v30 = vpop.f32.mrb[18].mxu0  ;;  %v1320_v34 = vadd.f32 1.0, %v3391_v57 }
0x127b   :  { %v4201_v32 = vpop.f32.mrb[19].mxu0 }
0x127c   :  { %3392 = vrcp.f32 %v1320_v34 }
0x1286   :  { %v3393_v35 = vpop.eup %3392 }
0x1287   :  { %v1329_v39 = vmul.f32 %v3393_v35, %v1327_v38 }
0x12ea   :  { %v1332_v36 = vpop.permute.xlu0 %1331 }
0x12eb   :  { %v1334_v37 = vmul.f32 %v3393_v35, %v1332_v36 }
0x12ed   :  { %1336 = vrot.lane.b32.xlu0 %v1334_v37, %s3788_s2 }
0x135f   :  { %v1337_v40 = vpop.permute.xlu0 %1336 }
0x1360   :  { %v1339_v41 = vadd.f32 %v1337_v40, %v1329_v39 }
0x1362   :  { %3394 = vtanh.f32 %v1339_v41 }
0x136c   :  { %v3395_v53 = vpop.eup %3394 }
0x136d   :  { %1342 = vrot.lane.b32.xlu1 %v3395_v53, %s3787_s11 }
0x1371   :  { %1347 = vrot.lane.b32.xlu1 %v1339_v41, %s3789_s6 }
0x13df   :  { %v1343_v42 = vpop.permute.xlu1 %1342 }
0x13e0   :  { %v1345_v43 = vmul.f32 %v3393_v35, %v1343_v42 }
0x13e2   :  { %1352 = vrot.lane.b32.xlu0 %v1345_v43, %s3788_s2 }
0x13e3   :  { %v1348_v44 = vpop.permute.xlu1 %1347 }
0x13e4   :  { %1350 = vst.msk [vmem:[#allocation3] sm:$0xff] %vm213_vm0, %v1348_v44 }
0x13eb   :  { %v1443_v46 = vld [vmem:[#allocation3] sm:$0xff] }
0x13ec   :  { %1445 = vrot.lane.b32.xlu1 %v1443_v46, %s3788_s2 }
0x1454   :  { %v1353_v49 = vpop.permute.xlu0 %1352 }
0x1455   :  { %1355 = vst.msk [vmem:[#allocation2] sm:$0xff] %vm213_vm0, %v1353_v49  ;;  %1357 = vst.msk [vmem:[#allocation5 + $0x30] sm:$0xff] %vm213_vm0, %v1353_v49  ;;  %v1744_v49 = vadd.f32 %v4190_v24, %v4248_v18 }
0x145c   :  { %v1361_v50 = vld [vmem:[#allocation2] sm:$0xff] }
0x145d   :  { %v1483_v52 = vld [vmem:[#allocation5 + $0x30] sm:$0xff]  ;;  %3057 = vmatmul.mubr.msk.f32.vlgmr.msra.gmra.mrb[12].mxu1 %vm213_vm0, %v1361_v50 }
0x145e   :  { %3076 = vmatprep.mubr.msk.f32.mxu0 %vm213_vm0, %v1483_v52  ;;  %3087 = vmatprep.mubr.msk.f32.mxu1 %vm3785_vm1, %v3786_v1  ;;  %v1446_v63 = vpop.permute.xlu1 %1445 }
0x145f   :  { %3265 = vmatpush3.bf16.msra.mxu1 %v4220_v6 }
0x1460   :  { %3266 = vmatprep.subr.bf16.mxu1 %v3784_v0 }
0x1463   :  { %3268 = vmatpush3.bf16.msra.mxu1 %v4223_v9 }
0x1464   :  { %3269 = vmatprep.subr.bf16.mxu1 %v3784_v0 }
0x1530   :  { %v1431_v54 = vpop.f32.mrb[12].mxu1 }
0x1531   :  { %v1435_v56 = vadd.f32 %v1431_v54, %v4083_v55  ;;  %v3058_v58 = vpop.f32.mrb[13].mxu1 }
0x1533   :  { %3396 = vtanh.f32 %v1435_v56  ;;  %v2769_v26 = vmul.f32 -1.442695, %v1435_v56 }
0x1535   :  { %3398 = vpow2.f32 %v2769_v26 }
0x153d   :  { %v3397_v59 = vpop.eup %3396 }
0x153e   :  { %1450 = vrot.lane.b32.xlu0 %v3397_v59, %s3787_s11 }
0x153f   :  { %v3399_v60 = vpop.eup %3398 }
0x1540   :  { %v1439_v61 = vadd.f32 1.0, %v3399_v60 }
0x1542   :  { %3400 = vrcp.f32 %v1439_v61 }
0x154c   :  { %v3401_v47 = vpop.eup %3400 }
0x154d   :  { %v1448_v2 = vmul.f32 %v3401_v47, %v1446_v63 }
0x15b0   :  { %v1451_v62 = vpop.permute.xlu0 %1450 }
0x15b1   :  { %v1453_v31 = vmul.f32 %v3401_v47, %v1451_v62 }
0x15b3   :  { %1455 = vrot.lane.b32.xlu0 %v1453_v31, %s3788_s2 }
0x1625   :  { %v1456_v3 = vpop.permute.xlu0 %1455 }
0x1626   :  { %v1458_v51 = vadd.f32 %v1456_v3, %v1448_v2 }
0x1628   :  { %3402 = vtanh.f32 %v1458_v51 }
0x1632   :  { %v3403_v55 = vpop.eup %3402 }
0x1633   :  { %1461 = vrot.lane.b32.xlu1 %v3403_v55, %s3787_s11 }
0x1637   :  { %1466 = vrot.lane.b32.xlu1 %v1458_v51, %s3789_s6 }
0x16a5   :  { %v1462_v10 = vpop.permute.xlu1 %1461 }
0x16a6   :  { %v1464_v11 = vmul.f32 %v3401_v47, %v1462_v10 }
0x16a8   :  { %1471 = vrot.lane.b32.xlu0 %v1464_v11, %s3788_s2 }
0x16a9   :  { %v1467_v12 = vpop.permute.xlu1 %1466 }
0x16aa   :  { %1469 = vst.msk [vmem:[#allocation3] sm:$0xff] %vm213_vm0, %v1467_v12 }
0x16b1   :  { %v1710_v13 = vld [vmem:[#allocation3] sm:$0xff] }
0x16b2   :  { %1712 = vrot.lane.b32.xlu1 %v1710_v13, %s3788_s2 }
0x171a   :  { %v1472_v14 = vpop.permute.xlu0 %1471 }
0x171b   :  { %1474 = vst.msk [vmem:[#allocation2] sm:$0xff] %vm213_vm0, %v1472_v14  ;;  %1476 = vst.msk [vmem:[#allocation5 + $0x38] sm:$0xff] %vm213_vm0, %v1472_v14 }
0x1722   :  { %v1484_v15 = vld [vmem:[#allocation5 + $0x38] sm:$0xff]  ;;  %v1628_v16 = vld [vmem:[#allocation2] sm:$0xff] }
0x1723   :  { %3077 = vmatmul.mubr.msk.f32.gmra.mrb[20].mxu0 %vm213_vm0, %v1484_v15  ;;  %3088 = vmatmul.mubr.msk.f32.vlgmr.msra.gmra.mrb[14].mxu1 %vm213_vm0, %v1628_v16 }
0x1724   :  { %3271 = vmatpush3.bf16.msra.mxu1 %v4220_v6  ;;  %3098 = vmatprep.mubr.msk.f32.mxu1 %vm3785_vm1, %v3786_v1  ;;  %v1713_v25 = vpop.permute.xlu1 %1712 }
0x1725   :  { %3272 = vmatprep.subr.bf16.mxu1 %v3784_v0  ;;  %3109 = vmatprep.mubr.msk.f32.mxu0 %vm3785_vm1, %v3786_v1 }
0x1728   :  { %3274 = vmatpush3.bf16.msra.mxu1 %v4223_v9 }
0x1729   :  { %3281 = vmatprep.subr.bf16.mxu1 %v3784_v0 }
0x17f6   :  { %v4252_v45 = vpop.f32.mrb[20].mxu0  ;;  %v1698_v20 = vpop.f32.mrb[14].mxu1 }
0x17f7   :  { %v1702_v21 = vadd.f32 %v1698_v20, %v1627_v19  ;;  %v4254_v22 = vpop.f32.mrb[21].mxu0  ;;  %v3089_v23 = vpop.f32.mrb[15].mxu1 }
0x17f9   :  { %3404 = vtanh.f32 %v1702_v21  ;;  %v2779_v33 = vmul.f32 -1.442695, %v1702_v21 }
0x17fb   :  { %3406 = vpow2.f32 %v2779_v33 }
0x1803   :  { %v3405_v28 = vpop.eup %3404 }
0x1804   :  { %1717 = vrot.lane.b32.xlu0 %v3405_v28, %s3787_s11 }
0x1805   :  { %v3407_v57 = vpop.eup %3406 }
0x1806   :  { %v1706_v34 = vadd.f32 1.0, %v3407_v57 }
0x1808   :  { %3408 = vrcp.f32 %v1706_v34 }
0x1812   :  { %v3409_v48 = vpop.eup %3408 }
0x1813   :  { %v1715_v37 = vmul.f32 %v3409_v48, %v1713_v25 }
0x1876   :  { %v1718_v35 = vpop.permute.xlu0 %1717 }
0x1877   :  { %v1720_v36 = vmul.f32 %v3409_v48, %v1718_v35 }
0x1879   :  { %1722 = vrot.lane.b32.xlu0 %v1720_v36, %s3788_s2 }
0x18eb   :  { %v1723_v38 = vpop.permute.xlu0 %1722 }
0x18ec   :  { %v1725_v39 = vadd.f32 %v1723_v38, %v1715_v37  ;;  %v1978_v37 = vadd.f32 %v4194_v27, %v4248_v18 }
0x18ee   :  { %3410 = vtanh.f32 %v1725_v39 }
0x18f8   :  { %v3411_v40 = vpop.eup %3410 }
0x18f9   :  { %1728 = vrot.lane.b32.xlu1 %v3411_v40, %s3787_s11 }
0x18fd   :  { %1733 = vrot.lane.b32.xlu1 %v1725_v39, %s3789_s6 }
0x196b   :  { %v1729_v41 = vpop.permute.xlu1 %1728 }
0x196c   :  { %v1731_v53 = vmul.f32 %v3409_v48, %v1729_v41 }
0x196e   :  { %1738 = vrot.lane.b32.xlu0 %v1731_v53, %s3788_s2 }
0x196f   :  { %v1734_v42 = vpop.permute.xlu1 %1733 }
0x1970   :  { %1736 = vst.msk [vmem:[#allocation3] sm:$0xff] %vm213_vm0, %v1734_v42 }
0x1977   :  { %v1827_v43 = vld [vmem:[#allocation3] sm:$0xff] }
0x1978   :  { %1829 = vrot.lane.b32.xlu1 %v1827_v43, %s3788_s2 }
0x19e0   :  { %v1739_v44 = vpop.permute.xlu0 %1738 }
0x19e1   :  { %1741 = vst.msk [vmem:[#allocation2] sm:$0xff] %vm213_vm0, %v1739_v44  ;;  %1742 = vst.msk [vmem:[#allocation5] sm:$0xff] %vm213_vm0, %v1739_v44 }
0x19e8   :  { %v1745_v46 = vld [vmem:[#allocation2] sm:$0xff] }
0x19e9   :  { %3099 = vmatmul.mubr.msk.f32.vlgmr.msra.gmra.mrb[16].mxu1 %vm213_vm0, %v1745_v46 }
0x19ea   :  { %3283 = vmatpush3.bf16.msra.mxu1 %v4220_v6  ;;  %3120 = vmatprep.mubr.msk.f32.mxu1 %vm3785_vm1, %v3786_v1  ;;  %v1830_v62 = vpop.permute.xlu1 %1829 }
0x19eb   :  { %3284 = vmatprep.subr.bf16.mxu1 %v3784_v0 }
0x19ee   :  { %3286 = vmatpush3.bf16.msra.mxu1 %v4223_v9 }
0x19ef   :  { %3293 = vmatprep.subr.bf16.mxu1 %v3784_v0 }
0x1abc   :  { %v1815_v50 = vpop.f32.mrb[16].mxu1 }
0x1abd   :  { %v1819_v52 = vadd.f32 %v1815_v50, %v1744_v49  ;;  %v3100_v54 = vpop.f32.mrb[17].mxu1 }
0x1abf   :  { %3412 = vtanh.f32 %v1819_v52  ;;  %v2781_v58 = vmul.f32 -1.442695, %v1819_v52 }
0x1ac1   :  { %3414 = vpow2.f32 %v2781_v58 }
0x1ac9   :  { %v3413_v56 = vpop.eup %3412 }
0x1aca   :  { %1834 = vrot.lane.b32.xlu0 %v3413_v56, %s3787_s11 }
0x1acb   :  { %v3415_v59 = vpop.eup %3414 }
0x1acc   :  { %v1823_v26 = vadd.f32 1.0, %v3415_v59 }
0x1ace   :  { %3416 = vrcp.f32 %v1823_v26 }
0x1ad8   :  { %v3417_v60 = vpop.eup %3416 }
0x1ad9   :  { %v1832_v31 = vmul.f32 %v3417_v60, %v1830_v62  ;;  %v2095_v62 = vadd.f32 %v4201_v32, %v4248_v18 }
0x1b3c   :  { %v1835_v61 = vpop.permute.xlu0 %1834 }
0x1b3d   :  { %v1837_v47 = vmul.f32 %v3417_v60, %v1835_v61 }
0x1b3f   :  { %1839 = vrot.lane.b32.xlu0 %v1837_v47, %s3788_s2 }
0x1bb1   :  { %v1840_v24 = vpop.permute.xlu0 %1839 }
0x1bb2   :  { %v1842_v63 = vadd.f32 %v1840_v24, %v1832_v31 }
0x1bb4   :  { %3418 = vtanh.f32 %v1842_v63 }
0x1bbe   :  { %v3419_v2 = vpop.eup %3418 }
0x1bbf   :  { %1845 = vrot.lane.b32.xlu1 %v3419_v2, %s3787_s11 }
0x1bc3   :  { %1850 = vrot.lane.b32.xlu1 %v1842_v63, %s3789_s6 }
0x1c31   :  { %v1846_v3 = vpop.permute.xlu1 %1845 }
0x1c32   :  { %v1848_v51 = vmul.f32 %v3417_v60, %v1846_v3 }
0x1c34   :  { %1855 = vrot.lane.b32.xlu0 %v1848_v51, %s3788_s2 }
0x1c35   :  { %v1851_v55 = vpop.permute.xlu1 %1850 }
0x1c36   :  { %1853 = vst.msk [vmem:[#allocation3] sm:$0xff] %vm213_vm0, %v1851_v55 }
0x1c3d   :  { %v1944_v4 = vld [vmem:[#allocation3] sm:$0xff] }
0x1c3e   :  { %1946 = vrot.lane.b32.xlu1 %v1944_v4, %s3788_s2 }
0x1ca6   :  { %v1856_v5 = vpop.permute.xlu0 %1855 }
0x1ca7   :  { %1858 = vst.msk [vmem:[#allocation2] sm:$0xff] %vm213_vm0, %v1856_v5  ;;  %1859 = vst.msk [vmem:[#allocation5 + $0x8] sm:$0xff] %vm213_vm0, %v1856_v5 }
0x1cae   :  { %v1862_v7 = vld [vmem:[#allocation2] sm:$0xff] }
0x1caf   :  { %3110 = vmatmul.mubr.msk.f32.vlgmr.msra.gmra.mrb[22].mxu0 %vm213_vm0, %v1862_v7 }
0x1cb0   :  { %3289 = vmatpush3.bf16.msra.mxu0 %v4220_v6  ;;  %3131 = vmatprep.mubr.msk.f32.mxu0 %vm3785_vm1, %v3786_v1  ;;  %v1947_v21 = vpop.permute.xlu1 %1946 }
0x1cb1   :  { %3290 = vmatprep.subr.bf16.mxu0 %v3784_v0 }
0x1cb4   :  { %3292 = vmatpush3.bf16.msra.mxu0 %v4223_v9 }
0x1cb5   :  { %3299 = vmatprep.subr.bf16.mxu0 %v3784_v0 }
0x1d82   :  { %v1932_v10 = vpop.f32.mrb[22].mxu0 }
0x1d83   :  { %v1936_v11 = vadd.f32 %v1932_v10, %v1861_v8  ;;  %v3111_v12 = vpop.f32.mrb[23].mxu0 }
0x1d85   :  { %3420 = vtanh.f32 %v1936_v11  ;;  %v2783_v14 = vmul.f32 -1.442695, %v1936_v11 }
0x1d87   :  { %3422 = vpow2.f32 %v2783_v14 }
0x1d8f   :  { %v3421_v13 = vpop.eup %3420 }
0x1d90   :  { %1951 = vrot.lane.b32.xlu0 %v3421_v13, %s3787_s11 }
0x1d91   :  { %v3423_v15 = vpop.eup %3422 }
0x1d92   :  { %v1940_v16 = vadd.f32 1.0, %v3423_v15 }
0x1d94   :  { %3424 = vrcp.f32 %v1940_v16 }
0x1d9e   :  { %v3425_v17 = vpop.eup %3424 }
0x1d9f   :  { %v1949_v23 = vmul.f32 %v3425_v17, %v1947_v21 }
0x1e02   :  { %v1952_v19 = vpop.permute.xlu0 %1951 }
0x1e03   :  { %v1954_v20 = vmul.f32 %v3425_v17, %v1952_v19 }
0x1e05   :  { %1956 = vrot.lane.b32.xlu0 %v1954_v20, %s3788_s2  ;;  %v2212_v20 = vadd.f32 %v4199_v30, %v4248_v18 }
0x1e77   :  { %v1957_v29 = vpop.permute.xlu0 %1956 }
0x1e78   :  { %v1959_v28 = vadd.f32 %v1957_v29, %v1949_v23 }
0x1e7a   :  { %3426 = vtanh.f32 %v1959_v28 }
0x1e84   :  { %v3427_v33 = vpop.eup %3426 }
0x1e85   :  { %1962 = vrot.lane.b32.xlu1 %v3427_v33, %s3787_s11 }
0x1e89   :  { %1967 = vrot.lane.b32.xlu1 %v1959_v28, %s3789_s6 }
0x1ef7   :  { %v1963_v57 = vpop.permute.xlu1 %1962 }
0x1ef8   :  { %v1965_v34 = vmul.f32 %v3425_v17, %v1963_v57 }
0x1efa   :  { %1972 = vrot.lane.b32.xlu0 %v1965_v34, %s3788_s2 }
0x1efb   :  { %v1968_v48 = vpop.permute.xlu1 %1967 }
0x1efc   :  { %1970 = vst.msk [vmem:[#allocation3] sm:$0xff] %vm213_vm0, %v1968_v48 }
0x1f03   :  { %v2061_v35 = vld [vmem:[#allocation3] sm:$0xff] }
0x1f04   :  { %2063 = vrot.lane.b32.xlu1 %v2061_v35, %s3788_s2 }
0x1f6c   :  { %v1973_v36 = vpop.permute.xlu0 %1972 }
0x1f6d   :  { %1975 = vst.msk [vmem:[#allocation2] sm:$0xff] %vm213_vm0, %v1973_v36  ;;  %1976 = vst.msk [vmem:[#allocation5 + $0x10] sm:$0xff] %vm213_vm0, %v1973_v36 }
0x1f74   :  { %v1979_v25 = vld [vmem:[#allocation2] sm:$0xff] }
0x1f75   :  { %3121 = vmatmul.mubr.msk.f32.vlgmr.msra.gmra.mrb[18].mxu1 %vm213_vm0, %v1979_v25  ;;  %v2570_v25 = vld [vmem:[#allocation23] sm:$0xff] }
0x1f76   :  { %3295 = vmatpush3.bf16.msra.mxu1 %v4220_v6  ;;  %3142 = vmatprep.mubr.msk.f32.mxu1 %vm3785_vm1, %v3786_v1  ;;  %v2064_v50 = vpop.permute.xlu1 %2063 }
0x1f77   :  { %3296 = vmatprep.subr.bf16.mxu1 %v3784_v0 }
0x1f7a   :  { %3298 = vmatpush3.bf16.msra.mxu1 %v4223_v9 }
0x1f7b   :  { %3305 = vmatprep.subr.bf16.mxu1 %v3784_v0 }
0x2048   :  { %v2049_v38 = vpop.f32.mrb[18].mxu1 }
0x2049   :  { %v2053_v39 = vadd.f32 %v2049_v38, %v1978_v37  ;;  %v3122_v40 = vpop.f32.mrb[19].mxu1  ;;  %v2571_v37 = vld [vmem:[#allocation23 + $0x8] sm:$0xff] }
0x204a   :  { %v3311_v38 = vpack.c.bf16 %v2571_v37, %v2570_v25 }
0x204b   :  { %3428 = vtanh.f32 %v2053_v39  ;;  %v2785_v53 = vmul.f32 -1.442695, %v2053_v39 }
0x204d   :  { %3430 = vpow2.f32 %v2785_v53 }
0x2055   :  { %v3429_v41 = vpop.eup %3428 }
0x2056   :  { %2068 = vrot.lane.b32.xlu0 %v3429_v41, %s3787_s11 }
0x2057   :  { %v3431_v42 = vpop.eup %3430 }
0x2058   :  { %v2057_v43 = vadd.f32 1.0, %v3431_v42 }
0x205a   :  { %3432 = vrcp.f32 %v2057_v43  ;;  %v2572_v43 = vld [vmem:[#allocation23 + $0x10] sm:$0xff] }
0x2064   :  { %v3433_v44 = vpop.eup %3432 }
0x2065   :  { %v2066_v52 = vmul.f32 %v3433_v44, %v2064_v50  ;;  %v2562_v50 = vld [vmem:[#allocation5] sm:$0xff] }
0x20c8   :  { %v2069_v46 = vpop.permute.xlu0 %2068 }
0x20c9   :  { %v2071_v49 = vmul.f32 %v3433_v44, %v2069_v46 }
0x20cb   :  { %2073 = vrot.lane.b32.xlu0 %v2071_v49, %s3788_s2 }
0x213d   :  { %v2074_v27 = vpop.permute.xlu0 %2073 }
0x213e   :  { %v2076_v54 = vadd.f32 %v2074_v27, %v2066_v52  ;;  %v2563_v52 = vld [vmem:[#allocation5 + $0x8] sm:$0xff]  ;;  %v2564_v27 = vld [vmem:[#allocation5 + $0x10] sm:$0xff] }
0x2140   :  { %3434 = vtanh.f32 %v2076_v54 }
0x214a   :  { %v3435_v56 = vpop.eup %3434 }
0x214b   :  { %2079 = vrot.lane.b32.xlu1 %v3435_v56, %s3787_s11 }
0x214f   :  { %2084 = vrot.lane.b32.xlu1 %v2076_v54, %s3789_s6 }
0x21bd   :  { %v2080_v58 = vpop.permute.xlu1 %2079 }
0x21be   :  { %v2082_v59 = vmul.f32 %v3433_v44, %v2080_v58  ;;  %v2573_v44 = vld [vmem:[#allocation23 + $0x18] sm:$0xff] }
0x21bf   :  { %v3315_v46 = vpack.c.bf16 %v2573_v44, %v2572_v43 }
0x21c0   :  { %2089 = vrot.lane.b32.xlu0 %v2082_v59, %s3788_s2  ;;  %v2329_v59 = vadd.f32 %v4254_v22, %v4248_v18 }
0x21c1   :  { %v2085_v26 = vpop.permute.xlu1 %2084 }
0x21c2   :  { %2087 = vst.msk [vmem:[#allocation3] sm:$0xff] %vm213_vm0, %v2085_v26 }
0x21c9   :  { %v2178_v60 = vld [vmem:[#allocation3] sm:$0xff] }
0x21ca   :  { %2180 = vrot.lane.b32.xlu1 %v2178_v60, %s3788_s2 }
0x2232   :  { %v2090_v61 = vpop.permute.xlu0 %2089 }
0x2233   :  { %2092 = vst.msk [vmem:[#allocation2] sm:$0xff] %vm213_vm0, %v2090_v61  ;;  %2093 = vst.msk [vmem:[#allocation5 + $0x18] sm:$0xff] %vm213_vm0, %v2090_v61 }
0x223a   :  { %v2096_v47 = vld [vmem:[#allocation2] sm:$0xff]  ;;  %v2565_v54 = vld [vmem:[#allocation5 + $0x18] sm:$0xff] }
0x223b   :  { %3132 = vmatmul.mubr.msk.f32.vlgmr.msra.gmra.mrb[24].mxu0 %vm213_vm0, %v2096_v47  ;;  %v4362_v47 = vld [vmem:[#allocation24] ss:$0 sm:$0xff] }
0x223c   :  { %3301 = vmatpush3.bf16.msra.mxu0 %v4220_v6  ;;  %3153 = vmatprep.mubr.msk.f32.mxu0 %vm3785_vm1, %v3786_v1  ;;  %v2181_v8 = vpop.permute.xlu1 %2180 }
0x223d   :  { %3302 = vmatprep.subr.bf16.mxu0 %v3784_v0 }
0x2240   :  { %3304 = vmatpush3.bf16.msra.mxu0 %v4223_v9 }
0x2241   :  { %3312 = vmatprep.subr.bf16.mxu0 %v3311_v38 }
0x230e   :  { %v2166_v31 = vpop.f32.mrb[24].mxu0 }
0x230f   :  { %v2170_v24 = vadd.f32 %v2166_v31, %v2095_v62  ;;  %v3133_v63 = vpop.f32.mrb[25].mxu0 }
0x2311   :  { %3436 = vtanh.f32 %v2170_v24  ;;  %v2787_v3 = vmul.f32 -1.442695, %v2170_v24 }
0x2313   :  { %3438 = vpow2.f32 %v2787_v3 }
0x231b   :  { %v3437_v2 = vpop.eup %3436 }
0x231c   :  { %2185 = vrot.lane.b32.xlu0 %v3437_v2, %s3787_s11 }
0x231d   :  { %v3439_v51 = vpop.eup %3438 }
0x231e   :  { %v2174_v55 = vadd.f32 1.0, %v3439_v51 }
0x2320   :  { %3440 = vrcp.f32 %v2174_v55 }
0x232a   :  { %v3441_v4 = vpop.eup %3440 }
0x232b   :  { %v2183_v10 = vmul.f32 %v3441_v4, %v2181_v8 }
0x238e   :  { %v2186_v5 = vpop.permute.xlu0 %2185 }
0x238f   :  { %v2188_v7 = vmul.f32 %v3441_v4, %v2186_v5 }
0x2391   :  { %2190 = vrot.lane.b32.xlu0 %v2188_v7, %s3788_s2 }
0x2403   :  { %v2191_v32 = vpop.permute.xlu0 %2190 }
0x2404   :  { %v2193_v11 = vadd.f32 %v2191_v32, %v2183_v10 }
0x2406   :  { %3442 = vtanh.f32 %v2193_v11 }
0x2410   :  { %v3443_v12 = vpop.eup %3442 }
0x2411   :  { %2196 = vrot.lane.b32.xlu1 %v3443_v12, %s3787_s11 }
0x2415   :  { %2201 = vrot.lane.b32.xlu1 %v2193_v11, %s3789_s6 }
0x2483   :  { %v2197_v13 = vpop.permute.xlu1 %2196 }
0x2484   :  { %v2199_v14 = vmul.f32 %v3441_v4, %v2197_v13 }
0x2486   :  { %2206 = vrot.lane.b32.xlu0 %v2199_v14, %s3788_s2 }
0x2487   :  { %v2202_v15 = vpop.permute.xlu1 %2201 }
0x2488   :  { %2204 = vst.msk [vmem:[#allocation3] sm:$0xff] %vm213_vm0, %v2202_v15 }
0x248f   :  { %v2295_v16 = vld [vmem:[#allocation3] sm:$0xff] }
0x2490   :  { %2297 = vrot.lane.b32.xlu1 %v2295_v16, %s3788_s2 }
0x24f8   :  { %v2207_v17 = vpop.permute.xlu0 %2206 }
0x24f9   :  { %2209 = vst.msk [vmem:[#allocation2] sm:$0xff] %vm213_vm0, %v2207_v17  ;;  %2210 = vst.msk [vmem:[#allocation5 + $0x20] sm:$0xff] %vm213_vm0, %v2207_v17 }
0x2500   :  { %v2213_v19 = vld [vmem:[#allocation2] sm:$0xff]  ;;  %v2566_v56 = vld [vmem:[#allocation5 + $0x20] sm:$0xff] }
0x2501   :  { %3143 = vmatmul.mubr.msk.f32.vlgmr.msra.gmra.mrb[20].mxu1 %vm213_vm0, %v2213_v19 }
0x2502   :  { %3307 = vmatpush3.bf16.msra.mxu1 %v4220_v6  ;;  %3164 = vmatprep.mubr.msk.f32.mxu1 %vm3785_vm1, %v3786_v1 }
0x2503   :  { %3308 = vmatprep.subr.bf16.mxu1 %v3784_v0 }
0x2506   :  { %3310 = vmatpush3.bf16.msra.mxu1 %v4223_v9  ;;  %v2298_v9 = vpop.permute.xlu1 %2297 }
0x25d4   :  { %v2283_v21 = vpop.f32.mrb[20].mxu1 }
0x25d5   :  { %v2287_v23 = vadd.f32 %v2283_v21, %v2212_v20  ;;  %v3144_v29 = vpop.f32.mrb[21].mxu1 }
0x25d7   :  { %3444 = vtanh.f32 %v2287_v23  ;;  %v2789_v33 = vmul.f32 -1.442695, %v2287_v23 }
0x25d9   :  { %3446 = vpow2.f32 %v2789_v33 }
0x25e1   :  { %v3445_v28 = vpop.eup %3444 }
0x25e2   :  { %2302 = vrot.lane.b32.xlu0 %v3445_v28, %s3787_s11 }
0x25e3   :  { %v3447_v6 = vpop.eup %3446 }
0x25e4   :  { %v2291_v57 = vadd.f32 1.0, %v3447_v6 }
0x25e6   :  { %3448 = vrcp.f32 %v2291_v57 }
0x25f0   :  { %v3449_v1 = vpop.eup %3448 }
0x25f1   :  { %v2300_v48 = vmul.f32 %v3449_v1, %v2298_v9 }
0x2654   :  { %v2303_v34 = vpop.permute.xlu0 %2302 }
0x2655   :  { %v2305_v0 = vmul.f32 %v3449_v1, %v2303_v34 }
0x2657   :  { %2307 = vrot.lane.b32.xlu0 %v2305_v0, %s3788_s2 }
0x26c9   :  { %v2308_v30 = vpop.permute.xlu0 %2307 }
0x26ca   :  { %v2310_v35 = vadd.f32 %v2308_v30, %v2300_v48 }
0x26cc   :  { %3450 = vtanh.f32 %v2310_v35 }
0x26d6   :  { %v3451_v36 = vpop.eup %3450 }
0x26d7   :  { %2313 = vrot.lane.b32.xlu1 %v3451_v36, %s3787_s11 }
0x26db   :  { %2318 = vrot.lane.b32.xlu1 %v2310_v35, %s3789_s6 }
0x2749   :  { %v2314_v39 = vpop.permute.xlu1 %2313 }
0x274a   :  { %v2316_v40 = vmul.f32 %v3449_v1, %v2314_v39  ;;  %v2446_v1 = vadd.f32 %v4252_v45, %v4248_v18 }
0x274c   :  { %2323 = vrot.lane.b32.xlu0 %v2316_v40, %s3788_s2 }
0x274d   :  { %v2319_v41 = vpop.permute.xlu1 %2318 }
0x274e   :  { %2321 = vst.msk [vmem:[#allocation3] sm:$0xff] %vm213_vm0, %v2319_v41 }
0x2755   :  { %v2412_v53 = vld [vmem:[#allocation3] sm:$0xff] }
0x2756   :  { %2414 = vrot.lane.b32.xlu1 %v2412_v53, %s3788_s2 }
0x27be   :  { %v2324_v42 = vpop.permute.xlu0 %2323 }
0x27bf   :  { %2326 = vst.msk [vmem:[#allocation2] sm:$0xff] %vm213_vm0, %v2324_v42  ;;  %2327 = vst.msk [vmem:[#allocation5 + $0x28] sm:$0xff] %vm213_vm0, %v2324_v42 }
0x27c6   :  { %v2330_v49 = vld [vmem:[#allocation2] sm:$0xff]  ;;  %v2567_v58 = vld [vmem:[#allocation5 + $0x28] sm:$0xff] }
0x27c7   :  { %3154 = vmatmul.mubr.msk.f32.vlgmr.msra.gmra.mrb[26].mxu0 %vm213_vm0, %v2330_v49 }
0x27c8   :  { %3314 = vmatpush3.bf16.msra.mxu0 %v3311_v38  ;;  %3175 = vmatprep.mubr.msk.f32.mxu0 %vm213_vm0, %v2562_v50  ;;  %v2415_v15 = vpop.permute.xlu1 %2414 }
0x27c9   :  { %3316 = vmatprep.subr.bf16.mxu0 %v3315_v46 }
0x27cc   :  { %3318 = vmatpush3.bf16.msra.mxu0 %v3315_v46 }
0x27cf   :  { %3176 = vmatmul.mubr.msk.f32.vlgmr.msra.gmra.mrb[28].mxu0 %vm213_vm0, %v2563_v52 }
0x27d0   :  { %3178 = vmatprep.mubr.msk.f32.mxu0 %vm213_vm0, %v2564_v27 }
0x27d3   :  { %3179 = vmatmul.mubr.msk.f32.gmra.mrb[30].mxu0 %vm213_vm0, %v2565_v54 }
0x27d4   :  { %3181 = vmatprep.mubr.msk.f32.mxu0 %vm213_vm0, %v2566_v56 }
0x27d7   :  { %3182 = vmatmul.mubr.msk.f32.gmra.mrb[32].mxu0 %vm213_vm0, %v2567_v58 }
0x289a   :  { %v2400_v26 = vpop.f32.mrb[26].mxu0 }
0x289b   :  { %v2404_v60 = vadd.f32 %v2400_v26, %v2329_v59  ;;  %v3155_v61 = vpop.f32.mrb[27].mxu0 }
0x289d   :  { %3452 = vtanh.f32 %v2404_v60  ;;  %v2791_v10 = vmul.f32 -1.442695, %v2404_v60 }
0x289f   :  { %3454 = vpow2.f32 %v2791_v10 }
0x28a2   :  { %v3177_v62 = vpop.f32.mrb[28].mxu0 }
0x28a3   :  { %v2678_v31 = vadd.f32 %v3177_v62, %v4362_v47  ;;  %v2672_v24 = vpop.f32.mrb[29].mxu0 }
0x28a4   :  { %v2673_v63 = vadd.f32 %v4362_v47, %v2672_v24 }
0x28a5   :  { %2712 = vst [vmem:[#allocation26 + $0x8] sm:$0xff] %v2678_v31 }
0x28a6   :  { %2711 = vst [vmem:[#allocation26] sm:$0xff] %v2673_v63  ;;  %v3180_v2 = vpop.f32.mrb[30].mxu0 }
0x28a7   :  { %v3453_v3 = vpop.eup %3452  ;;  %v2688_v51 = vadd.f32 %v3180_v2, %v4362_v47  ;;  %v2682_v55 = vpop.f32.mrb[31].mxu0 }
0x28a8   :  { %v2683_v22 = vadd.f32 %v4362_v47, %v2682_v55  ;;  %2419 = vrot.lane.b32.xlu0 %v3453_v3, %s3787_s11 }
0x28a9   :  { %2714 = vst [vmem:[#allocation26 + $0x18] sm:$0xff] %v2688_v51  ;;  %v3455_v32 = vpop.eup %3454 }
0x28aa   :  { %2713 = vst [vmem:[#allocation26 + $0x10] sm:$0xff] %v2683_v22  ;;  %v3183_v4 = vpop.f32.mrb[32].mxu0  ;;  %v2408_v11 = vadd.f32 1.0, %v3455_v32 }
0x28ab   :  { %v2698_v5 = vadd.f32 %v3183_v4, %v4362_v47  ;;  %v2692_v7 = vpop.f32.mrb[33].mxu0 }
0x28ac   :  { %v2693_v8 = vadd.f32 %v4362_v47, %v2692_v7  ;;  %3456 = vrcp.f32 %v2408_v11 }
0x28ad   :  { %2716 = vst [vmem:[#allocation26 + $0x28] sm:$0xff] %v2698_v5 }
0x28ae   :  { %2715 = vst [vmem:[#allocation26 + $0x20] sm:$0xff] %v2693_v8 }
0x28b6   :  { %v3457_v12 = vpop.eup %3456 }
0x28b7   :  { %v2417_v16 = vmul.f32 %v3457_v12, %v2415_v15 }
0x291a   :  { %v2420_v13 = vpop.permute.xlu0 %2419 }
0x291b   :  { %v2422_v14 = vmul.f32 %v3457_v12, %v2420_v13 }
0x291d   :  { %2424 = vrot.lane.b32.xlu0 %v2422_v14, %s3788_s2 }
0x298f   :  { %v2425_v17 = vpop.permute.xlu0 %2424 }
0x2990   :  { %v2427_v19 = vadd.f32 %v2425_v17, %v2417_v16 }
0x2992   :  { %3458 = vtanh.f32 %v2427_v19 }
0x299c   :  { %v3459_v20 = vpop.eup %3458 }
0x299d   :  { %2430 = vrot.lane.b32.xlu1 %v3459_v20, %s3787_s11 }
0x29a1   :  { %2435 = vrot.lane.b32.xlu1 %v2427_v19, %s3789_s6 }
0x2a0f   :  { %v2431_v21 = vpop.permute.xlu1 %2430 }
0x2a10   :  { %v2433_v23 = vmul.f32 %v3457_v12, %v2431_v21 }
0x2a12   :  { %2440 = vrot.lane.b32.xlu0 %v2433_v23, %s3788_s2 }
0x2a13   :  { %v2436_v29 = vpop.permute.xlu1 %2435 }
0x2a14   :  { %2438 = vst.msk [vmem:[#allocation3] sm:$0xff] %vm213_vm0, %v2436_v29 }
0x2a1b   :  { %v2529_v28 = vld [vmem:[#allocation3] sm:$0xff] }
0x2a1c   :  { %2531 = vrot.lane.b32.xlu1 %v2529_v28, %s3788_s2 }
0x2a84   :  { %v2441_v33 = vpop.permute.xlu0 %2440 }
0x2a85   :  { %2443 = vst.msk [vmem:[#allocation2] sm:$0xff] %vm213_vm0, %v2441_v33  ;;  %2444 = vst.msk [vmem:[#allocation5 + $0x30] sm:$0xff] %vm213_vm0, %v2441_v33 }
0x2a8c   :  { %v2447_v6 = vld [vmem:[#allocation2] sm:$0xff] }
0x2a8d   :  { %v2568_v57 = vld [vmem:[#allocation5 + $0x30] sm:$0xff]  ;;  %3165 = vmatmul.mubr.msk.f32.vlgmr.msra.gmra.mrb[22].mxu1 %vm213_vm0, %v2447_v6 }
0x2a8e   :  { %3184 = vmatprep.mubr.msk.f32.mxu0 %vm213_vm0, %v2568_v57  ;;  %v2532_v39 = vpop.permute.xlu1 %2531 }
0x2b60   :  { %v2517_v34 = vpop.f32.mrb[22].mxu1 }
0x2b61   :  { %v2521_v0 = vadd.f32 %v2517_v34, %v2446_v1  ;;  %v3166_v9 = vpop.f32.mrb[23].mxu1 }
0x2b63   :  { %3460 = vtanh.f32 %v2521_v0  ;;  %v2793_v30 = vmul.f32 -1.442695, %v2521_v0 }
0x2b65   :  { %3462 = vpow2.f32 %v2793_v30 }
0x2b6d   :  { %v3461_v48 = vpop.eup %3460 }
0x2b6e   :  { %2536 = vrot.lane.b32.xlu0 %v3461_v48, %s3787_s11 }
0x2b6f   :  { %v3463_v35 = vpop.eup %3462 }
0x2b70   :  { %v2525_v36 = vadd.f32 1.0, %v3463_v35 }
0x2b72   :  { %3464 = vrcp.f32 %v2525_v36 }
0x2b7c   :  { %v3465_v25 = vpop.eup %3464 }
0x2b7d   :  { %v2534_v40 = vmul.f32 %v3465_v25, %v2532_v39 }
0x2be0   :  { %v2537_v37 = vpop.permute.xlu0 %2536 }
0x2be1   :  { %v2539_v38 = vmul.f32 %v3465_v25, %v2537_v37 }
0x2be3   :  { %2541 = vrot.lane.b32.xlu0 %v2539_v38, %s3788_s2 }
0x2c55   :  { %v2542_v18 = vpop.permute.xlu0 %2541 }
0x2c56   :  { %v2544_v45 = vadd.f32 %v2542_v18, %v2534_v40 }
0x2c58   :  { %3466 = vtanh.f32 %v2544_v45 }
0x2c62   :  { %v3467_v41 = vpop.eup %3466 }
0x2c63   :  { %2547 = vrot.lane.b32.xlu1 %v3467_v41, %s3787_s11 }
0x2c67   :  { %2552 = vrot.lane.b32.xlu1 %v2544_v45, %s3789_s6 }
0x2cd5   :  { %v2548_v53 = vpop.permute.xlu1 %2547 }
0x2cd6   :  { %v2550_v42 = vmul.f32 %v3465_v25, %v2548_v53 }
0x2cd8   :  { %2557 = vrot.lane.b32.xlu0 %v2550_v42, %s3788_s2 }
0x2cd9   :  { %v2553_v43 = vpop.permute.xlu1 %2552 }
0x2cda   :  { %2555 = vst.msk [vmem:[#allocation3] sm:$0xff] %vm213_vm0, %v2553_v43 }
0x2d4a   :  { %v2558_v44 = vpop.permute.xlu0 %2557 }
0x2d4b   :  { %2560 = vst.msk [vmem:[#allocation2] sm:$0xff] %vm213_vm0, %v2558_v44  ;;  %2561 = vst.msk [vmem:[#allocation5 + $0x38] sm:$0xff] %vm213_vm0, %v2558_v44 }
0x2d52   :  { %v2569_v46 = vld [vmem:[#allocation5 + $0x38] sm:$0xff] }
0x2d53   :  { %3185 = vmatmul.mubr.msk.f32.gmra.mrb[34].mxu0 %vm213_vm0, %v2569_v46 }
0x2e26   :  { %v3186_v49 = vpop.f32.mrb[34].mxu0 }
0x2e27   :  { %v2708_v50 = vadd.f32 %v3186_v49, %v4362_v47  ;;  %v2702_v52 = vpop.f32.mrb[35].mxu0 }
0x2e28   :  { %v2703_v27 = vadd.f32 %v4362_v47, %v2702_v52 }
0x2e29   :  { %2718 = vst [vmem:[#allocation26 + $0x38] sm:$0xff] %v2708_v50 }
0x2e2a   :  { %2717 = vst [vmem:[#allocation26 + $0x30] sm:$0xff] %v2703_v27 }
0x2e2b   :  { %3743 = shalt.err (!%p3740_p2)
}
0x2e2c   :  { %s3744_s22 = scalar_lea.hbm %s4421_s12, 1024 }
0x2e2d   :  { %p3745_p3 = scmp.ne.s32.totalorder %s4421_s12, %s3744_s22  ;;  %p3748_p4 = scmp.lt.u32.totalorder %s3744_s22, %s4421_s12 }
0x2e2f   :  { %p3750_p5 = pnand %p3748_p4, %p3745_p3 }
0x2e31   :  { %3753 = shalt.err (!%p3750_p5)
}
0x2e32   :  { %2730 = dma.vmem_to_hbm [thread:$0]  %s2725_s17, 1024, %s4421_s12, [#allocation8], %s3771_s13, %s3771_s13, %s3772_s14  }
0x2e33   :  { %3768 = dma.done.wait [#allocation8], 1024  }
0x2e34   :  { %3769 = vsyncadd [#allocation8], 4294966272 }
0x2e35   :  { %2734 = vsyncpa [#allocation7], 1 }
0x2e36   :  { %2735 = vsyncpa [#allocation10], 1 }
0x2e37   :  { %2736 = vsyncpa [#allocation13], 1 }
0x2e38   :  { %2737 = vsyncpa [#allocation16], 1 }
0x2e39   :  { %2738 = vsyncpa [#allocation19], 1 }
0x2e3a   :  { %2739 = vsyncpa [#allocation22], 1 }
0x2e3b   :  { %2740 = vsyncpa [#allocation25], 1 }
0x2e3c   :  { %2741 = vsyncpa [#allocation8], 1 }

</bundles_post_ra>
